<compile_context>
chip_gen: v6e
topology: v6e:2x2x1
jax: 0.10.0
libtpu: 0.0.40
codegen_flags: <defaults>
</compile_context>

<pallas_src>
import functools

import numpy as np
import jax
import jax.numpy as jnp
from jax.experimental import pallas as pl
from jax.experimental.pallas import tpu as pltpu

# ---------------------------- model constants ------------------------------
K = 5                       # conv kernel size (both convs)
H = W = 32                  # CIFAR-10 spatial size required by fc1 = Linear(16*5*5, .)
C0, C1, C2 = 3, 6, 16       # channels: input, conv1 out, conv2 out
HID1, HID2 = 120, 84        # fc hidden sizes
HP1 = (H - K + 1) // 2      # 14  (pooled height/width after stage 1)
HP2 = (HP1 - K + 1) // 2    # 5   (pooled height/width after stage 2; == K, used by fc1 fusion)

VMEM_SPEC = pl.BlockSpec(memory_space=pltpu.MemorySpace.VMEM)


# ------------------------------ fused kernel -------------------------------

def _convnet_fused_kernel(
    x_ref,                                   # (B*32, 32*3) f32   rows=(b,y), lanes=(x,c)
    m1_ref, b1_ref,                          # (5, 96, 168) cd, (1, 168) f32
    sy1e_ref, sy1o_ref, sx1e_ref, sx1o_ref,  # pool1 even/odd row & lane one-hot selectors
    m2_ref, b2_ref,                          # (5, 84, 160) cd, (1, 160) f32
    sy2e_ref, sy2o_ref, sx2e_ref, sx2o_ref,  # pool2 even/odd row & lane one-hot selectors
    w1_ref, fb1_ref,                         # (5, 80, 120) cd, (1, 120) f32
    w2_ref, fb2_ref,                         # (120, 84) cd, (1, 84) f32
    w3_ref, fb3_ref,                         # (84, ncls) cd, (1, ncls) f32
    qsel_ref,                                # (B, B*5-4) cd     final valid-row selector
    out_ref,                                 # (B, ncls) f32
    p1_scr, p2_scr,                          # VMEM scratch (B*14, 84) / (B*5, 80), compute dtype
    *, nb):

    def mm(a, b):
        # MXU matmul; activations are cast to the weight compute dtype (bf16 or
        # f32), accumulation is always f32.
        return jnp.dot(a.astype(b.dtype), b, preferred_element_type=jnp.float32)

    def conv_relu(src_ref, m_ref, bias, rows_keep):
        # "valid" 5-tap window along the row (y) axis: 5 ref-sliced matmuls
        # against banded weight matrices.  Rows whose window crosses an image
        # boundary hold garbage and are never picked up by the selectors.
        acc = mm(src_ref[pl.ds(0, rows_keep), :], m_ref[0])
        for ky in range(1, K):
            acc = acc + mm(src_ref[pl.ds(ky, rows_keep), :], m_ref[ky])
        return jnp.maximum(acc + bias, 0.0)            # bias + ReLU fused

    def maxpool(act, sye, syo, sxe, sxo):
        # 2x2 max-pool via 4 one-hot selector matmuls + 2 element-wise maxes.
        # No lane/sublane-misaligned value slices on the critical path.
        act = act.astype(sxe.dtype)
        col = jnp.maximum(mm(act, sxe), mm(act, sxo))   # max over x pair
        col = col.astype(sye.dtype)
        return jnp.maximum(mm(sye, col), mm(syo, col))  # max over y pair

    # ---- stage 1: conv1 + ReLU + 2x2 max-pool ----
    act1 = conv_relu(x_ref, m1_ref, b1_ref[...], nb * H - (K - 1))         # (B*32-4, 28*6)
    p1_scr[...] = maxpool(act1, sy1e_ref[...], sy1o_ref[...],
                          sx1e_ref[...], sx1o_ref[...]).astype(p1_scr.dtype)

    # ---- stage 2: conv2 + ReLU + 2x2 max-pool ----
    act2 = conv_relu(p1_scr, m2_ref, b2_ref[...], nb * HP1 - (K - 1))      # (B*14-4, 10*16)
    p2_scr[...] = maxpool(act2, sy2e_ref[...], sy2o_ref[...],
                          sx2e_ref[...], sx2o_ref[...]).astype(p2_scr.dtype)

    # ---- flatten + fc1 + ReLU ----
    # The pooled map has HP2 == K rows per image, so flatten+fc1 is the same
    # "5 shifted matmuls" pattern with the re-ordered fc1 weight.
    z = conv_relu(p2_scr, w1_ref, fb1_ref[...], nb * HP2 - (K - 1))        # (B*5-4, 120)

    # ---- early downselect: keep the one valid row per image ----
    zb = mm(qsel_ref[...], z)                                              # (B, 120)

    # ---- fc2 + ReLU, fc3 ----
    zb = jnp.maximum(mm(zb, w2_ref[...]) + fb2_ref[...], 0.0)              # (B, 84)
    out_ref[...] = (mm(zb, w3_ref[...]) + fb3_ref[...]).astype(out_ref.dtype)


# ------------------------- host-side parameter prep ------------------------

def init_params(key, num_classes=10):
    """Deterministic init mimicking PyTorch default U(-1/sqrt(fan_in), +)."""
    def uniform(k, shape, fan_in):
        bound = 1.0 / float(fan_in) ** 0.5
        return jax.random.uniform(k, shape, jnp.float32, -bound, bound)

    ks = jax.random.split(key, 10)
    return {
        "conv1_w": uniform(ks[0], (C1, C0, K, K), C0 * K * K),
        "conv1_b": uniform(ks[1], (C1,), C0 * K * K),
        "conv2_w": uniform(ks[2], (C2, C1, K, K), C1 * K * K),
        "conv2_b": uniform(ks[3], (C2,), C1 * K * K),
        "fc1_w": uniform(ks[4], (HID1, C2 * HP2 * HP2), C2 * HP2 * HP2),
        "fc1_b": uniform(ks[5], (HID1,), C2 * HP2 * HP2),
        "fc2_w": uniform(ks[6], (HID2, HID1), HID1),
        "fc2_b": uniform(ks[7], (HID2,), HID1),
        "fc3_w": uniform(ks[8], (num_classes, HID2), HID2),
        "fc3_b": uniform(ks[9], (num_classes,), HID2),
    }


def prepare_params(params, batch, compute_dtype=jnp.bfloat16):
    """One-time host-side repack of PyTorch-layout params into the matrices the
    fused kernel consumes.  MXU operands (banded conv weights, fc weights and
    one-hot selectors) are stored at `compute_dtype` (bf16 by default; one-hot
    selectors are exact in bf16); biases stay f32."""
    f32 = np.float32
    nb = batch
    wo1 = W - K + 1                    # 28 (conv1 output width)
    wo2 = HP1 - K + 1                  # 10 (conv2 output width)

    def banded_conv_matrix(w, win, cin, cout):
        # M[ky, xi*cin + ci, xo*cout + co] = w[co, ci, ky, xi - xo] for 0 <= xi-xo < K
        w_np = np.asarray(w, f32)                       # (cout, cin, K, K)
        wout = win - K + 1
        m = np.zeros((K, win * cin, wout * cout), f32)
        for ky in range(K):
            for kx in range(K):
                blk = w_np[:, :, ky, kx].T              # (cin, cout)
                for xo in range(wout):
                    xi = xo + kx
                    m[ky, xi * cin:(xi + 1) * cin, xo * cout:(xo + 1) * cout] = blk
        return m

    def row_selectors(h_raster, hp):
        # even/odd: pick conv-output rows (b*h_raster + 2*py) / (... + 2*py + 1)
        nrows_act = nb * h_raster - (K - 1)
        se = np.zeros((nb * hp, nrows_act), f32)
        so = np.zeros((nb * hp, nrows_act), f32)
        for b in range(nb):
            for py in range(hp):
                se[b * hp + py, b * h_raster + 2 * py] = 1.0
                so[b * hp + py, b * h_raster + 2 * py + 1] = 1.0
        return se, so

    def col_selectors(w_conv, c):
        # even/odd: pick lanes (2*px)*c + ch / (2*px + 1)*c + ch
        se = np.zeros((w_conv * c, (w_conv // 2) * c), f32)
        so = np.zeros((w_conv * c, (w_conv // 2) * c), f32)
        for px in range(w_conv // 2):
            for ch in range(c):
                se[(2 * px) * c + ch, px * c + ch] = 1.0
                so[(2 * px + 1) * c + ch, px * c + ch] = 1.0
        return se, so

    # fc1: torch flatten order is (c, y, x); pooled layout is rows=(b,y), lanes=(x,c).
    w1 = np.asarray(params["fc1_w"], f32)                                    # (120, 400)
    w1r = w1.reshape(HID1, C2, HP2, HP2).transpose(2, 3, 1, 0)               # (y, x, c, j)
    w1r = w1r.reshape(HP2, HP2 * C2, HID1)                                   # (5, 80, 120)

    qsel = np.zeros((nb, nb * HP2 - (K - 1)), f32)
    for b in range(nb):
        qsel[b, b * HP2] = 1.0

    sy1e, sy1o = row_selectors(H, HP1)
    sx1e, sx1o = col_selectors(wo1, C1)
    sy2e, sy2o = row_selectors(HP1, HP2)
    sx2e, sx2o = col_selectors(wo2, C2)

    mxu_operands = {
        "m1": banded_conv_matrix(params["conv1_w"], W, C0, C1),              # (5, 96, 168)
        "sy1e": sy1e, "sy1o": sy1o,                                          # (28, 60)
        "sx1e": sx1e, "sx1o": sx1o,                                          # (168, 84)
        "m2": banded_conv_matrix(params["conv2_w"], HP1, C1, C2),            # (5, 84, 160)
        "sy2e": sy2e, "sy2o": sy2o,                                          # (10, 24)
        "sx2e": sx2e, "sx2o": sx2o,                                          # (160, 80)
        "w1r": w1r,                                                          # (5, 80, 120)
        "w2t": np.asarray(params["fc2_w"], f32).T,                           # (120, 84)
        "w3t": np.asarray(params["fc3_w"], f32).T,                           # (84, ncls)
        "qsel": qsel,                                                        # (B, B*5-4)
    }
    biases = {
        "b1": np.tile(np.asarray(params["conv1_b"], f32), wo1)[None, :],     # (1, 168)
        "b2": np.tile(np.asarray(params["conv2_b"], f32), wo2)[None, :],     # (1, 160)
        "fb1": np.asarray(params["fc1_b"], f32)[None, :],                    # (1, 120)
        "fb2": np.asarray(params["fc2_b"], f32)[None, :],                    # (1, 84)
        "fb3": np.asarray(params["fc3_b"], f32)[None, :],                    # (1, ncls)
    }
    prep = {k: jnp.asarray(v, compute_dtype) for k, v in mxu_operands.items()}
    prep.update({k: jnp.asarray(v, jnp.float32) for k, v in biases.items()})
    return prep


# --------------------------------- forward ---------------------------------

def convnet_cifar10_forward(prep, x_nhwc):
    """x_nhwc: (B, 32, 32, 3) float32 channels-last -> (B, num_classes) float32.

    (NCHW callers: transpose once with x.transpose(0, 2, 3, 1), ideally outside
    jit, so the in-jit reshape below stays a free view.)"""
    nb = x_nhwc.shape[0]
    num_classes = prep["w3t"].shape[1]
    compute_dtype = prep["m1"].dtype
    x2d = x_nhwc.reshape(nb * H, W * C0)          # free view: rows=(b,y), lanes=(x,c)

    kernel = functools.partial(_convnet_fused_kernel, nb=nb)
    cost = pl.CostEstimate(flops=10_000_000 * nb, transcendentals=0,
                           bytes_accessed=600_000 + 13_000 * nb)
    return pl.pallas_call(
        kernel,
        out_shape=jax.ShapeDtypeStruct((nb, num_classes), jnp.float32),
        in_specs=[VMEM_SPEC] * 20,
        out_specs=VMEM_SPEC,
        scratch_shapes=[
            pltpu.VMEM((nb * HP1, HP1 * C1), compute_dtype),   # pooled stage-1 map
            pltpu.VMEM((nb * HP2, HP2 * C2), compute_dtype),   # pooled stage-2 map
        ],
        cost_estimate=cost,
    )(x2d,
      prep["m1"], prep["b1"],
      prep["sy1e"], prep["sy1o"], prep["sx1e"], prep["sx1o"],
      prep["m2"], prep["b2"],
      prep["sy2e"], prep["sy2o"], prep["sx2e"], prep["sx2o"],
      prep["w1r"], prep["fb1"], prep["w2t"], prep["fb2"],
      prep["w3t"], prep["fb3"], prep["qsel"])


# ------------------------ pure-JAX reference (check) ------------------------

def _reference_forward(params, x_nchw):
    def conv(x, w, b):
        y = jax.lax.conv_general_dilated(
            x, w, window_strides=(1, 1), padding="VALID",
            dimension_numbers=("NCHW", "OIHW", "NCHW"))
        return y + b[None, :, None, None]

    def pool(x):
        b, c, h, w = x.shape
        return x.reshape(b, c, h // 2, 2, w // 2, 2).max(axis=(3, 5))

    x = pool(jax.nn.relu(conv(x_nchw, params["conv1_w"], params["conv1_b"])))
    x = pool(jax.nn.relu(conv(x, params["conv2_w"], params["conv2_b"])))
    x = x.reshape(x.shape[0], -1)
    x = jax.nn.relu(x @ params["fc1_w"].T + params["fc1_b"])
    x = jax.nn.relu(x @ params["fc2_w"].T + params["fc2_b"])
    return x @ params["fc3_w"].T + params["fc3_b"]


# ----------------------------------- main -----------------------------------

if __name__ == "__main__":
    key = jax.random.PRNGKey(0)
    k_param, k_x = jax.random.split(key)
    num_classes = 10
    batch = 2

    params = init_params(k_param, num_classes)

    # Spatial size must be 32 so that fc1's 16*5*5 input matches (28->14->10->5).
    x_nchw = jax.random.normal(k_x, (batch, 3, 32, 32), dtype=jnp.float32)
    # One-time channels-last relayout OUTSIDE jit; the kernel-side reshape is free.
    x_nhwc = jnp.transpose(x_nchw, (0, 2, 3, 1))

    fwd = jax.jit(convnet_cifar10_forward)
    ref = jax.block_until_ready(_reference_forward(params, x_nchw))

    # 1) exact-parity check: f32 weights path vs plain-JAX/XLA reference
    prep_f32 = prepare_params(params, batch, compute_dtype=jnp.float32)
    out_f32 = jax.block_until_ready(fwd(prep_f32, x_nhwc))
    assert out_f32.shape == (batch, num_classes), out_f32.shape
    assert out_f32.dtype == jnp.float32, out_f32.dtype
    assert jnp.allclose(out_f32, ref, atol=1e-3, rtol=1e-3), \
        float(jnp.max(jnp.abs(out_f32 - ref)))

    # 2) fast path: bf16 MXU operands (host-precast weights/selectors), f32 accumulation
    prep_bf16 = prepare_params(params, batch, compute_dtype=jnp.bfloat16)
    out = jax.block_until_ready(fwd(prep_bf16, x_nhwc))
    assert out.shape == (batch, num_classes), out.shape
    assert out.dtype == jnp.float32, out.dtype
    assert jnp.allclose(out, ref, atol=5e-2, rtol=5e-2), \
        float(jnp.max(jnp.abs(out - ref)))

    print("KERNEL_OK")
</pallas_src>

<mosaic_0001>
module attributes {stable_mosaic.version = 11 : i64} {
  func.func @_convnet_fused_kernel(%arg0: memref<64x96xf32, #tpu.memory_space<vmem>>, %arg1: memref<5x96x168xf32, #tpu.memory_space<vmem>>, %arg2: memref<1x168xf32, #tpu.memory_space<vmem>>, %arg3: memref<28x60xf32, #tpu.memory_space<vmem>>, %arg4: memref<28x60xf32, #tpu.memory_space<vmem>>, %arg5: memref<168x84xf32, #tpu.memory_space<vmem>>, %arg6: memref<168x84xf32, #tpu.memory_space<vmem>>, %arg7: memref<5x84x160xf32, #tpu.memory_space<vmem>>, %arg8: memref<1x160xf32, #tpu.memory_space<vmem>>, %arg9: memref<10x24xf32, #tpu.memory_space<vmem>>, %arg10: memref<10x24xf32, #tpu.memory_space<vmem>>, %arg11: memref<160x80xf32, #tpu.memory_space<vmem>>, %arg12: memref<160x80xf32, #tpu.memory_space<vmem>>, %arg13: memref<5x80x120xf32, #tpu.memory_space<vmem>>, %arg14: memref<1x120xf32, #tpu.memory_space<vmem>>, %arg15: memref<120x84xf32, #tpu.memory_space<vmem>>, %arg16: memref<1x84xf32, #tpu.memory_space<vmem>>, %arg17: memref<84x10xf32, #tpu.memory_space<vmem>>, %arg18: memref<1x10xf32, #tpu.memory_space<vmem>>, %arg19: memref<2x6xf32, #tpu.memory_space<vmem>>, %arg20: memref<2x10xf32, #tpu.memory_space<vmem>>, %arg21: memref<28x84xf32, #tpu.memory_space<vmem>>, %arg22: memref<10x80xf32, #tpu.memory_space<vmem>>) attributes {dimension_semantics = [], scalar_prefetch = 0 : i64, scratch_operands = 2 : i64, tpu.core_type = #tpu.core_type<tc>} {
    %c0 = arith.constant 0 : index
    %c0_0 = arith.constant 0 : index
    %0 = vector.load %arg2[%c0, %c0_0] : memref<1x168xf32, #tpu.memory_space<vmem>>, vector<1x168xf32>
    %c0_1 = arith.constant 0 : index
    %c0_2 = arith.constant 0 : index
    %1 = vector.load %arg0[%c0_1, %c0_2] : memref<64x96xf32, #tpu.memory_space<vmem>>, vector<60x96xf32>
    %c0_3 = arith.constant 0 : index
    %c0_4 = arith.constant 0 : index
    %c0_5 = arith.constant 0 : index
    %2 = vector.load %arg1[%c0_3, %c0_4, %c0_5] : memref<5x96x168xf32, #tpu.memory_space<vmem>>, vector<1x96x168xf32>
    %3 = vector.shape_cast %2 : vector<1x96x168xf32> to vector<96x168xf32>
    %cst = arith.constant dense<0.000000e+00> : vector<60x168xf32>
    %4 = tpu.matmul %1, %3, %cst {dimension_numbers = #tpu.dot_dimension_numbers<[1], [0], [0], [1], [0, 0, 1, 1], [], []>} : vector<60x96xf32>, vector<96x168xf32>, vector<60x168xf32> -> vector<60x168xf32>
    %c1 = arith.constant 1 : index
    %c0_6 = arith.constant 0 : index
    %5 = vector.load %arg0[%c1, %c0_6] : memref<64x96xf32, #tpu.memory_space<vmem>>, vector<60x96xf32>
    %c1_7 = arith.constant 1 : index
    %c0_8 = arith.constant 0 : index
    %c0_9 = arith.constant 0 : index
    %6 = vector.load %arg1[%c1_7, %c0_8, %c0_9] : memref<5x96x168xf32, #tpu.memory_space<vmem>>, vector<1x96x168xf32>
    %7 = vector.shape_cast %6 : vector<1x96x168xf32> to vector<96x168xf32>
    %cst_10 = arith.constant dense<0.000000e+00> : vector<60x168xf32>
    %8 = tpu.matmul %5, %7, %cst_10 {dimension_numbers = #tpu.dot_dimension_numbers<[1], [0], [0], [1], [0, 0, 1, 1], [], []>} : vector<60x96xf32>, vector<96x168xf32>, vector<60x168xf32> -> vector<60x168xf32>
    %9 = arith.addf %4, %8 : vector<60x168xf32>
    %c2 = arith.constant 2 : index
    %c0_11 = arith.constant 0 : index
    %10 = vector.load %arg0[%c2, %c0_11] : memref<64x96xf32, #tpu.memory_space<vmem>>, vector<60x96xf32>
    %c2_12 = arith.constant 2 : index
    %c0_13 = arith.constant 0 : index
    %c0_14 = arith.constant 0 : index
    %11 = vector.load %arg1[%c2_12, %c0_13, %c0_14] : memref<5x96x168xf32, #tpu.memory_space<vmem>>, vector<1x96x168xf32>
    %12 = vector.shape_cast %11 : vector<1x96x168xf32> to vector<96x168xf32>
    %cst_15 = arith.constant dense<0.000000e+00> : vector<60x168xf32>
    %13 = tpu.matmul %10, %12, %cst_15 {dimension_numbers = #tpu.dot_dimension_numbers<[1], [0], [0], [1], [0, 0, 1, 1], [], []>} : vector<60x96xf32>, vector<96x168xf32>, vector<60x168xf32> -> vector<60x168xf32>
    %14 = arith.addf %9, %13 : vector<60x168xf32>
    %c3 = arith.constant 3 : index
    %c0_16 = arith.constant 0 : index
    %15 = vector.load %arg0[%c3, %c0_16] : memref<64x96xf32, #tpu.memory_space<vmem>>, vector<60x96xf32>
    %c3_17 = arith.constant 3 : index
    %c0_18 = arith.constant 0 : index
    %c0_19 = arith.constant 0 : index
    %16 = vector.load %arg1[%c3_17, %c0_18, %c0_19] : memref<5x96x168xf32, #tpu.memory_space<vmem>>, vector<1x96x168xf32>
    %17 = vector.shape_cast %16 : vector<1x96x168xf32> to vector<96x168xf32>
    %cst_20 = arith.constant dense<0.000000e+00> : vector<60x168xf32>
    %18 = tpu.matmul %15, %17, %cst_20 {dimension_numbers = #tpu.dot_dimension_numbers<[1], [0], [0], [1], [0, 0, 1, 1], [], []>} : vector<60x96xf32>, vector<96x168xf32>, vector<60x168xf32> -> vector<60x168xf32>
    %19 = arith.addf %14, %18 : vector<60x168xf32>
    %c4 = arith.constant 4 : index
    %c0_21 = arith.constant 0 : index
    %20 = vector.load %arg0[%c4, %c0_21] : memref<64x96xf32, #tpu.memory_space<vmem>>, vector<60x96xf32>
    %c4_22 = arith.constant 4 : index
    %c0_23 = arith.constant 0 : index
    %c0_24 = arith.constant 0 : index
    %21 = vector.load %arg1[%c4_22, %c0_23, %c0_24] : memref<5x96x168xf32, #tpu.memory_space<vmem>>, vector<1x96x168xf32>
    %22 = vector.shape_cast %21 : vector<1x96x168xf32> to vector<96x168xf32>
    %cst_25 = arith.constant dense<0.000000e+00> : vector<60x168xf32>
    %23 = tpu.matmul %20, %22, %cst_25 {dimension_numbers = #tpu.dot_dimension_numbers<[1], [0], [0], [1], [0, 0, 1, 1], [], []>} : vector<60x96xf32>, vector<96x168xf32>, vector<60x168xf32> -> vector<60x168xf32>
    %24 = arith.addf %19, %23 : vector<60x168xf32>
    %25 = vector.broadcast %0 : vector<1x168xf32> to vector<60x168xf32>
    %26 = arith.addf %24, %25 : vector<60x168xf32>
    %cst_26 = arith.constant 0.000000e+00 : f32
    %27 = vector.broadcast %cst_26 : f32 to vector<60x168xf32>
    %28 = arith.maximumf %26, %27 : vector<60x168xf32>
    %c0_27 = arith.constant 0 : index
    %c0_28 = arith.constant 0 : index
    %29 = vector.load %arg3[%c0_27, %c0_28] : memref<28x60xf32, #tpu.memory_space<vmem>>, vector<28x60xf32>
    %c0_29 = arith.constant 0 : index
    %c0_30 = arith.constant 0 : index
    %30 = vector.load %arg4[%c0_29, %c0_30] : memref<28x60xf32, #tpu.memory_space<vmem>>, vector<28x60xf32>
    %c0_31 = arith.constant 0 : index
    %c0_32 = arith.constant 0 : index
    %31 = vector.load %arg5[%c0_31, %c0_32] : memref<168x84xf32, #tpu.memory_space<vmem>>, vector<168x84xf32>
    %c0_33 = arith.constant 0 : index
    %c0_34 = arith.constant 0 : index
    %32 = vector.load %arg6[%c0_33, %c0_34] : memref<168x84xf32, #tpu.memory_space<vmem>>, vector<168x84xf32>
    %cst_35 = arith.constant dense<0.000000e+00> : vector<60x84xf32>
    %33 = tpu.matmul %28, %31, %cst_35 {dimension_numbers = #tpu.dot_dimension_numbers<[1], [0], [0], [1], [0, 0, 1, 1], [], []>} : vector<60x168xf32>, vector<168x84xf32>, vector<60x84xf32> -> vector<60x84xf32>
    %cst_36 = arith.constant dense<0.000000e+00> : vector<60x84xf32>
    %34 = tpu.matmul %28, %32, %cst_36 {dimension_numbers = #tpu.dot_dimension_numbers<[1], [0], [0], [1], [0, 0, 1, 1], [], []>} : vector<60x168xf32>, vector<168x84xf32>, vector<60x84xf32> -> vector<60x84xf32>
    %35 = arith.maximumf %33, %34 : vector<60x84xf32>
    %cst_37 = arith.constant dense<0.000000e+00> : vector<28x84xf32>
    %36 = tpu.matmul %29, %35, %cst_37 {dimension_numbers = #tpu.dot_dimension_numbers<[1], [0], [0], [1], [0, 0, 1, 1], [], []>} : vector<28x60xf32>, vector<60x84xf32>, vector<28x84xf32> -> vector<28x84xf32>
    %cst_38 = arith.constant dense<0.000000e+00> : vector<28x84xf32>
    %37 = tpu.matmul %30, %35, %cst_38 {dimension_numbers = #tpu.dot_dimension_numbers<[1], [0], [0], [1], [0, 0, 1, 1], [], []>} : vector<28x60xf32>, vector<60x84xf32>, vector<28x84xf32> -> vector<28x84xf32>
    %38 = arith.maximumf %36, %37 : vector<28x84xf32>
    %c0_39 = arith.constant 0 : index
    %c0_40 = arith.constant 0 : index
    %39 = vector.load %arg21[%c0_39, %c0_40] : memref<28x84xf32, #tpu.memory_space<vmem>>, vector<28x84xf32>
    tpu.vector_store %arg21[%c0_39, %c0_40], %38 {strides = array<i32>} : memref<28x84xf32, #tpu.memory_space<vmem>>, vector<28x84xf32>,
    %c0_41 = arith.constant 0 : index
    %c0_42 = arith.constant 0 : index
    %40 = vector.load %arg8[%c0_41, %c0_42] : memref<1x160xf32, #tpu.memory_space<vmem>>, vector<1x160xf32>
    %c0_43 = arith.constant 0 : index
    %c0_44 = arith.constant 0 : index
    %41 = vector.load %arg21[%c0_43, %c0_44] : memref<28x84xf32, #tpu.memory_space<vmem>>, vector<24x84xf32>
    %c0_45 = arith.constant 0 : index
    %c0_46 = arith.constant 0 : index
    %c0_47 = arith.constant 0 : index
    %42 = vector.load %arg7[%c0_45, %c0_46, %c0_47] : memref<5x84x160xf32, #tpu.memory_space<vmem>>, vector<1x84x160xf32>
    %43 = vector.shape_cast %42 : vector<1x84x160xf32> to vector<84x160xf32>
    %cst_48 = arith.constant dense<0.000000e+00> : vector<24x160xf32>
    %44 = tpu.matmul %41, %43, %cst_48 {dimension_numbers = #tpu.dot_dimension_numbers<[1], [0], [0], [1], [0, 0, 1, 1], [], []>} : vector<24x84xf32>, vector<84x160xf32>, vector<24x160xf32> -> vector<24x160xf32>
    %c1_49 = arith.constant 1 : index
    %c0_50 = arith.constant 0 : index
    %45 = vector.load %arg21[%c1_49, %c0_50] : memref<28x84xf32, #tpu.memory_space<vmem>>, vector<24x84xf32>
    %c1_51 = arith.constant 1 : index
    %c0_52 = arith.constant 0 : index
    %c0_53 = arith.constant 0 : index
    %46 = vector.load %arg7[%c1_51, %c0_52, %c0_53] : memref<5x84x160xf32, #tpu.memory_space<vmem>>, vector<1x84x160xf32>
    %47 = vector.shape_cast %46 : vector<1x84x160xf32> to vector<84x160xf32>
    %cst_54 = arith.constant dense<0.000000e+00> : vector<24x160xf32>
    %48 = tpu.matmul %45, %47, %cst_54 {dimension_numbers = #tpu.dot_dimension_numbers<[1], [0], [0], [1], [0, 0, 1, 1], [], []>} : vector<24x84xf32>, vector<84x160xf32>, vector<24x160xf32> -> vector<24x160xf32>
    %49 = arith.addf %44, %48 : vector<24x160xf32>
    %c2_55 = arith.constant 2 : index
    %c0_56 = arith.constant 0 : index
    %50 = vector.load %arg21[%c2_55, %c0_56] : memref<28x84xf32, #tpu.memory_space<vmem>>, vector<24x84xf32>
    %c2_57 = arith.constant 2 : index
    %c0_58 = arith.constant 0 : index
    %c0_59 = arith.constant 0 : index
    %51 = vector.load %arg7[%c2_57, %c0_58, %c0_59] : memref<5x84x160xf32, #tpu.memory_space<vmem>>, vector<1x84x160xf32>
    %52 = vector.shape_cast %51 : vector<1x84x160xf32> to vector<84x160xf32>
    %cst_60 = arith.constant dense<0.000000e+00> : vector<24x160xf32>
    %53 = tpu.matmul %50, %52, %cst_60 {dimension_numbers = #tpu.dot_dimension_numbers<[1], [0], [0], [1], [0, 0, 1, 1], [], []>} : vector<24x84xf32>, vector<84x160xf32>, vector<24x160xf32> -> vector<24x160xf32>
    %54 = arith.addf %49, %53 : vector<24x160xf32>
    %c3_61 = arith.constant 3 : index
    %c0_62 = arith.constant 0 : index
    %55 = vector.load %arg21[%c3_61, %c0_62] : memref<28x84xf32, #tpu.memory_space<vmem>>, vector<24x84xf32>
    %c3_63 = arith.constant 3 : index
    %c0_64 = arith.constant 0 : index
    %c0_65 = arith.constant 0 : index
    %56 = vector.load %arg7[%c3_63, %c0_64, %c0_65] : memref<5x84x160xf32, #tpu.memory_space<vmem>>, vector<1x84x160xf32>
    %57 = vector.shape_cast %56 : vector<1x84x160xf32> to vector<84x160xf32>
    %cst_66 = arith.constant dense<0.000000e+00> : vector<24x160xf32>
    %58 = tpu.matmul %55, %57, %cst_66 {dimension_numbers = #tpu.dot_dimension_numbers<[1], [0], [0], [1], [0, 0, 1, 1], [], []>} : vector<24x84xf32>, vector<84x160xf32>, vector<24x160xf32> -> vector<24x160xf32>
    %59 = arith.addf %54, %58 : vector<24x160xf32>
    %c4_67 = arith.constant 4 : index
    %c0_68 = arith.constant 0 : index
    %60 = vector.load %arg21[%c4_67, %c0_68] : memref<28x84xf32, #tpu.memory_space<vmem>>, vector<24x84xf32>
    %c4_69 = arith.constant 4 : index
    %c0_70 = arith.constant 0 : index
    %c0_71 = arith.constant 0 : index
    %61 = vector.load %arg7[%c4_69, %c0_70, %c0_71] : memref<5x84x160xf32, #tpu.memory_space<vmem>>, vector<1x84x160xf32>
    %62 = vector.shape_cast %61 : vector<1x84x160xf32> to vector<84x160xf32>
    %cst_72 = arith.constant dense<0.000000e+00> : vector<24x160xf32>
    %63 = tpu.matmul %60, %62, %cst_72 {dimension_numbers = #tpu.dot_dimension_numbers<[1], [0], [0], [1], [0, 0, 1, 1], [], []>} : vector<24x84xf32>, vector<84x160xf32>, vector<24x160xf32> -> vector<24x160xf32>
    %64 = arith.addf %59, %63 : vector<24x160xf32>
    %65 = vector.broadcast %40 : vector<1x160xf32> to vector<24x160xf32>
    %66 = arith.addf %64, %65 : vector<24x160xf32>
    %cst_73 = arith.constant 0.000000e+00 : f32
    %67 = vector.broadcast %cst_73 : f32 to vector<24x160xf32>
    %68 = arith.maximumf %66, %67 : vector<24x160xf32>
    %c0_74 = arith.constant 0 : index
    %c0_75 = arith.constant 0 : index
    %69 = vector.load %arg9[%c0_74, %c0_75] : memref<10x24xf32, #tpu.memory_space<vmem>>, vector<10x24xf32>
    %c0_76 = arith.constant 0 : index
    %c0_77 = arith.constant 0 : index
    %70 = vector.load %arg10[%c0_76, %c0_77] : memref<10x24xf32, #tpu.memory_space<vmem>>, vector<10x24xf32>
    %c0_78 = arith.constant 0 : index
    %c0_79 = arith.constant 0 : index
    %71 = vector.load %arg11[%c0_78, %c0_79] : memref<160x80xf32, #tpu.memory_space<vmem>>, vector<160x80xf32>
    %c0_80 = arith.constant 0 : index
    %c0_81 = arith.constant 0 : index
    %72 = vector.load %arg12[%c0_80, %c0_81] : memref<160x80xf32, #tpu.memory_space<vmem>>, vector<160x80xf32>
    %cst_82 = arith.constant dense<0.000000e+00> : vector<24x80xf32>
    %73 = tpu.matmul %68, %71, %cst_82 {dimension_numbers = #tpu.dot_dimension_numbers<[1], [0], [0], [1], [0, 0, 1, 1], [], []>} : vector<24x160xf32>, vector<160x80xf32>, vector<24x80xf32> -> vector<24x80xf32>
    %cst_83 = arith.constant dense<0.000000e+00> : vector<24x80xf32>
    %74 = tpu.matmul %68, %72, %cst_83 {dimension_numbers = #tpu.dot_dimension_numbers<[1], [0], [0], [1], [0, 0, 1, 1], [], []>} : vector<24x160xf32>, vector<160x80xf32>, vector<24x80xf32> -> vector<24x80xf32>
    %75 = arith.maximumf %73, %74 : vector<24x80xf32>
    %cst_84 = arith.constant dense<0.000000e+00> : vector<10x80xf32>
    %76 = tpu.matmul %69, %75, %cst_84 {dimension_numbers = #tpu.dot_dimension_numbers<[1], [0], [0], [1], [0, 0, 1, 1], [], []>} : vector<10x24xf32>, vector<24x80xf32>, vector<10x80xf32> -> vector<10x80xf32>
    %cst_85 = arith.constant dense<0.000000e+00> : vector<10x80xf32>
    %77 = tpu.matmul %70, %75, %cst_85 {dimension_numbers = #tpu.dot_dimension_numbers<[1], [0], [0], [1], [0, 0, 1, 1], [], []>} : vector<10x24xf32>, vector<24x80xf32>, vector<10x80xf32> -> vector<10x80xf32>
    %78 = arith.maximumf %76, %77 : vector<10x80xf32>
    %c0_86 = arith.constant 0 : index
    %c0_87 = arith.constant 0 : index
    %79 = vector.load %arg22[%c0_86, %c0_87] : memref<10x80xf32, #tpu.memory_space<vmem>>, vector<10x80xf32>
    tpu.vector_store %arg22[%c0_86, %c0_87], %78 {strides = array<i32>} : memref<10x80xf32, #tpu.memory_space<vmem>>, vector<10x80xf32>,
    %c0_88 = arith.constant 0 : index
    %c0_89 = arith.constant 0 : index
    %80 = vector.load %arg14[%c0_88, %c0_89] : memref<1x120xf32, #tpu.memory_space<vmem>>, vector<1x120xf32>
    %c0_90 = arith.constant 0 : index
    %c0_91 = arith.constant 0 : index
    %81 = vector.load %arg22[%c0_90, %c0_91] : memref<10x80xf32, #tpu.memory_space<vmem>>, vector<6x80xf32>
    %c0_92 = arith.constant 0 : index
    %c0_93 = arith.constant 0 : index
    %c0_94 = arith.constant 0 : index
    %82 = vector.load %arg13[%c0_92, %c0_93, %c0_94] : memref<5x80x120xf32, #tpu.memory_space<vmem>>, vector<1x80x120xf32>
    %83 = vector.shape_cast %82 : vector<1x80x120xf32> to vector<80x120xf32>
    %cst_95 = arith.constant dense<0.000000e+00> : vector<6x120xf32>
    %84 = tpu.matmul %81, %83, %cst_95 {dimension_numbers = #tpu.dot_dimension_numbers<[1], [0], [0], [1], [0, 0, 1, 1], [], []>} : vector<6x80xf32>, vector<80x120xf32>, vector<6x120xf32> -> vector<6x120xf32>
    %c1_96 = arith.constant 1 : index
    %c0_97 = arith.constant 0 : index
    %85 = vector.load %arg22[%c1_96, %c0_97] : memref<10x80xf32, #tpu.memory_space<vmem>>, vector<6x80xf32>
    %c1_98 = arith.constant 1 : index
    %c0_99 = arith.constant 0 : index
    %c0_100 = arith.constant 0 : index
    %86 = vector.load %arg13[%c1_98, %c0_99, %c0_100] : memref<5x80x120xf32, #tpu.memory_space<vmem>>, vector<1x80x120xf32>
    %87 = vector.shape_cast %86 : vector<1x80x120xf32> to vector<80x120xf32>
    %cst_101 = arith.constant dense<0.000000e+00> : vector<6x120xf32>
    %88 = tpu.matmul %85, %87, %cst_101 {dimension_numbers = #tpu.dot_dimension_numbers<[1], [0], [0], [1], [0, 0, 1, 1], [], []>} : vector<6x80xf32>, vector<80x120xf32>, vector<6x120xf32> -> vector<6x120xf32>
    %89 = arith.addf %84, %88 : vector<6x120xf32>
    %c2_102 = arith.constant 2 : index
    %c0_103 = arith.constant 0 : index
    %90 = vector.load %arg22[%c2_102, %c0_103] : memref<10x80xf32, #tpu.memory_space<vmem>>, vector<6x80xf32>
    %c2_104 = arith.constant 2 : index
    %c0_105 = arith.constant 0 : index
    %c0_106 = arith.constant 0 : index
    %91 = vector.load %arg13[%c2_104, %c0_105, %c0_106] : memref<5x80x120xf32, #tpu.memory_space<vmem>>, vector<1x80x120xf32>
    %92 = vector.shape_cast %91 : vector<1x80x120xf32> to vector<80x120xf32>
    %cst_107 = arith.constant dense<0.000000e+00> : vector<6x120xf32>
    %93 = tpu.matmul %90, %92, %cst_107 {dimension_numbers = #tpu.dot_dimension_numbers<[1], [0], [0], [1], [0, 0, 1, 1], [], []>} : vector<6x80xf32>, vector<80x120xf32>, vector<6x120xf32> -> vector<6x120xf32>
    %94 = arith.addf %89, %93 : vector<6x120xf32>
    %c3_108 = arith.constant 3 : index
    %c0_109 = arith.constant 0 : index
    %95 = vector.load %arg22[%c3_108, %c0_109] : memref<10x80xf32, #tpu.memory_space<vmem>>, vector<6x80xf32>
    %c3_110 = arith.constant 3 : index
    %c0_111 = arith.constant 0 : index
    %c0_112 = arith.constant 0 : index
    %96 = vector.load %arg13[%c3_110, %c0_111, %c0_112] : memref<5x80x120xf32, #tpu.memory_space<vmem>>, vector<1x80x120xf32>
    %97 = vector.shape_cast %96 : vector<1x80x120xf32> to vector<80x120xf32>
    %cst_113 = arith.constant dense<0.000000e+00> : vector<6x120xf32>
    %98 = tpu.matmul %95, %97, %cst_113 {dimension_numbers = #tpu.dot_dimension_numbers<[1], [0], [0], [1], [0, 0, 1, 1], [], []>} : vector<6x80xf32>, vector<80x120xf32>, vector<6x120xf32> -> vector<6x120xf32>
    %99 = arith.addf %94, %98 : vector<6x120xf32>
    %c4_114 = arith.constant 4 : index
    %c0_115 = arith.constant 0 : index
    %100 = vector.load %arg22[%c4_114, %c0_115] : memref<10x80xf32, #tpu.memory_space<vmem>>, vector<6x80xf32>
    %c4_116 = arith.constant 4 : index
    %c0_117 = arith.constant 0 : index
    %c0_118 = arith.constant 0 : index
    %101 = vector.load %arg13[%c4_116, %c0_117, %c0_118] : memref<5x80x120xf32, #tpu.memory_space<vmem>>, vector<1x80x120xf32>
    %102 = vector.shape_cast %101 : vector<1x80x120xf32> to vector<80x120xf32>
    %cst_119 = arith.constant dense<0.000000e+00> : vector<6x120xf32>
    %103 = tpu.matmul %100, %102, %cst_119 {dimension_numbers = #tpu.dot_dimension_numbers<[1], [0], [0], [1], [0, 0, 1, 1], [], []>} : vector<6x80xf32>, vector<80x120xf32>, vector<6x120xf32> -> vector<6x120xf32>
    %104 = arith.addf %99, %103 : vector<6x120xf32>
    %105 = vector.broadcast %80 : vector<1x120xf32> to vector<6x120xf32>
    %106 = arith.addf %104, %105 : vector<6x120xf32>
    %cst_120 = arith.constant 0.000000e+00 : f32
    %107 = vector.broadcast %cst_120 : f32 to vector<6x120xf32>
    %108 = arith.maximumf %106, %107 : vector<6x120xf32>
    %c0_121 = arith.constant 0 : index
    %c0_122 = arith.constant 0 : index
    %109 = vector.load %arg19[%c0_121, %c0_122] : memref<2x6xf32, #tpu.memory_space<vmem>>, vector<2x6xf32>
    %cst_123 = arith.constant dense<0.000000e+00> : vector<2x120xf32>
    %110 = tpu.matmul %109, %108, %cst_123 {dimension_numbers = #tpu.dot_dimension_numbers<[1], [0], [0], [1], [0, 0, 1, 1], [], []>} : vector<2x6xf32>, vector<6x120xf32>, vector<2x120xf32> -> vector<2x120xf32>
    %c0_124 = arith.constant 0 : index
    %c0_125 = arith.constant 0 : index
    %111 = vector.load %arg15[%c0_124, %c0_125] : memref<120x84xf32, #tpu.memory_space<vmem>>, vector<120x84xf32>
    %cst_126 = arith.constant dense<0.000000e+00> : vector<2x84xf32>
    %112 = tpu.matmul %110, %111, %cst_126 {dimension_numbers = #tpu.dot_dimension_numbers<[1], [0], [0], [1], [0, 0, 1, 1], [], []>} : vector<2x120xf32>, vector<120x84xf32>, vector<2x84xf32> -> vector<2x84xf32>
    %c0_127 = arith.constant 0 : index
    %c0_128 = arith.constant 0 : index
    %113 = vector.load %arg16[%c0_127, %c0_128] : memref<1x84xf32, #tpu.memory_space<vmem>>, vector<1x84xf32>
    %114 = vector.broadcast %113 : vector<1x84xf32> to vector<2x84xf32>
    %115 = arith.addf %112, %114 : vector<2x84xf32>
    %cst_129 = arith.constant 0.000000e+00 : f32
    %116 = vector.broadcast %cst_129 : f32 to vector<2x84xf32>
    %117 = arith.maximumf %115, %116 : vector<2x84xf32>
    %c0_130 = arith.constant 0 : index
    %c0_131 = arith.constant 0 : index
    %118 = vector.load %arg17[%c0_130, %c0_131] : memref<84x10xf32, #tpu.memory_space<vmem>>, vector<84x10xf32>
    %cst_132 = arith.constant dense<0.000000e+00> : vector<2x10xf32>
    %119 = tpu.matmul %117, %118, %cst_132 {dimension_numbers = #tpu.dot_dimension_numbers<[1], [0], [0], [1], [0, 0, 1, 1], [], []>} : vector<2x84xf32>, vector<84x10xf32>, vector<2x10xf32> -> vector<2x10xf32>
    %c0_133 = arith.constant 0 : index
    %c0_134 = arith.constant 0 : index
    %120 = vector.load %arg18[%c0_133, %c0_134] : memref<1x10xf32, #tpu.memory_space<vmem>>, vector<1x10xf32>
    %121 = vector.broadcast %120 : vector<1x10xf32> to vector<2x10xf32>
    %122 = arith.addf %119, %121 : vector<2x10xf32>
    %c0_135 = arith.constant 0 : index
    %c0_136 = arith.constant 0 : index
    %123 = vector.load %arg20[%c0_135, %c0_136] : memref<2x10xf32, #tpu.memory_space<vmem>>, vector<2x10xf32>
    tpu.vector_store %arg20[%c0_135, %c0_136], %122 {strides = array<i32>} : memref<2x10xf32, #tpu.memory_space<vmem>>, vector<2x10xf32>,
    return
  }
}

</mosaic_0001>

<bundles_post_ra>
// kernel: convnet_cifar10_forward.1
= control target key start
LH: loop header
LB: loop body
LE: loop exit
PB: predicated region body
PF: predicated region fallthrough
CT: control target
= control target key end

     0   :  { %s5931_s0 = inlined_call_operand.vmem [shape: f32[64,96], index: 0, kind: input, shape index: {}]   ;;  %s5932_s1 = inlined_call_operand.vmem [shape: f32[5,96,168], index: 1, kind: input, shape index: {}]   ;;  %s5933_s2 = inlined_call_operand.vmem [shape: f32[1,168], index: 2, kind: input, shape index: {}]   ;;  %s5934_s3 = inlined_call_operand.vmem [shape: f32[28,60], index: 3, kind: input, shape index: {}]   ;;  %s5935_s4 = inlined_call_operand.vmem [shape: f32[28,60], index: 4, kind: input, shape index: {}]   ;;  %s5936_s5 = inlined_call_operand.vmem [shape: f32[168,84], index: 5, kind: input, shape index: {}]   ;;  %s5937_s6 = inlined_call_operand.vmem [shape: f32[168,84], index: 6, kind: input, shape index: {}]   ;;  %s5938_s7 = inlined_call_operand.vmem [shape: f32[5,84,160], index: 7, kind: input, shape index: {}]   ;;  %s5939_s8 = inlined_call_operand.vmem [shape: f32[1,160], index: 8, kind: input, shape index: {}]   ;;  %s5940_s9 = inlined_call_operand.vmem [shape: f32[10,24], index: 9, kind: input, shape index: {}]   ;;  %s5941_s10 = inlined_call_operand.vmem [shape: f32[10,24], index: 10, kind: input, shape index: {}]   ;;  %s5942_s11 = inlined_call_operand.vmem [shape: f32[160,80], index: 11, kind: input, shape index: {}]   ;;  %s5943_s12 = inlined_call_operand.vmem [shape: f32[160,80], index: 12, kind: input, shape index: {}]   ;;  %s5944_s13 = inlined_call_operand.vmem [shape: f32[5,80,120], index: 13, kind: input, shape index: {}]   ;;  %s5945_s14 = inlined_call_operand.vmem [shape: f32[1,120], index: 14, kind: input, shape index: {}]   ;;  %s5946_s15 = inlined_call_operand.vmem [shape: f32[120,84], index: 15, kind: input, shape index: {}]   ;;  %s5947_s16 = inlined_call_operand.vmem [shape: f32[1,84], index: 16, kind: input, shape index: {}]   ;;  %s5948_s17 = inlined_call_operand.vmem [shape: f32[84,10], index: 17, kind: input, shape index: {}]   ;;  %s5949_s18 = inlined_call_operand.vmem [shape: f32[1,10], index: 18, kind: input, shape index: {}]   ;;  %s5950_s19 = inlined_call_operand.vmem [shape: f32[2,6], index: 19, kind: input, shape index: {}]   ;;  %s5951_s20 = inlined_call_operand.hbm [shape: f32[2,10], index: 20, kind: output, shape index: {}]  }
   0x1   :  { %5962 = sst [smem:[#allocation11_spill]] %s5931_s0 }
   0x2   :  { %5963 = sst [smem:[#allocation12_spill]] %s5932_s1 }
   0x3   :  { %5964 = sst [smem:[#allocation13_spill]] %s5933_s2 }
   0x4   :  { %5965 = sst [smem:[#allocation14_spill]] %s5934_s3 }
   0x5   :  { %5966 = sst [smem:[#allocation15_spill]] %s5935_s4 }
   0x6   :  { %s5967_s23 = sld [smem:[#allocation12_spill]]  ;;  %vm132_vm0 = vcmask 785408   ;;  %v5956_v50 = vmov 0.0  }
   0x7   :  { %s5968_s1 = sld [smem:[#allocation11_spill]]  ;;  %221 = vmatprep.mubr.f32.mxu0 %v5956_v50  ;;  %358 = vmatprep.mubr.f32.mxu1 %v5956_v50 }
   0xc   :  { %v3302_v0 = vld [vmem:[%s5967_s23 + $0x178] sm:$0xff]  ;;  %v3301_v2 = vld [vmem:[%s5967_s23 + $0x170] sm:$0xff]  ;;  %v3300_v4 = vld [vmem:[%s5967_s23 + $0x168] sm:$0xff] }
   0xd   :  { %v98_v1 = vld [vmem:[%s5967_s23 + $0xb8] sm:$0xff]  ;;  %165 = vmatprep.subr.mxu0 %v3302_v0  ;;  %v97_v3 = vld [vmem:[%s5967_s23 + $0xb0] sm:$0xff]  ;;  %v96_v5 = vld [vmem:[%s5967_s23 + $0xa8] sm:$0xff] }
   0xe   :  { %302 = vmatprep.subr.mxu1 %v98_v1  ;;  %166 = vmatpush1.msra.mxu0 %v3301_v2  ;;  %v3299_v6 = vld [vmem:[%s5967_s23 + $0x160] sm:$0xff]  ;;  %v3298_v8 = vld [vmem:[%s5967_s23 + $0x158] sm:$0xff]  ;;  %v3297_v10 = vld [vmem:[%s5967_s23 + $0x150] sm:$0xff] }
   0xf   :  { %303 = vmatpush1.msra.mxu1 %v97_v3  ;;  %v95_v7 = vld [vmem:[%s5967_s23 + $0xa0] sm:$0xff]  ;;  %167 = vmatprep.subr.mxu0 %v3300_v4  ;;  %v94_v9 = vld [vmem:[%s5967_s23 + $0x98] sm:$0xff]  ;;  %v93_v11 = vld [vmem:[%s5967_s23 + $0x90] sm:$0xff] }
  0x10   :  { %304 = vmatprep.subr.mxu1 %v96_v5  ;;  %168 = vmatpush1.msra.mxu0 %v3299_v6  ;;  %v3296_v12 = vld [vmem:[%s5967_s23 + $0x148] sm:$0xff]  ;;  %v3295_v14 = vld [vmem:[%s5967_s23 + $0x140] sm:$0xff]  ;;  %v3294_v16 = vld [vmem:[%s5967_s23 + $0x138] sm:$0xff] }
  0x11   :  { %305 = vmatpush1.msra.mxu1 %v95_v7  ;;  %v92_v13 = vld [vmem:[%s5967_s23 + $0x88] sm:$0xff]  ;;  %169 = vmatprep.subr.mxu0 %v3298_v8  ;;  %v91_v15 = vld [vmem:[%s5967_s23 + $0x80] sm:$0xff]  ;;  %v90_v17 = vld [vmem:[%s5967_s23 + $0x78] sm:$0xff] }
  0x12   :  { %306 = vmatprep.subr.mxu1 %v94_v9  ;;  %170 = vmatpush1.msra.mxu0 %v3297_v10  ;;  %v3293_v18 = vld [vmem:[%s5967_s23 + $0x130] sm:$0xff]  ;;  %v3292_v20 = vld [vmem:[%s5967_s23 + $0x128] sm:$0xff]  ;;  %v3291_v22 = vld [vmem:[%s5967_s23 + $0x120] sm:$0xff] }
  0x13   :  { %307 = vmatpush1.msra.mxu1 %v93_v11  ;;  %171 = vmatprep.subr.mxu0 %v3296_v12  ;;  %v89_v19 = vld [vmem:[%s5967_s23 + $0x70] sm:$0xff]  ;;  %v88_v21 = vld [vmem:[%s5967_s23 + $0x68] sm:$0xff]  ;;  %v87_v23 = vld [vmem:[%s5967_s23 + $0x60] sm:$0xff] }
  0x14   :  { %308 = vmatprep.subr.mxu1 %v92_v13  ;;  %172 = vmatpush1.msra.mxu0 %v3295_v14  ;;  %v3290_v24 = vld [vmem:[%s5967_s23 + $0x118] sm:$0xff]  ;;  %v3289_v26 = vld [vmem:[%s5967_s23 + $0x110] sm:$0xff]  ;;  %v3288_v28 = vld [vmem:[%s5967_s23 + $0x108] sm:$0xff] }
  0x15   :  { %309 = vmatpush1.msra.mxu1 %v91_v15  ;;  %173 = vmatprep.subr.mxu0 %v3294_v16  ;;  %v86_v25 = vld [vmem:[%s5967_s23 + $0x58] sm:$0xff]  ;;  %v85_v27 = vld [vmem:[%s5967_s23 + $0x50] sm:$0xff]  ;;  %v84_v29 = vld [vmem:[%s5967_s23 + $0x48] sm:$0xff] }
  0x16   :  { %310 = vmatprep.subr.mxu1 %v90_v17  ;;  %174 = vmatpush1.msra.mxu0 %v3293_v18  ;;  %v3287_v30 = vld [vmem:[%s5967_s23 + $0x100] sm:$0xff]  ;;  %v3286_v32 = vld [vmem:[%s5967_s23 + $0xf8] sm:$0xff]  ;;  %v3285_v34 = vld [vmem:[%s5967_s23 + $0xf0] sm:$0xff] }
  0x17   :  { %311 = vmatpush1.msra.mxu1 %v89_v19  ;;  %175 = vmatprep.subr.mxu0 %v3292_v20  ;;  %v83_v31 = vld [vmem:[%s5967_s23 + $0x40] sm:$0xff]  ;;  %v82_v33 = vld [vmem:[%s5967_s23 + $0x38] sm:$0xff]  ;;  %v81_v35 = vld [vmem:[%s5967_s23 + $0x30] sm:$0xff] }
  0x18   :  { %312 = vmatprep.subr.mxu1 %v88_v21  ;;  %176 = vmatpush1.msra.mxu0 %v3291_v22  ;;  %v3284_v36 = vld [vmem:[%s5967_s23 + $0xe8] sm:$0xff]  ;;  %v3283_v38 = vld [vmem:[%s5967_s23 + $0xe0] sm:$0xff]  ;;  %v3282_v40 = vld [vmem:[%s5967_s23 + $0xd8] sm:$0xff] }
  0x19   :  { %313 = vmatpush1.msra.mxu1 %v87_v23  ;;  %177 = vmatprep.subr.mxu0 %v3290_v24  ;;  %v80_v37 = vld [vmem:[%s5967_s23 + $0x28] sm:$0xff]  ;;  %v79_v39 = vld [vmem:[%s5967_s23 + $0x20] sm:$0xff]  ;;  %v78_v41 = vld [vmem:[%s5967_s23 + $0x18] sm:$0xff] }
  0x1a   :  { %314 = vmatprep.subr.mxu1 %v86_v25  ;;  %178 = vmatpush1.msra.mxu0 %v3289_v26  ;;  %v3281_v42 = vld [vmem:[%s5967_s23 + $0xd0] sm:$0xff]  ;;  %v3280_v44 = vld [vmem:[%s5967_s23 + $0xc8] sm:$0xff]  ;;  %v3279_v46 = vld [vmem:[%s5967_s23 + $0xc0] sm:$0xff] }
  0x1b   :  { %315 = vmatpush1.msra.mxu1 %v85_v27  ;;  %179 = vmatprep.subr.mxu0 %v3288_v28  ;;  %v77_v43 = vld [vmem:[%s5967_s23 + $0x10] sm:$0xff]  ;;  %v76_v45 = vld [vmem:[%s5967_s23 + $0x8] sm:$0xff]  ;;  %v75_v47 = vld [vmem:[%s5967_s23] sm:$0xff] }
  0x1c   :  { %316 = vmatprep.subr.mxu1 %v84_v29  ;;  %180 = vmatpush1.msra.mxu0 %v3287_v30  ;;  %v99_v48 = vld [vmem:[%s5968_s1 + $0x1] sm:$0xff]  ;;  %v3342_v51 = vld [vmem:[%s5967_s23 + $0x238] sm:$0xff]  ;;  %v3341_v53 = vld [vmem:[%s5967_s23 + $0x230] sm:$0xff] }
  0x1d   :  { %317 = vmatpush1.msra.mxu1 %v83_v31  ;;  %181 = vmatprep.subr.mxu0 %v3286_v32  ;;  %v67_v49 = vld [vmem:[%s5968_s1] sm:$0xff]  ;;  %v3374_v52 = vld [vmem:[%s5967_s23 + $0x2f8] sm:$0xff]  ;;  %v3373_v54 = vld [vmem:[%s5967_s23 + $0x2f0] sm:$0xff] }
  0x1e   :  { %318 = vmatprep.subr.mxu1 %v82_v33  ;;  %182 = vmatpush1.msra.mxu0 %v3285_v34  ;;  %v100_v55 = vld [vmem:[%s5968_s1 + $0x9] sm:$0xff]  ;;  %v3339_v59 = vld [vmem:[%s5967_s23 + $0x220] sm:$0xff]  ;;  %v101_v61 = vld [vmem:[%s5968_s1 + $0x11] sm:$0xff] }
  0x1f   :  { %319 = vmatpush1.msra.mxu1 %v81_v35  ;;  %183 = vmatprep.subr.mxu0 %v3284_v36  ;;  %v68_v56 = vld [vmem:[%s5968_s1 + $0x8] sm:$0xff]  ;;  %v3371_v60 = vld [vmem:[%s5967_s23 + $0x2e0] sm:$0xff]  ;;  %v69_v62 = vld [vmem:[%s5968_s1 + $0x10] sm:$0xff] }
  0x20   :  { %320 = vmatprep.subr.mxu1 %v80_v37  ;;  %184 = vmatpush1.msra.mxu0 %v3283_v38  ;;  %v3340_v57 = vld [vmem:[%s5967_s23 + $0x228] sm:$0xff]  ;;  %v3338_v63 = vld [vmem:[%s5967_s23 + $0x218] sm:$0xff]  ;;  %v3337_v1 = vld [vmem:[%s5967_s23 + $0x210] sm:$0xff] }
  0x21   :  { %321 = vmatpush1.msra.mxu1 %v79_v39  ;;  %185 = vmatprep.subr.mxu0 %v3282_v40  ;;  %v3372_v58 = vld [vmem:[%s5967_s23 + $0x2e8] sm:$0xff]  ;;  %v3370_v0 = vld [vmem:[%s5967_s23 + $0x2d8] sm:$0xff]  ;;  %v3369_v2 = vld [vmem:[%s5967_s23 + $0x2d0] sm:$0xff] }
  0x22   :  { %322 = vmatprep.subr.mxu1 %v78_v41  ;;  %186 = vmatpush1.msra.mxu0 %v3281_v42  ;;  %v102_v3 = vld [vmem:[%s5968_s1 + $0x19] sm:$0xff]  ;;  %v3336_v5 = vld [vmem:[%s5967_s23 + $0x208] sm:$0xff]  ;;  %v3333_v11 = vld [vmem:[%s5967_s23 + $0x1f0] sm:$0xff] }
  0x23   :  { %323 = vmatpush1.msra.mxu1 %v77_v43  ;;  %187 = vmatprep.subr.mxu0 %v3280_v44  ;;  %v70_v4 = vld [vmem:[%s5968_s1 + $0x18] sm:$0xff]  ;;  %v3335_v6 = vld [vmem:[%s5967_s23 + $0x200] sm:$0xff]  ;;  %v3368_v8 = vld [vmem:[%s5967_s23 + $0x2c8] sm:$0xff] }
  0x24   :  { %324 = vmatprep.subr.mxu1 %v76_v45  ;;  %188 = vmatpush1.msra.mxu0 %v3279_v46  ;;  %v3334_v7 = vld [vmem:[%s5967_s23 + $0x1f8] sm:$0xff]  ;;  %v103_v9 = vld [vmem:[%s5968_s1 + $0x21] sm:$0xff]  ;;  %v3365_v16 = vld [vmem:[%s5967_s23 + $0x2b0] sm:$0xff] }
  0x25   :  { %325 = vmatpush1.msra.mxu1 %v75_v47  ;;  %3303 = vmatmul.mubr.msk.f32.vlgmr.msra.gmra.mxu0 %vm132_vm0, %v99_v48  ;;  %v71_v10 = vld [vmem:[%s5968_s1 + $0x20] sm:$0xff]  ;;  %v3332_v13 = vld [vmem:[%s5967_s23 + $0x1e8] sm:$0xff]  ;;  %v3366_v14 = vld [vmem:[%s5967_s23 + $0x2b8] sm:$0xff] }
  0x26   :  { %3311 = vmatmul.mubr.msk.f32.vlgmr.msra.gmra.mxu1 %vm132_vm0, %v67_v49  ;;  %227 = vmatprep.mubr.f32.mxu0 %v5956_v50  ;;  %v3367_v12 = vld [vmem:[%s5967_s23 + $0x2c0] sm:$0xff]  ;;  %v104_v17 = vld [vmem:[%s5968_s1 + $0x29] sm:$0xff]  ;;  %v3330_v19 = vld [vmem:[%s5967_s23 + $0x1d8] sm:$0xff] }
  0x27   :  { %364 = vmatprep.mubr.f32.mxu1 %v5956_v50  ;;  %472 = vmatprep.subr.mxu0 %v3342_v51  ;;  %v3331_v15 = vld [vmem:[%s5967_s23 + $0x1e0] sm:$0xff]  ;;  %v72_v18 = vld [vmem:[%s5968_s1 + $0x28] sm:$0xff]  ;;  %v3329_v21 = vld [vmem:[%s5967_s23 + $0x1d0] sm:$0xff] }
  0x28   :  { %658 = vmatprep.subr.mxu1 %v3374_v52  ;;  %473 = vmatpush1.msra.mxu0 %v3341_v53  ;;  %v3364_v20 = vld [vmem:[%s5967_s23 + $0x2a8] sm:$0xff]  ;;  %v3363_v22 = vld [vmem:[%s5967_s23 + $0x2a0] sm:$0xff]  ;;  %v3362_v24 = vld [vmem:[%s5967_s23 + $0x298] sm:$0xff] }
  0x29   :  { %659 = vmatpush1.msra.mxu1 %v3373_v54  ;;  %3304 = vmatmul.mubr.msk.f32.gmra.mxu0 %vm132_vm0, %v100_v55  ;;  %v3328_v23 = vld [vmem:[%s5967_s23 + $0x1c8] sm:$0xff]  ;;  %v3327_v25 = vld [vmem:[%s5967_s23 + $0x1c0] sm:$0xff]  ;;  %v3361_v26 = vld [vmem:[%s5967_s23 + $0x290] sm:$0xff] }
  0x2a   :  { %3312 = vmatmul.mubr.msk.f32.gmra.mxu1 %vm132_vm0, %v68_v56  ;;  %233 = vmatprep.mubr.f32.mxu0 %v5956_v50  ;;  %v105_v27 = vld [vmem:[%s5968_s1 + $0x31] sm:$0xff]  ;;  %v3360_v30 = vld [vmem:[%s5967_s23 + $0x288] sm:$0xff]  ;;  %v3359_v32 = vld [vmem:[%s5967_s23 + $0x280] sm:$0xff] }
  0x2b   :  { %370 = vmatprep.mubr.f32.mxu1 %v5956_v50  ;;  %474 = vmatprep.subr.mxu0 %v3340_v57  ;;  %v73_v28 = vld [vmem:[%s5968_s1 + $0x30] sm:$0xff]  ;;  %v3326_v29 = vld [vmem:[%s5967_s23 + $0x1b8] sm:$0xff]  ;;  %v3324_v33 = vld [vmem:[%s5967_s23 + $0x1a8] sm:$0xff] }
  0x2c   :  { %660 = vmatprep.subr.mxu1 %v3372_v58  ;;  %475 = vmatpush1.msra.mxu0 %v3339_v59  ;;  %v3325_v31 = vld [vmem:[%s5967_s23 + $0x1b0] sm:$0xff]  ;;  %v3358_v34 = vld [vmem:[%s5967_s23 + $0x278] sm:$0xff] }
  0x2d   :  { %661 = vmatpush1.msra.mxu1 %v3371_v60  ;;  %3305 = vmatmul.mubr.msk.f32.gmra.mxu0 %vm132_vm0, %v101_v61 }
  0x2e   :  { %3313 = vmatmul.mubr.msk.f32.gmra.mxu1 %vm132_vm0, %v69_v62  ;;  %239 = vmatprep.mubr.f32.mxu0 %v5956_v50 }
  0x2f   :  { %376 = vmatprep.mubr.f32.mxu1 %v5956_v50  ;;  %476 = vmatprep.subr.mxu0 %v3338_v63 }
  0x30   :  { %662 = vmatprep.subr.mxu1 %v3370_v0  ;;  %477 = vmatpush1.msra.mxu0 %v3337_v1 }
  0x31   :  { %663 = vmatpush1.msra.mxu1 %v3369_v2  ;;  %3306 = vmatmul.mubr.msk.f32.gmra.mxu0 %vm132_vm0, %v102_v3 }
  0x32   :  { %3314 = vmatmul.mubr.msk.f32.gmra.mxu1 %vm132_vm0, %v70_v4  ;;  %478 = vmatprep.subr.mxu0 %v3336_v5 }
  0x33   :  { %245 = vmatprep.mubr.f32.mxu0 %v5956_v50  ;;  %382 = vmatprep.mubr.f32.mxu1 %v5956_v50 }
  0x34   :  { %479 = vmatpush1.msra.mxu0 %v3335_v6  ;;  %664 = vmatprep.subr.mxu1 %v3368_v8 }
  0x35   :  { %480 = vmatprep.subr.mxu0 %v3334_v7  ;;  %3307 = vmatmul.mubr.msk.f32.gmra.mxu0 %vm132_vm0, %v103_v9 }
  0x36   :  { %3315 = vmatmul.mubr.msk.f32.gmra.mxu1 %vm132_vm0, %v71_v10  ;;  %481 = vmatpush1.msra.mxu0 %v3333_v11 }
  0x37   :  { %665 = vmatpush1.msra.mxu1 %v3367_v12  ;;  %482 = vmatprep.subr.mxu0 %v3332_v13 }
  0x38   :  { %666 = vmatprep.subr.mxu1 %v3366_v14  ;;  %251 = vmatprep.mubr.f32.mxu0 %v5956_v50 }
  0x39   :  { %388 = vmatprep.mubr.f32.mxu1 %v5956_v50  ;;  %483 = vmatpush1.msra.mxu0 %v3331_v15 }
  0x3a   :  { %667 = vmatpush1.msra.mxu1 %v3365_v16  ;;  %3308 = vmatmul.mubr.msk.f32.gmra.mxu0 %vm132_vm0, %v104_v17 }
  0x3b   :  { %3316 = vmatmul.mubr.msk.f32.gmra.mxu1 %vm132_vm0, %v72_v18  ;;  %484 = vmatprep.subr.mxu0 %v3330_v19 }
  0x3c   :  { %668 = vmatprep.subr.mxu1 %v3364_v20  ;;  %485 = vmatpush1.msra.mxu0 %v3329_v21 }
  0x3d   :  { %669 = vmatpush1.msra.mxu1 %v3363_v22  ;;  %486 = vmatprep.subr.mxu0 %v3328_v23 }
  0x3e   :  { %670 = vmatprep.subr.mxu1 %v3362_v24  ;;  %257 = vmatprep.mubr.f32.mxu0 %v5956_v50 }
  0x3f   :  { %394 = vmatprep.mubr.f32.mxu1 %v5956_v50  ;;  %487 = vmatpush1.msra.mxu0 %v3327_v25 }
  0x40   :  { %671 = vmatpush1.msra.mxu1 %v3361_v26  ;;  %3309 = vmatmul.mubr.msk.f32.gmra.mxu0 %vm132_vm0, %v105_v27 }
  0x41   :  { %3317 = vmatmul.mubr.msk.f32.gmra.mxu1 %vm132_vm0, %v73_v28 }
  0x42   :  { %25 = vsyncpa [#allocation5], 0  ;;  %488 = vmatprep.subr.mxu0 %v3326_v29  ;;  %672 = vmatprep.subr.mxu1 %v3360_v30  ;;  %v3323_v35 = vld [vmem:[%s5967_s23 + $0x1a0] sm:$0xff]  ;;  %v3357_v36 = vld [vmem:[%s5967_s23 + $0x270] sm:$0xff]  ;;  %s5972_s28 = sld [smem:[#allocation13_spill]]  ;;  %vm1058_vm1 = vcmask 326656  }
  0x43   :  { %489 = vmatpush1.msra.mxu0 %v3325_v31  ;;  %673 = vmatpush1.msra.mxu1 %v3359_v32  ;;  %v106_v37 = vld [vmem:[%s5968_s1 + $0x39] sm:$0xf]  ;;  %v3356_v40 = vld [vmem:[%s5967_s23 + $0x268] sm:$0xff]  ;;  %v3321_v41 = vld [vmem:[%s5967_s23 + $0x190] sm:$0xff]  ;;  %s5978_s30 = sld [smem:[#allocation14_spill]]  ;;  %vm1301_vm2 = vcmask 490496  }
  0x44   :  { %490 = vmatprep.subr.mxu0 %v3324_v33  ;;  %674 = vmatprep.subr.mxu1 %v3358_v34  ;;  %v74_v38 = vld [vmem:[%s5968_s1 + $0x38] sm:$0xf]  ;;  %v3355_v42 = vld [vmem:[%s5967_s23 + $0x260] sm:$0xff]  ;;  %v3320_v43 = vld [vmem:[%s5967_s23 + $0x188] sm:$0xff]  ;;  %vm1314_vm3 = vcmask 1043456   ;;  %vm1504_vm4 = vcmask 687104  }
  0x45   :  { %263 = vmatprep.mubr.f32.mxu0 %v5956_v50  ;;  %400 = vmatprep.mubr.f32.mxu1 %v5956_v50  ;;  %v3322_v39 = vld [vmem:[%s5967_s23 + $0x198] sm:$0xff]  ;;  %v3319_v45 = vld [vmem:[%s5967_s23 + $0x180] sm:$0xff]  ;;  %v3353_v46 = vld [vmem:[%s5967_s23 + $0x250] sm:$0xff]  ;;  %vm1508_vm5 = vcmask 683008   ;;  %vm2215_vm6 = vcmask 261120   ;;  %vm2388_vm7 = vcmask 195584  }
  0x46   :  { %491 = vmatpush1.msra.mxu0 %v3323_v35  ;;  %675 = vmatpush1.msra.mxu1 %v3357_v36  ;;  %v3354_v44 = vld [vmem:[%s5967_s23 + $0x258] sm:$0xff]  ;;  %v407_v47 = vld [vmem:[%s5968_s1 + $0x2] sm:$0xff]  ;;  %v408_v53 = vld [vmem:[%s5968_s1 + $0xa] sm:$0xff]  ;;  %vm4002_vm8 = vmmov 0   ;;  %vm2555_vm9 = vcmask 648192   ;;  %vm2553_vm10 = vcmask 654336  }
  0x47   :  { %3310 = vmatmul.mubr.msk.f32.gmra.mxu0 %vm132_vm0, %v106_v37  ;;  %3318 = vmatmul.mubr.msk.f32.gmra.mxu1 %vm132_vm0, %v74_v38  ;;  %v3352_v48 = vld [vmem:[%s5967_s23 + $0x248] sm:$0xff]  ;;  %v3351_v49 = vld [vmem:[%s5967_s23 + $0x240] sm:$0xff]  ;;  %v3406_v52 = vld [vmem:[%s5967_s23 + $0x3b8] sm:$0xff]  ;;  %vm2998_vm11 = vcmask 1045504   ;;  %vm2994_vm12 = vcmask 48128   ;;  %vm3094_vm13 = vcmask 982016  }
  0x48   :  { %492 = vmatprep.subr.mxu0 %v3322_v39  ;;  %676 = vmatprep.subr.mxu1 %v3356_v40  ;;  %v593_v51 = vld [vmem:[%s5968_s1 + $0x3] sm:$0xff]  ;;  %v3405_v54 = vld [vmem:[%s5967_s23 + $0x3b0] sm:$0xff]  ;;  %v3402_v59 = vld [vmem:[%s5967_s23 + $0x398] sm:$0xff]  ;;  %vm3263_vm14 = vcmask 74752  }
  0x49   :  { %493 = vmatpush1.msra.mxu0 %v3321_v41  ;;  %677 = vmatpush1.msra.mxu1 %v3355_v42  ;;  %v3404_v55 = vld [vmem:[%s5967_s23 + $0x3a8] sm:$0xff]  ;;  %v3403_v57 = vld [vmem:[%s5967_s23 + $0x3a0] sm:$0xff]  ;;  %v409_v58 = vld [vmem:[%s5968_s1 + $0x12] sm:$0xff] }
  0x4a   :  { %494 = vmatprep.subr.mxu0 %v3320_v43  ;;  %678 = vmatprep.subr.mxu1 %v3354_v44  ;;  %v594_v56 = vld [vmem:[%s5968_s1 + $0xb] sm:$0xff]  ;;  %v595_v61 = vld [vmem:[%s5968_s1 + $0x13] sm:$0xff]  ;;  %v3399_v0 = vld [vmem:[%s5967_s23 + $0x380] sm:$0xff] }
  0x4b   :  { %495 = vmatpush1.msra.mxu0 %v3319_v45  ;;  %528 = vmatprep.mubr.f32.mxu0 %v5956_v50  ;;  %v3401_v60 = vld [vmem:[%s5967_s23 + $0x390] sm:$0xff]  ;;  %v3400_v62 = vld [vmem:[%s5967_s23 + $0x388] sm:$0xff]  ;;  %v410_v63 = vld [vmem:[%s5968_s1 + $0x1a] sm:$0xff] }
  0x4c   :  { %679 = vmatpush1.msra.mxu1 %v3353_v46  ;;  %3343 = vmatmul.mubr.msk.f32.vlgmr.msra.gmra.mxu0 %vm132_vm0, %v407_v47  ;;  %v3398_v1 = vld [vmem:[%s5967_s23 + $0x378] sm:$0xff]  ;;  %v3397_v3 = vld [vmem:[%s5967_s23 + $0x370] sm:$0xff]  ;;  %v411_v4 = vld [vmem:[%s5968_s1 + $0x22] sm:$0xff] }
  0x4d   :  { %680 = vmatprep.subr.mxu1 %v3352_v48  ;;  %714 = vmatprep.mubr.f32.mxu1 %v5956_v50  ;;  %v596_v2 = vld [vmem:[%s5968_s1 + $0x1b] sm:$0xff]  ;;  %v3396_v5 = vld [vmem:[%s5967_s23 + $0x368] sm:$0xff]  ;;  %v3393_v10 = vld [vmem:[%s5967_s23 + $0x350] sm:$0xff] }
  0x4e   :  { %681 = vmatpush1.msra.mxu1 %v3351_v49  ;;  %534 = vmatprep.mubr.f32.mxu0 %v5956_v50  ;;  %v3395_v6 = vld [vmem:[%s5967_s23 + $0x360] sm:$0xff]  ;;  %v3394_v8 = vld [vmem:[%s5967_s23 + $0x358] sm:$0xff]  ;;  %v412_v9 = vld [vmem:[%s5968_s1 + $0x2a] sm:$0xff] }
  0x4f   :  { %3375 = vmatmul.mubr.msk.f32.vlgmr.msra.gmra.mxu1 %vm132_vm0, %v593_v51  ;;  %844 = vmatprep.subr.mxu0 %v3406_v52  ;;  %v597_v7 = vld [vmem:[%s5968_s1 + $0x23] sm:$0xff]  ;;  %v598_v12 = vld [vmem:[%s5968_s1 + $0x2b] sm:$0xff]  ;;  %v3390_v15 = vld [vmem:[%s5967_s23 + $0x338] sm:$0xff] }
  0x50   :  { %3344 = vmatmul.mubr.msk.f32.gmra.mxu0 %vm132_vm0, %v408_v53  ;;  %720 = vmatprep.mubr.f32.mxu1 %v5956_v50  ;;  %v3392_v11 = vld [vmem:[%s5967_s23 + $0x348] sm:$0xff]  ;;  %v3391_v13 = vld [vmem:[%s5967_s23 + $0x340] sm:$0xff]  ;;  %v413_v14 = vld [vmem:[%s5968_s1 + $0x32] sm:$0xff] }
  0x51   :  { %540 = vmatprep.mubr.f32.mxu0 %v5956_v50  ;;  %845 = vmatpush1.msra.mxu0 %v3405_v54  ;;  %v3389_v16 = vld [vmem:[%s5967_s23 + $0x330] sm:$0xff]  ;;  %v3388_v17 = vld [vmem:[%s5967_s23 + $0x328] sm:$0xff]  ;;  %v3387_v19 = vld [vmem:[%s5967_s23 + $0x320] sm:$0xff] }
  0x52   :  { %846 = vmatprep.subr.mxu0 %v3404_v55  ;;  %1083 = vmatprep.subr.mxu1 %v5956_v50  ;;  %v599_v18 = vld [vmem:[%s5968_s1 + $0x33] sm:$0xff]  ;;  %v3384_v23 = vld [vmem:[%s5967_s23 + $0x308] sm:$0xff]  ;;  %v600_v24 = vld [vmem:[%s5968_s1 + $0x3b] sm:$0xf] }
  0x53   :  { %3376 = vmatmul.mubr.msk.f32.gmra.mxu1 %vm132_vm0, %v594_v56  ;;  %847 = vmatpush1.msra.mxu0 %v3403_v57  ;;  %v414_v20 = vld [vmem:[%s5968_s1 + $0x3a] sm:$0xf]  ;;  %v3385_v22 = vld [vmem:[%s5967_s23 + $0x310] sm:$0xff]  ;;  %v3383_v25 = vld [vmem:[%s5967_s23 + $0x300] sm:$0xff] }
  0x54   :  { %3345 = vmatmul.mubr.msk.f32.gmra.mxu0 %vm132_vm0, %v409_v58  ;;  %726 = vmatprep.mubr.f32.mxu1 %v5956_v50  ;;  %v3386_v21 = vld [vmem:[%s5967_s23 + $0x318] sm:$0xff]  ;;  %v779_v26 = vld [vmem:[%s5968_s1 + $0x4] sm:$0xff]  ;;  %v780_v27 = vld [vmem:[%s5968_s1 + $0xc] sm:$0xff] }
  0x55   :  { %546 = vmatprep.mubr.f32.mxu0 %v5956_v50  ;;  %848 = vmatprep.subr.mxu0 %v3402_v59  ;;  %v781_v28 = vld [vmem:[%s5968_s1 + $0x14] sm:$0xff]  ;;  %v782_v29 = vld [vmem:[%s5968_s1 + $0x1c] sm:$0xff]  ;;  %v783_v30 = vld [vmem:[%s5968_s1 + $0x24] sm:$0xff] }
  0x56   :  { %849 = vmatpush1.msra.mxu0 %v3401_v60  ;;  %v784_v31 = vld [vmem:[%s5968_s1 + $0x2c] sm:$0xff]  ;;  %v785_v32 = vld [vmem:[%s5968_s1 + $0x34] sm:$0xff]  ;;  %v786_v33 = vld [vmem:[%s5968_s1 + $0x3c] sm:$0xf] }
  0x57   :  { %3377 = vmatmul.mubr.msk.f32.gmra.mxu1 %vm132_vm0, %v595_v61  ;;  %850 = vmatprep.subr.mxu0 %v3400_v62  ;;  %v1031_v34 = vld [vmem:[%s5936_s5 + $0x78] sm:$0xff]  ;;  %v1030_v36 = vld [vmem:[%s5936_s5 + $0x70] sm:$0xff]  ;;  %v1029_v38 = vld [vmem:[%s5936_s5 + $0x68] sm:$0xff] }
  0x58   :  { %3346 = vmatmul.mubr.msk.f32.gmra.mxu0 %vm132_vm0, %v410_v63  ;;  %732 = vmatprep.mubr.f32.mxu1 %v5956_v50  ;;  %v1052_v35 = vld [vmem:[%s5937_s6 + $0x78] sm:$0xff]  ;;  %v1051_v37 = vld [vmem:[%s5937_s6 + $0x70] sm:$0xff]  ;;  %v1050_v39 = vld [vmem:[%s5937_s6 + $0x68] sm:$0xff] }
  0x59   :  { %552 = vmatprep.mubr.f32.mxu0 %v5956_v50  ;;  %851 = vmatpush1.msra.mxu0 %v3399_v0  ;;  %v1028_v40 = vld [vmem:[%s5936_s5 + $0x60] sm:$0xff]  ;;  %v1027_v42 = vld [vmem:[%s5936_s5 + $0x58] sm:$0xff]  ;;  %v1026_v44 = vld [vmem:[%s5936_s5 + $0x50] sm:$0xff] }
  0x5a   :  { %852 = vmatprep.subr.mxu0 %v3398_v1  ;;  %1084 = vmatpush1.msra.mxu1 %v1031_v34  ;;  %v1049_v41 = vld [vmem:[%s5937_s6 + $0x60] sm:$0xff]  ;;  %v1048_v43 = vld [vmem:[%s5937_s6 + $0x58] sm:$0xff]  ;;  %v1047_v45 = vld [vmem:[%s5937_s6 + $0x50] sm:$0xff] }
  0x5b   :  { %3378 = vmatmul.mubr.msk.f32.gmra.mxu1 %vm132_vm0, %v596_v2  ;;  %853 = vmatpush1.msra.mxu0 %v3397_v3  ;;  %v1025_v46 = vld [vmem:[%s5936_s5 + $0x48] sm:$0xff]  ;;  %v1024_v48 = vld [vmem:[%s5936_s5 + $0x40] sm:$0xff]  ;;  %v1023_v51 = vld [vmem:[%s5936_s5 + $0x38] sm:$0xff] }
  0x5c   :  { %3347 = vmatmul.mubr.msk.f32.gmra.mxu0 %vm132_vm0, %v411_v4  ;;  %738 = vmatprep.mubr.f32.mxu1 %v5956_v50  ;;  %v1046_v47 = vld [vmem:[%s5937_s6 + $0x48] sm:$0xff]  ;;  %v1045_v49 = vld [vmem:[%s5937_s6 + $0x40] sm:$0xff]  ;;  %v1044_v52 = vld [vmem:[%s5937_s6 + $0x38] sm:$0xff] }
  0x5d   :  { %854 = vmatprep.subr.mxu0 %v3396_v5  ;;  %558 = vmatprep.mubr.f32.mxu0 %v5956_v50  ;;  %v1022_v53 = vld [vmem:[%s5936_s5 + $0x30] sm:$0xff]  ;;  %v1021_v55 = vld [vmem:[%s5936_s5 + $0x28] sm:$0xff]  ;;  %v1020_v57 = vld [vmem:[%s5936_s5 + $0x20] sm:$0xff] }
  0x5e   :  { %855 = vmatpush1.msra.mxu0 %v3395_v6  ;;  %1085 = vmatprep.subr.mxu1 %v5956_v50  ;;  %v1043_v54 = vld [vmem:[%s5937_s6 + $0x30] sm:$0xff]  ;;  %v1042_v56 = vld [vmem:[%s5937_s6 + $0x28] sm:$0xff]  ;;  %v1041_v58 = vld [vmem:[%s5937_s6 + $0x20] sm:$0xff] }
  0x5f   :  { %3379 = vmatmul.mubr.msk.f32.gmra.mxu1 %vm132_vm0, %v597_v7  ;;  %856 = vmatprep.subr.mxu0 %v3394_v8  ;;  %v1019_v59 = vld [vmem:[%s5936_s5 + $0x18] sm:$0xff]  ;;  %v1018_v61 = vld [vmem:[%s5936_s5 + $0x10] sm:$0xff]  ;;  %v1017_v63 = vld [vmem:[%s5936_s5 + $0x8] sm:$0xff] }
  0x60   :  { %3348 = vmatmul.mubr.msk.f32.gmra.mxu0 %vm132_vm0, %v412_v9  ;;  %744 = vmatprep.mubr.f32.mxu1 %v5956_v50  ;;  %v1040_v60 = vld [vmem:[%s5937_s6 + $0x18] sm:$0xff]  ;;  %v1039_v62 = vld [vmem:[%s5937_s6 + $0x10] sm:$0xff]  ;;  %v1038_v0 = vld [vmem:[%s5937_s6 + $0x8] sm:$0xff] }
  0x61   :  { %857 = vmatpush1.msra.mxu0 %v3393_v10  ;;  %564 = vmatprep.mubr.f32.mxu0 %v5956_v50  ;;  %v1016_v1 = vld [vmem:[%s5936_s5] sm:$0xff]  ;;  %v1035_v5 = vld [vmem:[%s5936_s5 + $0x98] sm:$0xff]  ;;  %v1034_v7 = vld [vmem:[%s5936_s5 + $0x90] sm:$0xff] }
  0x62   :  { %858 = vmatprep.subr.mxu0 %v3392_v11  ;;  %1086 = vmatpush1.msra.mxu1 %v1030_v36  ;;  %v1037_v2 = vld [vmem:[%s5937_s6] sm:$0xff]  ;;  %v1056_v6 = vld [vmem:[%s5937_s6 + $0x98] sm:$0xff]  ;;  %v1055_v8 = vld [vmem:[%s5937_s6 + $0x90] sm:$0xff] }
  0x63   :  { %3380 = vmatmul.mubr.msk.f32.gmra.mxu1 %vm132_vm0, %v598_v12  ;;  %859 = vmatpush1.msra.mxu0 %v3391_v13  ;;  %v1036_v3 = vld [vmem:[%s5936_s5 + $0xa0] sm:$0xff]  ;;  %v1033_v9 = vld [vmem:[%s5936_s5 + $0x88] sm:$0xff] }
  0x64   :  { %3349 = vmatmul.mubr.msk.f32.gmra.mxu0 %vm132_vm0, %v413_v14  ;;  %860 = vmatprep.subr.mxu0 %v3390_v15  ;;  %v1057_v4 = vld [vmem:[%s5937_s6 + $0xa0] sm:$0xff]  ;;  %v1054_v10 = vld [vmem:[%s5937_s6 + $0x88] sm:$0xff] }
  0x65   :  { %750 = vmatprep.mubr.f32.mxu1 %v5956_v50  ;;  %861 = vmatpush1.msra.mxu0 %v3389_v16  ;;  %v1032_v11 = vld [vmem:[%s5936_s5 + $0x80] sm:$0xff] }
  0x66   :  { %862 = vmatprep.subr.mxu0 %v3388_v17  ;;  %570 = vmatprep.mubr.f32.mxu0 %v5956_v50  ;;  %v1053_v12 = vld [vmem:[%s5937_s6 + $0x80] sm:$0xff]  ;;  %s5979_s6 = sld [smem:[#allocation15_spill]] }
  0x67   :  { %3381 = vmatmul.mubr.msk.f32.gmra.mxu1 %vm132_vm0, %v599_v18  ;;  %863 = vmatpush1.msra.mxu0 %v3387_v19 }
  0x68   :  { %3350 = vmatmul.mubr.msk.f32.gmra.mxu0 %vm132_vm0, %v414_v20  ;;  %864 = vmatprep.subr.mxu0 %v3386_v21 }
  0x69   :  { %756 = vmatprep.mubr.f32.mxu1 %v5956_v50  ;;  %865 = vmatpush1.msra.mxu0 %v3385_v22 }
  0x6a   :  { %866 = vmatprep.subr.mxu0 %v3384_v23  ;;  %900 = vmatprep.mubr.f32.mxu0 %v5956_v50 }
  0x6b   :  { %3382 = vmatmul.mubr.msk.f32.gmra.mxu1 %vm132_vm0, %v600_v24  ;;  %867 = vmatpush1.msra.mxu0 %v3383_v25 }
  0x6c   :  { %3407 = vmatmul.mubr.msk.f32.vlgmr.msra.gmra.mxu0 %vm132_vm0, %v779_v26  ;;  %1188 = vmatprep.subr.mxu0 %v5956_v50 }
  0x6d   :  { %906 = vmatprep.mubr.f32.mxu0 %v5956_v50  ;;  %1189 = vmatpush1.msra.mxu0 %v1052_v35 }
  0x6e   :  { %1190 = vmatprep.subr.mxu0 %v5956_v50  ;;  %1087 = vmatprep.subr.mxu1 %v5956_v50 }
  0x6f   :  { %1191 = vmatpush1.msra.mxu0 %v1051_v37  ;;  %1088 = vmatpush1.msra.mxu1 %v1029_v38 }
  0x70   :  { %3408 = vmatmul.mubr.msk.f32.gmra.mxu0 %vm132_vm0, %v780_v27  ;;  %1192 = vmatprep.subr.mxu0 %v5956_v50 }
  0x71   :  { %912 = vmatprep.mubr.f32.mxu0 %v5956_v50  ;;  %1193 = vmatpush1.msra.mxu0 %v1050_v39 }
  0x72   :  { %1089 = vmatprep.subr.mxu1 %v5956_v50  ;;  %1194 = vmatprep.subr.mxu0 %v5956_v50 }
  0x73   :  { %1090 = vmatpush1.msra.mxu1 %v1028_v40  ;;  %1195 = vmatpush1.msra.mxu0 %v1049_v41 }
  0x74   :  { %3409 = vmatmul.mubr.msk.f32.gmra.mxu0 %vm132_vm0, %v781_v28  ;;  %1091 = vmatprep.subr.mxu1 %v5956_v50 }
  0x75   :  { %918 = vmatprep.mubr.f32.mxu0 %v5956_v50  ;;  %1196 = vmatprep.subr.mxu0 %v5956_v50 }
  0x76   :  { %1092 = vmatpush1.msra.mxu1 %v1027_v42  ;;  %1197 = vmatpush1.msra.mxu0 %v1048_v43 }
  0x77   :  { %1093 = vmatprep.subr.mxu1 %v5956_v50  ;;  %1198 = vmatprep.subr.mxu0 %v5956_v50 }
  0x78   :  { %3410 = vmatmul.mubr.msk.f32.gmra.mxu0 %vm132_vm0, %v782_v29  ;;  %1094 = vmatpush1.msra.mxu1 %v1026_v44 }
  0x79   :  { %924 = vmatprep.mubr.f32.mxu0 %v5956_v50  ;;  %1199 = vmatpush1.msra.mxu0 %v1047_v45 }
  0x7a   :  { %1095 = vmatprep.subr.mxu1 %v5956_v50  ;;  %1200 = vmatprep.subr.mxu0 %v5956_v50 }
  0x7b   :  { %1096 = vmatpush1.msra.mxu1 %v1025_v46  ;;  %1201 = vmatpush1.msra.mxu0 %v1046_v47 }
  0x7c   :  { %3411 = vmatmul.mubr.msk.f32.gmra.mxu0 %vm132_vm0, %v783_v30  ;;  %1097 = vmatprep.subr.mxu1 %v5956_v50 }
  0x7d   :  { %930 = vmatprep.mubr.f32.mxu0 %v5956_v50  ;;  %1202 = vmatprep.subr.mxu0 %v5956_v50 }
  0x7e   :  { %1098 = vmatpush1.msra.mxu1 %v1024_v48  ;;  %1203 = vmatpush1.msra.mxu0 %v1045_v49 }
  0x7f   :  { %1099 = vmatprep.subr.mxu1 %v5956_v50  ;;  %1204 = vmatprep.subr.mxu0 %v5956_v50 }
  0x80   :  { %3412 = vmatmul.mubr.msk.f32.gmra.mxu0 %vm132_vm0, %v784_v31  ;;  %1100 = vmatpush1.msra.mxu1 %v1023_v51 }
  0x81   :  { %936 = vmatprep.mubr.f32.mxu0 %v5956_v50  ;;  %1205 = vmatpush1.msra.mxu0 %v1044_v52 }
  0x82   :  { %1101 = vmatprep.subr.mxu1 %v5956_v50  ;;  %1206 = vmatprep.subr.mxu0 %v5956_v50 }
  0x83   :  { %1102 = vmatpush1.msra.mxu1 %v1022_v53  ;;  %1207 = vmatpush1.msra.mxu0 %v1043_v54 }
  0x84   :  { %3413 = vmatmul.mubr.msk.f32.gmra.mxu0 %vm132_vm0, %v785_v32  ;;  %1103 = vmatprep.subr.mxu1 %v5956_v50 }
  0x85   :  { %942 = vmatprep.mubr.f32.mxu0 %v5956_v50  ;;  %1208 = vmatprep.subr.mxu0 %v5956_v50 }
  0x86   :  { %1104 = vmatpush1.msra.mxu1 %v1021_v55  ;;  %1209 = vmatpush1.msra.mxu0 %v1042_v56 }
  0x87   :  { %1105 = vmatprep.subr.mxu1 %v5956_v50  ;;  %1210 = vmatprep.subr.mxu0 %v5956_v50 }
  0x88   :  { %3414 = vmatmul.mubr.msk.f32.gmra.mxu0 %vm132_vm0, %v786_v33  ;;  %1106 = vmatpush1.msra.mxu1 %v1020_v57 }
  0x89   :  { %1211 = vmatpush1.msra.mxu0 %v1041_v58  ;;  %1107 = vmatprep.subr.mxu1 %v5956_v50 }
  0x8a   :  { %1212 = vmatprep.subr.mxu0 %v5956_v50  ;;  %1108 = vmatpush1.msra.mxu1 %v1019_v59 }
  0x8b   :  { %1213 = vmatpush1.msra.mxu0 %v1040_v60  ;;  %1109 = vmatprep.subr.mxu1 %v5956_v50 }
  0x8c   :  { %1214 = vmatprep.subr.mxu0 %v5956_v50  ;;  %1110 = vmatpush1.msra.mxu1 %v1018_v61 }
  0x8d   :  { %1215 = vmatpush1.msra.mxu0 %v1039_v62  ;;  %1111 = vmatprep.subr.mxu1 %v5956_v50 }
  0x8e   :  { %1216 = vmatprep.subr.mxu0 %v5956_v50  ;;  %1112 = vmatpush1.msra.mxu1 %v1017_v63  ;;  %v966_v63 = vlaneseq }
  0x8f   :  { %1217 = vmatpush1.msra.mxu0 %v1038_v0  ;;  %1113 = vmatprep.subr.mxu1 %v5956_v50 }
  0x90   :  { %1218 = vmatprep.subr.mxu0 %v5956_v50  ;;  %1114 = vmatpush1.msra.mxu1 %v1016_v1 }
  0x91   :  { %1219 = vmatpush1.msra.mxu0 %v1037_v2  ;;  %1137 = vmatprep.subr.mxu1 %v5956_v50 }
  0x92   :  { %1242 = vmatprep.subr.mxu0 %v5956_v50  ;;  %1138 = vmatpush2.msra.mxu1 %v1036_v3  ;;  %v4897_v3 = vshrl.u32 %v966_v63, 7  ;;  %v66_v63 = vld [vmem:[%s5972_s28] sm:$0x3] }
  0x93   :  { %1243 = vmatpush2.msra.mxu0 %v1057_v4  ;;  %1139 = vmatprep.subr.mxu1 %v5956_v50 }
  0x94   :  { %1244 = vmatprep.subr.mxu0 %v5956_v50  ;;  %1140 = vmatpush2.msra.mxu1 %v1035_v5  ;;  %5971 = vst [vmem:[#allocation9_spill] sm:$0xff] %v4897_v3 }
  0x95   :  { %1245 = vmatpush2.msra.mxu0 %v1056_v6  ;;  %1141 = vmatprep.subr.mxu1 %v5956_v50 }
  0x96   :  { %1246 = vmatprep.subr.mxu0 %v5956_v50  ;;  %1142 = vmatpush2.msra.mxu1 %v1034_v7 }
  0x97   :  { %1247 = vmatpush2.msra.mxu0 %v1055_v8  ;;  %1143 = vmatprep.subr.mxu1 %v5956_v50 }
  0x98   :  { %1248 = vmatprep.subr.mxu0 %v5956_v50  ;;  %1144 = vmatpush2.msra.mxu1 %v1033_v9 }
  0x99   :  { %1249 = vmatpush2.msra.mxu0 %v1054_v10  ;;  %1145 = vmatprep.subr.mxu1 %v5956_v50  ;;  %v5958_v10 = vsub.s32 0, %v4897_v3 }
  0x9a   :  { %1250 = vmatprep.subr.mxu0 %v5956_v50  ;;  %1146 = vmatpush2.msra.mxu1 %v1032_v11  ;;  %v5961_v11 = vsub.s32 1, %v4897_v3 }
  0x9b   :  { %1251 = vmatpush2.msra.mxu0 %v1053_v12 }
  0xe5   :  { %v223_v13 = vpop.f32.mrf.mxu0 }
  0xe6   :  { %v360_v14 = vpop.f32.mrf.mxu1 }
  0xe7   :  { %v225_v15 = vpop.f32.mrf.mxu0  ;;  %v361_v4 = vadd.f32 %v360_v14, %v223_v13 }
  0xe8   :  { %v362_v16 = vpop.f32.mrf.mxu1 }
  0xe9   :  { %v229_v17 = vpop.f32.mrf.mxu0  ;;  %v363_v7 = vadd.f32 %v362_v16, %v225_v15 }
  0xea   :  { %v366_v18 = vpop.f32.mrf.mxu1 }
  0xeb   :  { %v231_v19 = vpop.f32.mrf.mxu0  ;;  %v367_v12 = vadd.f32 %v366_v18, %v229_v17  ;;  %v4920_v17 = vrot.slane %v66_v63, %v5961_v11 }
  0xec   :  { %v368_v20 = vpop.f32.mrf.mxu1 }
  0xed   :  { %v4837_v21 = vpop.f32.mrf.mxu0  ;;  %v369_v14 = vadd.f32 %v368_v20, %v231_v19 }
  0xee   :  { %v4839_v22 = vpop.f32.mrf.mxu1 }
  0xef   :  { %v4841_v23 = vpop.f32.mrf.mxu0  ;;  %v373_v18 = vadd.f32 %v4839_v22, %v4837_v21 }
  0xf0   :  { %v4843_v24 = vpop.f32.mrf.mxu1 }
  0xf1   :  { %v4845_v25 = vpop.f32.mrf.mxu0  ;;  %v375_v19 = vadd.f32 %v4843_v24, %v4841_v23 }
  0xf2   :  { %v4847_v26 = vpop.f32.mrf.mxu1 }
  0xf3   :  { %v4849_v27 = vpop.f32.mrf.mxu0 }
  0xf4   :  { %v4851_v28 = vpop.f32.mrf.mxu1 }
  0xf5   :  { %v4853_v29 = vpop.f32.mrf.mxu0  ;;  %v381_v22 = vadd.f32 %v4851_v28, %v4849_v27 }
  0xf6   :  { %v4855_v30 = vpop.f32.mrf.mxu1 }
  0xf7   :  { %v4857_v31 = vpop.f32.mrf.mxu0 }
  0xf8   :  { %v4859_v32 = vpop.f32.mrf.mxu1 }
  0xf9   :  { %v387_v27 = vadd.f32 %v4859_v32, %v4857_v31 }
  0xfa   :  { %v4861_v33 = vpop.f32.mrf.mxu0 }
  0xfb   :  { %v4863_v34 = vpop.f32.mrf.mxu1 }
  0xfc   :  { %v4865_v35 = vpop.f32.mrf.mxu0 }
  0xfd   :  { %v4867_v36 = vpop.f32.mrf.mxu1 }
 0x100   :  { %v4869_v37 = vpop.f32.mrf.mxu0 }
 0x101   :  { %v4871_v38 = vpop.f32.mrf.mxu1 }
 0x102   :  { %v4873_v39 = vpop.f32.mrf.mxu0 }
 0x103   :  { %v4875_v40 = vpop.f32.mrf.mxu1 }
 0x107   :  { %v4877_v41 = vpop.f32.mrf.mxu0  ;;  %v4879_v42 = vpop.f32.mrf.mxu1 }
 0x109   :  { %v4881_v43 = vpop.f32.mrf.mxu0  ;;  %v4883_v45 = vpop.f32.mrf.mxu1 }
 0x10a   :  { %5969 = vst [vmem:[#allocation7_spill] sm:$0xff] %v4881_v43  ;;  %5970 = vst [vmem:[#allocation8_spill] sm:$0xff] %v4883_v45 }
 0x10c   :  { %v530_v44 = vpop.f32.mrf.mxu0 }
 0x10d   :  { %v577_v8 = vadd.f32 %v530_v44, %v361_v4  ;;  %v4916_v44 = vrot.slane %v66_v63, %v5958_v10  ;;  %v379_v63 = vadd.f32 %v4847_v26, %v4845_v25 }
 0x10e   :  { %v532_v46 = vpop.f32.mrf.mxu0 }
 0x10f   :  { %v716_v47 = vpop.f32.mrf.mxu1  ;;  %v578_v50 = vadd.f32 %v532_v46, %v363_v7 }
 0x110   :  { %v536_v48 = vpop.f32.mrf.mxu0  ;;  %v763_v43 = vadd.f32 %v716_v47, %v577_v8 }
 0x111   :  { %v718_v49 = vpop.f32.mrf.mxu1  ;;  %v579_v15 = vadd.f32 %v536_v48, %v367_v12 }
 0x112   :  { %v538_v51 = vpop.f32.mrf.mxu0  ;;  %v764_v46 = vadd.f32 %v718_v49, %v578_v50 }
 0x113   :  { %v722_v52 = vpop.f32.mrf.mxu1  ;;  %v580_v4 = vadd.f32 %v538_v51, %v369_v14 }
 0x114   :  { %v542_v53 = vpop.f32.mrf.mxu0  ;;  %v765_v48 = vadd.f32 %v722_v52, %v579_v15 }
 0x115   :  { %v724_v54 = vpop.f32.mrf.mxu1  ;;  %v581_v8 = vadd.f32 %v542_v53, %v373_v18  ;;  %v385_v53 = vadd.f32 %v4855_v30, %v4853_v29 }
 0x116   :  { %v544_v55 = vpop.f32.mrf.mxu0  ;;  %v766_v11 = vadd.f32 %v724_v54, %v580_v4  ;;  %v397_v4 = vadd.f32 %v4871_v38, %v4869_v37 }
 0x117   :  { %v728_v57 = vpop.f32.mrf.mxu1  ;;  %v582_v10 = vadd.f32 %v544_v55, %v375_v19 }
 0x118   :  { %v548_v56 = vpop.f32.mrf.mxu0 }
 0x119   :  { %v730_v60 = vpop.f32.mrf.mxu1  ;;  %v583_v49 = vadd.f32 %v548_v56, %v379_v63 }
 0x11a   :  { %v550_v58 = vpop.f32.mrf.mxu0  ;;  %v768_v55 = vadd.f32 %v730_v60, %v582_v10  ;;  %v391_v60 = vadd.f32 %v4863_v34, %v4861_v33 }
 0x11b   :  { %v4891_v0 = vpop.f32.mrf.mxu1  ;;  %v584_v54 = vadd.f32 %v550_v58, %v381_v22 }
 0x11c   :  { %v4885_v59 = vpop.f32.mrf.mxu0  ;;  %v769_v29 = vadd.f32 %v4891_v0, %v583_v49 }
 0x11d   :  { %v4899_v5 = vpop.f32.mrf.mxu1  ;;  %v585_v30 = vadd.f32 %v4885_v59, %v385_v53  ;;  %v393_v59 = vadd.f32 %v4867_v36, %v4865_v35 }
 0x11e   :  { %v4887_v61 = vpop.f32.mrf.mxu0  ;;  %v770_v31 = vadd.f32 %v4899_v5, %v584_v54 }
 0x11f   :  { %v4910_v45 = vpop.f32.mrf.mxu1  ;;  %v586_v10 = vadd.f32 %v4887_v61, %v387_v27 }
 0x120   :  { %v4889_v62 = vpop.f32.mrf.mxu0  ;;  %v771_v34 = vadd.f32 %v4910_v45, %v585_v30  ;;  %v399_v45 = vadd.f32 %v4875_v40, %v4873_v39 }
 0x121   :  { %v742_v20 = vpop.f32.mrf.mxu1  ;;  %v587_v61 = vadd.f32 %v4889_v62, %v391_v60 }
 0x122   :  { %v4893_v1 = vpop.f32.mrf.mxu0 }
 0x123   :  { %v746_v23 = vpop.f32.mrf.mxu1  ;;  %v588_v35 = vadd.f32 %v4893_v1, %v393_v59  ;;  %v403_v1 = vadd.f32 %v4879_v42, %v4877_v41 }
 0x124   :  { %v4895_v2 = vpop.f32.mrf.mxu0  ;;  %v773_v37 = vadd.f32 %v746_v23, %v587_v61  ;;  %v5975_v23 = vld [vmem:[#allocation8_spill] sm:$0xff]  ;;  %v5977_v61 = vmov 0.0  }
 0x125   :  { %v748_v28 = vpop.f32.mrf.mxu1  ;;  %v589_v38 = vadd.f32 %v4895_v2, %v397_v4  ;;  %v5974_v2 = vld [vmem:[#allocation7_spill] sm:$0xff] }
 0x126   :  { %v4901_v6 = vpop.f32.mrf.mxu0  ;;  %v405_v49 = vadd.f32 %v5975_v23, %v5974_v2 }
 0x127   :  { %v752_v0 = vpop.f32.mrf.mxu1 }
 0x128   :  { %v4903_v9 = vpop.f32.mrf.mxu0  ;;  %v775_v41 = vadd.f32 %v752_v0, %v589_v38 }
 0x129   :  { %v754_v62 = vpop.f32.mrf.mxu1  ;;  %v591_v42 = vadd.f32 %v4903_v9, %v403_v1 }
 0x12a   :  { %v4912_v13 = vpop.f32.mrf.mxu0 }
 0x12b   :  { %5973 = vst [vmem:[#allocation10_spill] sm:$0xff] %v4912_v13 }
 0x12c   :  { %v902_v16 = vpop.f32.mrf.mxu0 }
 0x12d   :  { %v949_v7 = vadd.f32 %v902_v16, %v763_v43  ;;  %v767_v43 = vadd.f32 %v728_v57, %v581_v8 }
 0x12e   :  { %v904_v47 = vpop.f32.mrf.mxu0 }
 0x12f   :  { %v950_v12 = vadd.f32 %v904_v47, %v764_v46  ;;  %v976_v13 = vadd.f32 %v4916_v44, %v949_v7  ;;  %v772_v7 = vadd.f32 %v742_v20, %v586_v10 }
 0x130   :  { %v908_v3 = vpop.f32.mrf.mxu0 }
 0x131   :  { %v977_v50 = vadd.f32 %v4920_v17, %v950_v12  ;;  %v951_v21 = vadd.f32 %v908_v3, %v765_v48  ;;  %v992_v14 = vmax.f32 %v976_v13, 0.0 }
 0x132   :  { %v910_v24 = vpop.f32.mrf.mxu0  ;;  %v5976_v54 = vld [vmem:[#allocation10_spill] sm:$0xff] }
 0x133   :  { %v993_v51 = vmax.f32 %v977_v50, 0.0  ;;  %v952_v52 = vadd.f32 %v910_v24, %v766_v11  ;;  %v978_v25 = vadd.f32 %v4916_v44, %v951_v21  ;;  %v590_v50 = vadd.f32 %v4901_v6, %v399_v45 }
 0x134   :  { %v914_v26 = vpop.f32.mrf.mxu0 }
 0x135   :  { %v979_v3 = vadd.f32 %v4920_v17, %v952_v52  ;;  %v953_v15 = vadd.f32 %v914_v26, %v767_v43  ;;  %3415 = vmatprep.mubr.msk.f32.mxu1 %vm1058_vm1, %v993_v51  ;;  %3423 = vmatprep.mubr.msk.f32.mxu0 %vm1058_vm1, %v993_v51  ;;  %v994_v11 = vmax.f32 %v978_v25, 0.0  ;;  %v774_v43 = vadd.f32 %v748_v28, %v588_v35  ;;  %v758_v51 = vpop.f32.mrf.mxu1 }
 0x136   :  { %v916_v56 = vpop.f32.mrf.mxu0  ;;  %1148 = vmatmul.mubr.f32.vlgmr.msra.gmra.mxu1 %v992_v14  ;;  %1253 = vmatmul.mubr.f32.vlgmr.msra.gmra.mxu0 %v992_v14  ;;  %v777_v9 = vadd.f32 %v758_v51, %v591_v42 }
 0x137   :  { %v995_v57 = vmax.f32 %v979_v3, 0.0  ;;  %v954_v58 = vadd.f32 %v916_v56, %v768_v55  ;;  %v980_v13 = vadd.f32 %v4916_v44, %v953_v15  ;;  %v776_v55 = vadd.f32 %v754_v62, %v590_v50  ;;  %v760_v28 = vpop.f32.mrf.mxu1 }
 0x138   :  { %v920_v16 = vpop.f32.mrf.mxu0  ;;  %v592_v3 = vadd.f32 %v5976_v54, %v405_v49 }
 0x139   :  { %v981_v32 = vadd.f32 %v4920_v17, %v954_v58  ;;  %v955_v18 = vadd.f32 %v920_v16, %v769_v29  ;;  %3416 = vmatprep.mubr.msk.f32.mxu1 %vm1058_vm1, %v995_v57  ;;  %3424 = vmatprep.mubr.msk.f32.mxu0 %vm1058_vm1, %v995_v57  ;;  %v996_v19 = vmax.f32 %v980_v13, 0.0 }
 0x13a   :  { %v922_v33 = vpop.f32.mrf.mxu0  ;;  %1153 = vmatmul.mubr.f32.gmra.mxu1 %v994_v11  ;;  %1258 = vmatmul.mubr.f32.gmra.mxu0 %v994_v11  ;;  %v778_v10 = vadd.f32 %v760_v28, %v592_v3  ;;  %v1010_v28 = vld [vmem:[%s5978_s30 + $0x10] sm:$0xff] }
 0x13b   :  { %v997_v46 = vmax.f32 %v981_v32, 0.0  ;;  %v956_v5 = vadd.f32 %v922_v33, %v770_v31  ;;  %v982_v47 = vadd.f32 %v4916_v44, %v955_v18 }
 0x13c   :  { %v926_v48 = vpop.f32.mrf.mxu0 }
 0x13d   :  { %v983_v36 = vadd.f32 %v4920_v17, %v956_v5  ;;  %v957_v8 = vadd.f32 %v926_v48, %v771_v34  ;;  %3417 = vmatprep.mubr.msk.f32.mxu1 %vm1058_vm1, %v997_v46  ;;  %3425 = vmatprep.mubr.msk.f32.mxu0 %vm1058_vm1, %v997_v46  ;;  %v998_v21 = vmax.f32 %v982_v47, 0.0  ;;  %v3461_v46 = vld [vmem:[%s5938_s7 + $0x150] sm:$0xf] }
 0x13e   :  { %v928_v12 = vpop.f32.mrf.mxu0  ;;  %1158 = vmatmul.mubr.f32.gmra.mxu1 %v996_v19  ;;  %1263 = vmatmul.mubr.f32.gmra.mxu0 %v996_v19 }
 0x13f   :  { %v999_v20 = vmax.f32 %v983_v36, 0.0  ;;  %v958_v63 = vadd.f32 %v928_v12, %v772_v7  ;;  %v984_v22 = vadd.f32 %v4916_v44, %v957_v8 }
 0x140   :  { %v932_v24 = vpop.f32.mrf.mxu0 }
 0x141   :  { %v985_v39 = vadd.f32 %v4920_v17, %v958_v63  ;;  %v959_v40 = vadd.f32 %v932_v24, %v773_v37  ;;  %3418 = vmatprep.mubr.msk.f32.mxu1 %vm1058_vm1, %v999_v20  ;;  %3426 = vmatprep.mubr.msk.f32.mxu0 %vm1058_vm1, %v999_v20  ;;  %v1000_v14 = vmax.f32 %v984_v22, 0.0 }
 0x142   :  { %v934_v52 = vpop.f32.mrf.mxu0  ;;  %1163 = vmatmul.mubr.f32.gmra.mxu1 %v998_v21  ;;  %1268 = vmatmul.mubr.f32.gmra.mxu0 %v998_v21 }
 0x143   :  { %v1001_v6 = vmax.f32 %v985_v39, 0.0  ;;  %v960_v53 = vadd.f32 %v934_v52, %v774_v43  ;;  %v986_v25 = vadd.f32 %v4916_v44, %v959_v40 }
 0x144   :  { %v938_v26 = vpop.f32.mrf.mxu0 }
 0x145   :  { %v987_v15 = vadd.f32 %v4920_v17, %v960_v53  ;;  %v961_v27 = vadd.f32 %v938_v26, %v775_v41  ;;  %3419 = vmatprep.mubr.msk.f32.mxu1 %vm1058_vm1, %v1001_v6  ;;  %3427 = vmatprep.mubr.msk.f32.mxu0 %vm1058_vm1, %v1001_v6  ;;  %v1002_v57 = vmax.f32 %v986_v25, 0.0 }
 0x146   :  { %v940_v56 = vpop.f32.mrf.mxu0  ;;  %1168 = vmatmul.mubr.f32.gmra.mxu1 %v1000_v14  ;;  %1273 = vmatmul.mubr.f32.gmra.mxu0 %v1000_v14 }
 0x147   :  { %v1003_v29 = vmax.f32 %v987_v15, 0.0  ;;  %v962_v30 = vadd.f32 %v940_v56, %v776_v55  ;;  %v988_v58 = vadd.f32 %v4916_v44, %v961_v27  ;;  %v1009_v27 = vld [vmem:[%s5978_s30 + $0x8] sm:$0xff]  ;;  %v1011_v56 = vld [vmem:[%s5978_s30 + $0x18] sm:$0xf] }
 0x148   :  { %v944_v60 = vpop.f32.mrf.mxu0 }
 0x149   :  { %v989_v11 = vadd.f32 %v4920_v17, %v962_v30  ;;  %v963_v13 = vadd.f32 %v944_v60, %v777_v9  ;;  %3420 = vmatprep.mubr.msk.f32.mxu1 %vm1058_vm1, %v1003_v29  ;;  %3428 = vmatprep.mubr.msk.f32.mxu0 %vm1058_vm1, %v1003_v29  ;;  %v1004_v18 = vmax.f32 %v988_v58, 0.0  ;;  %v1012_v9 = vld [vmem:[%s5979_s6] sm:$0xff]  ;;  %v1013_v29 = vld [vmem:[%s5979_s6 + $0x8] sm:$0xff]  ;;  %v1015_v60 = vld [vmem:[%s5979_s6 + $0x18] sm:$0xf] }
 0x14a   :  { %v946_v16 = vpop.f32.mrf.mxu0  ;;  %1173 = vmatmul.mubr.f32.gmra.mxu1 %v1002_v57  ;;  %1278 = vmatmul.mubr.f32.gmra.mxu0 %v1002_v57  ;;  %v1535_v30 = vld [vmem:[%s5938_s7 + $0xa8] sm:$0xf]  ;;  %v1014_v57 = vld [vmem:[%s5979_s6 + $0x10] sm:$0xff]  ;;  %v1534_v58 = vld [vmem:[%s5938_s7 + $0xa0] sm:$0xf] }
 0x14b   :  { %v1005_v31 = vmax.f32 %v989_v11, 0.0  ;;  %v964_v32 = vadd.f32 %v946_v16, %v778_v10  ;;  %v990_v59 = vadd.f32 %v4916_v44, %v963_v13  ;;  %v1008_v44 = vld [vmem:[%s5978_s30] sm:$0xff]  ;;  %v3460_v10 = vld [vmem:[%s5938_s7 + $0x148] sm:$0xff]  ;;  %v1533_v11 = vld [vmem:[%s5938_s7 + $0x98] sm:$0xff] }
 0x14c   :  { %v3459_v13 = vld [vmem:[%s5938_s7 + $0x140] sm:$0xff]  ;;  %v1532_v16 = vld [vmem:[%s5938_s7 + $0x90] sm:$0xff] }
 0x14d   :  { %v991_v0 = vadd.f32 %v4920_v17, %v964_v32  ;;  %3421 = vmatprep.mubr.msk.f32.mxu1 %vm1058_vm1, %v1005_v31  ;;  %3429 = vmatprep.mubr.msk.f32.mxu0 %vm1058_vm1, %v1005_v31  ;;  %v1006_v34 = vmax.f32 %v990_v59, 0.0  ;;  %v3462_v17 = vld [vmem:[%s5938_s7 + $0x158] sm:$0xf]  ;;  %v1531_v32 = vld [vmem:[%s5938_s7 + $0x88] sm:$0xff]  ;;  %v1530_v59 = vld [vmem:[%s5938_s7 + $0x80] sm:$0xff] }
 0x14e   :  { %1178 = vmatmul.mubr.f32.gmra.mxu1 %v1004_v18  ;;  %1283 = vmatmul.mubr.f32.gmra.mxu0 %v1004_v18  ;;  %v3458_v31 = vld [vmem:[%s5938_s7 + $0x138] sm:$0xff]  ;;  %v3457_v18 = vld [vmem:[%s5938_s7 + $0x130] sm:$0xff] }
 0x14f   :  { %v1007_v33 = vmax.f32 %v991_v0, 0.0  ;;  %3463 = vmatprep.subr.msk.mxu0 %vm1314_vm3, %v3462_v17  ;;  %v3456_v0 = vld [vmem:[%s5938_s7 + $0x128] sm:$0xff]  ;;  %v3454_v17 = vld [vmem:[%s5938_s7 + $0x118] sm:$0xff] }
 0x150   :  { %3464 = vmatpush1.msk.msra.mxu0 %vm1314_vm3, %v3461_v46  ;;  %v1527_v46 = vld [vmem:[%s5938_s7 + $0x68] sm:$0xff] }
 0x151   :  { %3422 = vmatprep.mubr.msk.f32.mxu1 %vm1058_vm1, %v1007_v33  ;;  %3430 = vmatprep.mubr.msk.f32.mxu0 %vm1058_vm1, %v1007_v33  ;;  %v1529_v33 = vld [vmem:[%s5938_s7 + $0x78] sm:$0xff] }
 0x152   :  { %1183 = vmatmul.mubr.f32.gmra.mxu1 %v1006_v34  ;;  %1288 = vmatmul.mubr.f32.gmra.mxu0 %v1006_v34  ;;  %v3455_v34 = vld [vmem:[%s5938_s7 + $0x120] sm:$0xff] }
 0x153   :  { %1641 = vmatprep.mubr.f32.mxu0 %v5977_v61  ;;  %3752 = vmatprep.mubr.msk.f32.mxu1 %vm1301_vm2, %v1008_v44  ;;  %v1528_v44 = vld [vmem:[%s5938_s7 + $0x70] sm:$0xff] }
 0x154   :  { %1589 = vmatprep.subr.mxu0 %v3460_v10  ;;  %v3517_v10 = vld [vmem:[%s5938_s7 + $0x298] sm:$0xff] }
 0x155   :  { %1590 = vmatpush1.msra.mxu0 %v3459_v13  ;;  %v3489_v13 = vld [vmem:[%s5938_s7 + $0x1e0] sm:$0xff] }
 0x156   :  { %1591 = vmatprep.subr.mxu0 %v3458_v31 }
 0x157   :  { %1592 = vmatpush1.msra.mxu0 %v3457_v18  ;;  %v3515_v18 = vld [vmem:[%s5938_s7 + $0x288] sm:$0xff] }
 0x158   :  { %1593 = vmatprep.subr.mxu0 %v3456_v0  ;;  %v3514_v0 = vld [vmem:[%s5938_s7 + $0x280] sm:$0xff] }
 0x159   :  { %1594 = vmatpush1.msra.mxu0 %v3455_v34  ;;  %v3513_v34 = vld [vmem:[%s5938_s7 + $0x278] sm:$0xff] }
 0x15a   :  { %1595 = vmatprep.subr.mxu0 %v3454_v17  ;;  %v3512_v17 = vld [vmem:[%s5938_s7 + $0x270] sm:$0xff] }
 0x1f6   :  { %v1149_v5 = vpop.f32.mrf.mxu1  ;;  %v1254_v4 = vpop.f32.mrf.mxu0 }
 0x1f7   :  { %v1293_v15 = vmax.f32 %v1149_v5, %v1254_v4  ;;  %v3453_v5 = vld [vmem:[%s5938_s7 + $0x110] sm:$0xff]  ;;  %v1526_v4 = vld [vmem:[%s5938_s7 + $0x60] sm:$0xff] }
 0x1f8   :  { %v1151_v7 = vpop.f32.mrf.mxu1  ;;  %v1256_v19 = vpop.f32.mrf.mxu0  ;;  %1596 = vmatpush1.msra.mxu0 %v3453_v5 }
 0x1f9   :  { %v3452_v7 = vld [vmem:[%s5938_s7 + $0x108] sm:$0xff]  ;;  %v1525_v19 = vld [vmem:[%s5938_s7 + $0x58] sm:$0xff] }
 0x1fa   :  { %v1154_v47 = vpop.f32.mrf.mxu1  ;;  %v1259_v48 = vpop.f32.mrf.mxu0  ;;  %1597 = vmatprep.subr.mxu0 %v3452_v7  ;;  %v3511_v7 = vld [vmem:[%s5938_s7 + $0x268] sm:$0xff] }
 0x1fb   :  { %v1294_v3 = vmax.f32 %v1154_v47, %v1259_v48  ;;  %v3451_v47 = vld [vmem:[%s5938_s7 + $0x100] sm:$0xff]  ;;  %v1524_v48 = vld [vmem:[%s5938_s7 + $0x50] sm:$0xff] }
 0x1fc   :  { %v1156_v35 = vpop.f32.mrf.mxu1  ;;  %v1261_v36 = vpop.f32.mrf.mxu0  ;;  %1598 = vmatpush1.msra.mxu0 %v3451_v47  ;;  %v3510_v47 = vld [vmem:[%s5938_s7 + $0x260] sm:$0xff] }
 0x1fd   :  { %v3450_v35 = vld [vmem:[%s5938_s7 + $0xf8] sm:$0xff]  ;;  %v1523_v36 = vld [vmem:[%s5938_s7 + $0x48] sm:$0xff] }
 0x1fe   :  { %v1159_v8 = vpop.f32.mrf.mxu1  ;;  %v1264_v45 = vpop.f32.mrf.mxu0  ;;  %1599 = vmatprep.subr.mxu0 %v3450_v35  ;;  %v3509_v35 = vld [vmem:[%s5938_s7 + $0x258] sm:$0xff] }
 0x1ff   :  { %v1295_v54 = vmax.f32 %v1159_v8, %v1264_v45  ;;  %v3449_v8 = vld [vmem:[%s5938_s7 + $0xf0] sm:$0xff]  ;;  %v1522_v45 = vld [vmem:[%s5938_s7 + $0x40] sm:$0xff] }
 0x200   :  { %v1161_v62 = vpop.f32.mrf.mxu1  ;;  %v1266_v12 = vpop.f32.mrf.mxu0  ;;  %1600 = vmatpush1.msra.mxu0 %v3449_v8  ;;  %v3508_v8 = vld [vmem:[%s5938_s7 + $0x250] sm:$0xff] }
 0x201   :  { %v3448_v62 = vld [vmem:[%s5938_s7 + $0xe8] sm:$0xff]  ;;  %v1521_v12 = vld [vmem:[%s5938_s7 + $0x38] sm:$0xff] }
 0x202   :  { %v1164_v37 = vpop.f32.mrf.mxu1  ;;  %v1269_v38 = vpop.f32.mrf.mxu0  ;;  %1601 = vmatprep.subr.mxu0 %v3448_v62  ;;  %v3507_v62 = vld [vmem:[%s5938_s7 + $0x248] sm:$0xff] }
 0x203   :  { %v1296_v26 = vmax.f32 %v1164_v37, %v1269_v38  ;;  %v3447_v37 = vld [vmem:[%s5938_s7 + $0xe0] sm:$0xff]  ;;  %v1520_v38 = vld [vmem:[%s5938_s7 + $0x30] sm:$0xff] }
 0x204   :  { %v1166_v20 = vpop.f32.mrf.mxu1  ;;  %v1271_v63 = vpop.f32.mrf.mxu0  ;;  %1602 = vmatpush1.msra.mxu0 %v3447_v37  ;;  %v3506_v37 = vld [vmem:[%s5938_s7 + $0x240] sm:$0xff] }
 0x205   :  { %v3446_v20 = vld [vmem:[%s5938_s7 + $0xd8] sm:$0xff]  ;;  %v1519_v63 = vld [vmem:[%s5938_s7 + $0x28] sm:$0xff] }
 0x206   :  { %v1169_v1 = vpop.f32.mrf.mxu1  ;;  %v1274_v50 = vpop.f32.mrf.mxu0  ;;  %1603 = vmatprep.subr.mxu0 %v3446_v20  ;;  %v3505_v20 = vld [vmem:[%s5938_s7 + $0x238] sm:$0xff] }
 0x207   :  { %v1297_v25 = vmax.f32 %v1169_v1, %v1274_v50  ;;  %v3445_v1 = vld [vmem:[%s5938_s7 + $0xd0] sm:$0xff]  ;;  %v1518_v50 = vld [vmem:[%s5938_s7 + $0x20] sm:$0xff] }
 0x208   :  { %v1171_v21 = vpop.f32.mrf.mxu1  ;;  %v1276_v22 = vpop.f32.mrf.mxu0  ;;  %1604 = vmatpush1.msra.mxu0 %v3445_v1  ;;  %v3504_v1 = vld [vmem:[%s5938_s7 + $0x230] sm:$0xff] }
 0x209   :  { %v3444_v21 = vld [vmem:[%s5938_s7 + $0xc8] sm:$0xff]  ;;  %v1517_v22 = vld [vmem:[%s5938_s7 + $0x18] sm:$0xff] }
 0x20a   :  { %v1174_v24 = vpop.f32.mrf.mxu1  ;;  %v1279_v43 = vpop.f32.mrf.mxu0  ;;  %1605 = vmatprep.subr.mxu0 %v3444_v21  ;;  %v3503_v21 = vld [vmem:[%s5938_s7 + $0x228] sm:$0xff] }
 0x20b   :  { %v1298_v14 = vmax.f32 %v1174_v24, %v1279_v43  ;;  %v3443_v24 = vld [vmem:[%s5938_s7 + $0xc0] sm:$0xff]  ;;  %v1516_v43 = vld [vmem:[%s5938_s7 + $0x10] sm:$0xff] }
 0x20c   :  { %v1176_v39 = vpop.f32.mrf.mxu1  ;;  %v1281_v40 = vpop.f32.mrf.mxu0  ;;  %1606 = vmatpush1.msra.mxu0 %v3443_v24  ;;  %v3502_v24 = vld [vmem:[%s5938_s7 + $0x220] sm:$0xff] }
 0x20d   :  { %v3442_v39 = vld [vmem:[%s5938_s7 + $0xb8] sm:$0xff]  ;;  %v1515_v40 = vld [vmem:[%s5938_s7 + $0x8] sm:$0xff] }
 0x20e   :  { %v1179_v2 = vpop.f32.mrf.mxu1  ;;  %v1284_v23 = vpop.f32.mrf.mxu0  ;;  %1607 = vmatprep.subr.mxu0 %v3442_v39  ;;  %v3501_v39 = vld [vmem:[%s5938_s7 + $0x218] sm:$0xff] }
 0x20f   :  { %v1299_v55 = vmax.f32 %v1179_v2, %v1284_v23  ;;  %v3441_v2 = vld [vmem:[%s5938_s7 + $0xb0] sm:$0xff]  ;;  %v1514_v23 = vld [vmem:[%s5938_s7] sm:$0xff] }
 0x210   :  { %v1181_v49 = vpop.f32.mrf.mxu1  ;;  %v1286_v51 = vpop.f32.mrf.mxu0  ;;  %1608 = vmatpush1.msra.mxu0 %v3441_v2  ;;  %v3500_v2 = vld [vmem:[%s5938_s7 + $0x210] sm:$0xff] }
 0x211   :  { %v3494_v49 = vld [vmem:[%s5938_s7 + $0x208] sm:$0xf]  ;;  %v3521_v51 = vld [vmem:[%s5938_s7 + $0x2b8] sm:$0xf] }
 0x212   :  { %v1184_v52 = vpop.f32.mrf.mxu1  ;;  %v1289_v41 = vpop.f32.mrf.mxu0  ;;  %3495 = vmatprep.subr.msk.mxu0 %vm1314_vm3, %v3494_v49 }
 0x213   :  { %v1300_v42 = vmax.f32 %v1184_v52, %v1289_v41 }
 0x214   :  { %v1186_v6 = vpop.f32.mrf.mxu1  ;;  %v1291_v53 = vpop.f32.mrf.mxu0 }
 0x215   :  { %3736 = vmatprep.subr.msk.mxu1 %vm1314_vm3, %v1300_v42 }
 0x216   :  { %3737 = vmatpush3.msk.msra.mxu1 %vm1314_vm3, %v1300_v42 }
 0x217   :  { %3738 = vmatprep.subr.mxu1 %v1299_v55 }
 0x218   :  { %3739 = vmatpush3.msra.mxu1 %v1299_v55 }
 0x219   :  { %3740 = vmatprep.subr.mxu1 %v1298_v14 }
 0x21a   :  { %3741 = vmatpush3.msra.mxu1 %v1298_v14 }
 0x21b   :  { %3742 = vmatprep.subr.mxu1 %v1297_v25 }
 0x21c   :  { %3743 = vmatpush3.msra.mxu1 %v1297_v25 }
 0x21d   :  { %3744 = vmatprep.subr.mxu1 %v1296_v26 }
 0x21e   :  { %3745 = vmatpush3.msra.mxu1 %v1296_v26 }
 0x21f   :  { %3746 = vmatprep.subr.mxu1 %v1295_v54 }
 0x220   :  { %3747 = vmatpush3.msra.mxu1 %v1295_v54 }
 0x221   :  { %3748 = vmatprep.subr.mxu1 %v1294_v3 }
 0x222   :  { %3749 = vmatpush3.msra.mxu1 %v1294_v3 }
 0x223   :  { %3750 = vmatprep.subr.mxu1 %v1293_v15 }
 0x224   :  { %3751 = vmatpush3.msra.mxu1 %v1293_v15 }
 0x225   :  { %3758 = vmatprep.subr.msk.mxu1 %vm1314_vm3, %v1300_v42  ;;  %3753 = vmatmul.mubr.msk.f32.vlgmr.msra.gmra.mxu1 %vm1301_vm2, %v1009_v27  ;;  %v3493_v27 = vld [vmem:[%s5938_s7 + $0x200] sm:$0xf] }
 0x226   :  { %3759 = vmatpush3.msk.msra.mxu1 %vm1314_vm3, %v1300_v42  ;;  %3755 = vmatprep.mubr.msk.f32.mxu1 %vm1301_vm2, %v1010_v28  ;;  %v3520_v28 = vld [vmem:[%s5938_s7 + $0x2b0] sm:$0xf] }
 0x227   :  { %3760 = vmatprep.subr.mxu1 %v1299_v55 }
 0x228   :  { %3761 = vmatpush3.msra.mxu1 %v1299_v55 }
 0x229   :  { %3762 = vmatprep.subr.mxu1 %v1298_v14  ;;  %3756 = vmatmul.mubr.msk.f32.gmra.mxu1 %vm1301_vm2, %v1011_v56  ;;  %v3492_v56 = vld [vmem:[%s5938_s7 + $0x1f8] sm:$0xff] }
 0x22a   :  { %3763 = vmatpush3.msra.mxu1 %v1298_v14  ;;  %3774 = vmatprep.mubr.msk.f32.mxu1 %vm1301_vm2, %v1012_v9 }
 0x22b   :  { %3764 = vmatprep.subr.mxu1 %v1297_v25 }
 0x22c   :  { %3765 = vmatpush3.msra.mxu1 %v1297_v25 }
 0x22d   :  { %3766 = vmatprep.subr.mxu1 %v1296_v26 }
 0x22e   :  { %3767 = vmatpush3.msra.mxu1 %v1296_v26 }
 0x22f   :  { %3768 = vmatprep.subr.mxu1 %v1295_v54 }
 0x230   :  { %3769 = vmatpush3.msra.mxu1 %v1295_v54 }
 0x231   :  { %3770 = vmatprep.subr.mxu1 %v1294_v3 }
 0x232   :  { %3771 = vmatpush3.msra.mxu1 %v1294_v3 }
 0x233   :  { %3772 = vmatprep.subr.mxu1 %v1293_v15 }
 0x234   :  { %3773 = vmatpush3.msra.mxu1 %v1293_v15 }
 0x235   :  { %3775 = vmatmul.mubr.msk.f32.vlgmr.msra.gmra.mxu1 %vm1301_vm2, %v1013_v29  ;;  %3468 = vmatprep.subr.msk.mxu1 %vm1314_vm3, %v1535_v30  ;;  %v3519_v30 = vld [vmem:[%s5938_s7 + $0x2a8] sm:$0xff] }
 0x236   :  { %3777 = vmatprep.mubr.msk.f32.mxu1 %vm1301_vm2, %v1014_v57  ;;  %3469 = vmatpush1.msk.msra.mxu1 %vm1314_vm3, %v1534_v58  ;;  %v3491_v57 = vld [vmem:[%s5938_s7 + $0x1f0] sm:$0xff]  ;;  %v3518_v58 = vld [vmem:[%s5938_s7 + $0x2a0] sm:$0xff] }
 0x237   :  { %1687 = vmatprep.subr.mxu1 %v1533_v11 }
 0x238   :  { %1688 = vmatpush1.msra.mxu1 %v1532_v16  ;;  %v3516_v16 = vld [vmem:[%s5938_s7 + $0x290] sm:$0xff] }
 0x239   :  { %3778 = vmatmul.mubr.msk.f32.gmra.mxu1 %vm1301_vm2, %v1015_v60  ;;  %1689 = vmatprep.subr.mxu1 %v1531_v32  ;;  %v3490_v60 = vld [vmem:[%s5938_s7 + $0x1e8] sm:$0xff]  ;;  %v3488_v32 = vld [vmem:[%s5938_s7 + $0x1d8] sm:$0xff] }
 0x23a   :  { %1739 = vmatprep.mubr.f32.mxu1 %v5977_v61  ;;  %1690 = vmatpush1.msra.mxu1 %v1530_v59  ;;  %v3487_v59 = vld [vmem:[%s5938_s7 + $0x1d0] sm:$0xff] }
 0x23b   :  { %1691 = vmatprep.subr.mxu1 %v1529_v33  ;;  %v3486_v33 = vld [vmem:[%s5938_s7 + $0x1c8] sm:$0xff] }
 0x23c   :  { %1692 = vmatpush1.msra.mxu1 %v1528_v44  ;;  %v3485_v44 = vld [vmem:[%s5938_s7 + $0x1c0] sm:$0xff] }
 0x23d   :  { %1693 = vmatprep.subr.mxu1 %v1527_v46  ;;  %v3484_v46 = vld [vmem:[%s5938_s7 + $0x1b8] sm:$0xff] }
 0x23e   :  { %1694 = vmatpush1.msra.mxu1 %v1526_v4 }
 0x23f   :  { %1695 = vmatprep.subr.mxu1 %v1525_v19  ;;  %v3483_v19 = vld [vmem:[%s5938_s7 + $0x1b0] sm:$0xff] }
 0x240   :  { %1696 = vmatpush1.msra.mxu1 %v1524_v48  ;;  %v3482_v48 = vld [vmem:[%s5938_s7 + $0x1a8] sm:$0xff] }
 0x241   :  { %1697 = vmatprep.subr.mxu1 %v1523_v36  ;;  %v3481_v36 = vld [vmem:[%s5938_s7 + $0x1a0] sm:$0xff] }
 0x242   :  { %1698 = vmatpush1.msra.mxu1 %v1522_v45  ;;  %v3480_v45 = vld [vmem:[%s5938_s7 + $0x198] sm:$0xff] }
 0x243   :  { %1699 = vmatprep.subr.mxu1 %v1521_v12  ;;  %v3479_v12 = vld [vmem:[%s5938_s7 + $0x190] sm:$0xff] }
 0x244   :  { %1700 = vmatpush1.msra.mxu1 %v1520_v38  ;;  %v3478_v38 = vld [vmem:[%s5938_s7 + $0x188] sm:$0xff] }
 0x245   :  { %1701 = vmatprep.subr.mxu1 %v1519_v63  ;;  %v3477_v63 = vld [vmem:[%s5938_s7 + $0x180] sm:$0xff] }
 0x246   :  { %1702 = vmatpush1.msra.mxu1 %v1518_v50  ;;  %v3476_v50 = vld [vmem:[%s5938_s7 + $0x178] sm:$0xff] }
 0x247   :  { %1703 = vmatprep.subr.mxu1 %v1517_v22  ;;  %v3475_v22 = vld [vmem:[%s5938_s7 + $0x170] sm:$0xff] }
 0x248   :  { %1704 = vmatpush1.msra.mxu1 %v1516_v43  ;;  %v3474_v43 = vld [vmem:[%s5938_s7 + $0x168] sm:$0xff] }
 0x249   :  { %1705 = vmatprep.subr.mxu1 %v1515_v40  ;;  %v3473_v40 = vld [vmem:[%s5938_s7 + $0x160] sm:$0xff] }
 0x24a   :  { %1706 = vmatpush1.msra.mxu1 %v1514_v23  ;;  %v3548_v23 = vld [vmem:[%s5938_s7 + $0x368] sm:$0xf] }
 0x24b   :  { %3522 = vmatprep.subr.msk.mxu1 %vm1314_vm3, %v3521_v51 }
 0x2e5   :  { %v3754_v52 = vpop.f32.mrf.mxu1 }
 0x2e7   :  { %v1384_v41 = vpop.f32.mrf.mxu1 }
 0x2e9   :  { %v3757_v42 = vpop.f32.mrf.mxu1 }
 0x2eb   :  { %v1394_v6 = vpop.f32.mrf.mxu1 }
 0x2f5   :  { %v3776_v53 = vpop.f32.mrf.mxu1 }
 0x2f6   :  { %v1501_v55 = vmax.f32 %v3754_v52, %v3776_v53  ;;  %v3547_v52 = vld [vmem:[%s5938_s7 + $0x360] sm:$0xf] }
 0x2f7   :  { %v1481_v14 = vpop.f32.mrf.mxu1 }
 0x2f8   :  { %1506 = vst.msk [vmem:[#allocation2 + $0x8] sm:$0xff] %vm1504_vm4, %v1501_v55  ;;  %v1500_v25 = vmax.f32 %v1384_v41, %v1481_v14  ;;  %v3546_v41 = vld [vmem:[%s5938_s7 + $0x358] sm:$0xff]  ;;  %v3543_v55 = vld [vmem:[%s5938_s7 + $0x340] sm:$0xff] }
 0x2f9   :  { %v3779_v26 = vpop.f32.mrf.mxu1 }
 0x2fa   :  { %1505 = vst.msk [vmem:[#allocation2] sm:$0xff] %vm1504_vm4, %v1500_v25  ;;  %v1503_v54 = vmax.f32 %v3757_v42, %v3779_v26  ;;  %v3545_v42 = vld [vmem:[%s5938_s7 + $0x350] sm:$0xff]  ;;  %v3542_v25 = vld [vmem:[%s5938_s7 + $0x338] sm:$0xff] }
 0x2fb   :  { %v1491_v3 = vpop.f32.mrf.mxu1  ;;  %v3541_v26 = vld [vmem:[%s5938_s7 + $0x330] sm:$0xff] }
 0x2fc   :  { %1509 = vst.msk [vmem:[#allocation2 + $0x18] sm:$0xf] %vm1508_vm5, %v1503_v54  ;;  %v1502_v15 = vmax.f32 %v1394_v6, %v1491_v3  ;;  %v3544_v6 = vld [vmem:[%s5938_s7 + $0x348] sm:$0xff] }
 0x2fd   :  { %v3540_v54 = vld [vmem:[%s5938_s7 + $0x328] sm:$0xff] }
 0x2fe   :  { %1507 = vst.msk [vmem:[#allocation2 + $0x10] sm:$0xff] %vm1504_vm4, %v1502_v15  ;;  %v3539_v15 = vld [vmem:[%s5938_s7 + $0x320] sm:$0xff] }
 0x2ff   :  { %v1512_v31 = vld [vmem:[#allocation2 + $0x8] sm:$0xff] }
 0x301   :  { %v1536_v9 = vld [vmem:[#allocation2 + $0x1] sm:$0xff] }
 0x302   :  { %v1511_v29 = vld [vmem:[#allocation2] sm:$0xff]  ;;  %3465 = vmatmul.mubr.msk.f32.vlgmr.msra.gmra.mxu0 %vm1504_vm4, %v1536_v9  ;;  %v3536_v9 = vld [vmem:[%s5938_s7 + $0x308] sm:$0xff] }
 0x303   :  { %3470 = vmatmul.mubr.msk.f32.vlgmr.msra.gmra.mxu1 %vm1504_vm4, %v1511_v29  ;;  %3496 = vmatpush1.msk.msra.mxu0 %vm1314_vm3, %v3493_v27  ;;  %v1758_v49 = vld [vmem:[#allocation2 + $0x2] sm:$0xff] }
 0x304   :  { %3523 = vmatpush1.msk.msra.mxu1 %vm1314_vm3, %v3520_v28  ;;  %1811 = vmatprep.subr.mxu0 %v3492_v56  ;;  %v1888_v51 = vld [vmem:[#allocation2 + $0x3] sm:$0xff]  ;;  %v3538_v28 = vld [vmem:[%s5938_s7 + $0x318] sm:$0xff]  ;;  %v3537_v56 = vld [vmem:[%s5938_s7 + $0x310] sm:$0xff] }
 0x305   :  { %1941 = vmatprep.subr.mxu1 %v3519_v30  ;;  %1812 = vmatpush1.msra.mxu0 %v3491_v57  ;;  %v1537_v11 = vld [vmem:[#allocation2 + $0x9] sm:$0xff]  ;;  %v1538_v5 = vld [vmem:[#allocation2 + $0x11] sm:$0xff]  ;;  %v3535_v29 = vld [vmem:[%s5938_s7 + $0x300] sm:$0xff] }
 0x306   :  { %1942 = vmatpush1.msra.mxu1 %v3518_v58  ;;  %1647 = vmatprep.mubr.f32.mxu0 %v5977_v61  ;;  %v1513_v4 = vld [vmem:[#allocation2 + $0x10] sm:$0xff]  ;;  %v3534_v30 = vld [vmem:[%s5938_s7 + $0x2f8] sm:$0xff]  ;;  %v3532_v58 = vld [vmem:[%s5938_s7 + $0x2e8] sm:$0xff] }
 0x307   :  { %1745 = vmatprep.mubr.f32.mxu1 %v5977_v61  ;;  %1813 = vmatprep.subr.mxu0 %v3490_v60  ;;  %v1889_v53 = vld [vmem:[#allocation2 + $0xb] sm:$0xff]  ;;  %v1890_v3 = vld [vmem:[#allocation2 + $0x13] sm:$0xff]  ;;  %v3531_v60 = vld [vmem:[%s5938_s7 + $0x2e0] sm:$0xff] }
 0x308   :  { %1943 = vmatprep.subr.mxu1 %v3517_v10  ;;  %3466 = vmatmul.mubr.msk.f32.gmra.mxu0 %vm1504_vm4, %v1537_v11  ;;  %v1759_v14 = vld [vmem:[#allocation2 + $0xa] sm:$0xff]  ;;  %v1760_v27 = vld [vmem:[#allocation2 + $0x12] sm:$0xff] }
 0x309   :  { %3471 = vmatmul.mubr.msk.f32.gmra.mxu1 %vm1504_vm4, %v1512_v31  ;;  %1814 = vmatpush1.msra.mxu0 %v3489_v13  ;;  %v3533_v57 = vld [vmem:[%s5938_s7 + $0x2f0] sm:$0xff]  ;;  %v3530_v10 = vld [vmem:[%s5938_s7 + $0x2d8] sm:$0xff]  ;;  %v3528_v13 = vld [vmem:[%s5938_s7 + $0x2c8] sm:$0xff] }
 0x30a   :  { %1944 = vmatpush1.msra.mxu1 %v3516_v16  ;;  %1815 = vmatprep.subr.mxu0 %v3488_v32  ;;  %v3529_v11 = vld [vmem:[%s5938_s7 + $0x2d0] sm:$0xff]  ;;  %v3527_v16 = vld [vmem:[%s5938_s7 + $0x2c0] sm:$0xff] }
 0x30b   :  { %1945 = vmatprep.subr.mxu1 %v3515_v18  ;;  %1816 = vmatpush1.msra.mxu0 %v3487_v59  ;;  %v2018_v31 = vld [vmem:[#allocation2 + $0x4] sm:$0xff]  ;;  %v2019_v32 = vld [vmem:[#allocation2 + $0xc] sm:$0xff]  ;;  %v2020_v18 = vld [vmem:[#allocation2 + $0x14] sm:$0xff] }
 0x30c   :  { %1946 = vmatpush1.msra.mxu1 %v3514_v0  ;;  %1653 = vmatprep.mubr.f32.mxu0 %v5977_v61  ;;  %v2190_v59 = vld [vmem:[%s5942_s11 + $0x78] sm:$0xff] }
 0x30d   :  { %1751 = vmatprep.mubr.f32.mxu1 %v5977_v61  ;;  %1817 = vmatprep.subr.mxu0 %v3486_v33  ;;  %v2210_v0 = vld [vmem:[%s5943_s12 + $0x78] sm:$0xff]  ;;  %v2189_v33 = vld [vmem:[%s5942_s11 + $0x70] sm:$0xff] }
 0x30e   :  { %1947 = vmatprep.subr.mxu1 %v3513_v34  ;;  %3467 = vmatmul.mubr.msk.f32.gmra.mxu0 %vm1504_vm4, %v1538_v5  ;;  %v2209_v34 = vld [vmem:[%s5943_s12 + $0x70] sm:$0xff]  ;;  %v2207_v5 = vld [vmem:[%s5943_s12 + $0x60] sm:$0xff] }
 0x30f   :  { %3472 = vmatmul.mubr.msk.f32.gmra.mxu1 %vm1504_vm4, %v1513_v4  ;;  %1818 = vmatpush1.msra.mxu0 %v3485_v44  ;;  %v2188_v44 = vld [vmem:[%s5942_s11 + $0x68] sm:$0xff]  ;;  %v2186_v4 = vld [vmem:[%s5942_s11 + $0x58] sm:$0xff] }
 0x310   :  { %1948 = vmatpush1.msra.mxu1 %v3512_v17  ;;  %1819 = vmatprep.subr.mxu0 %v3484_v46  ;;  %v2208_v17 = vld [vmem:[%s5943_s12 + $0x68] sm:$0xff]  ;;  %v2187_v46 = vld [vmem:[%s5942_s11 + $0x60] sm:$0xff] }
 0x311   :  { %1949 = vmatprep.subr.mxu1 %v3511_v7  ;;  %1820 = vmatpush1.msra.mxu0 %v3483_v19  ;;  %v2206_v7 = vld [vmem:[%s5943_s12 + $0x58] sm:$0xff]  ;;  %v2185_v19 = vld [vmem:[%s5942_s11 + $0x50] sm:$0xff] }
 0x312   :  { %1950 = vmatpush1.msra.mxu1 %v3510_v47  ;;  %1821 = vmatprep.subr.mxu0 %v3482_v48  ;;  %v2205_v47 = vld [vmem:[%s5943_s12 + $0x50] sm:$0xff]  ;;  %v2184_v48 = vld [vmem:[%s5942_s11 + $0x48] sm:$0xff] }
 0x313   :  { %1951 = vmatprep.subr.mxu1 %v3509_v35  ;;  %1822 = vmatpush1.msra.mxu0 %v3481_v36  ;;  %v2204_v35 = vld [vmem:[%s5943_s12 + $0x48] sm:$0xff]  ;;  %v2183_v36 = vld [vmem:[%s5942_s11 + $0x40] sm:$0xff] }
 0x314   :  { %1952 = vmatpush1.msra.mxu1 %v3508_v8  ;;  %1823 = vmatprep.subr.mxu0 %v3480_v45  ;;  %v2203_v8 = vld [vmem:[%s5943_s12 + $0x40] sm:$0xff]  ;;  %v2182_v45 = vld [vmem:[%s5942_s11 + $0x38] sm:$0xff] }
 0x315   :  { %1953 = vmatprep.subr.mxu1 %v3507_v62  ;;  %1824 = vmatpush1.msra.mxu0 %v3479_v12  ;;  %v2202_v62 = vld [vmem:[%s5943_s12 + $0x38] sm:$0xff]  ;;  %v2181_v12 = vld [vmem:[%s5942_s11 + $0x30] sm:$0xff] }
 0x316   :  { %1954 = vmatpush1.msra.mxu1 %v3506_v37  ;;  %1825 = vmatprep.subr.mxu0 %v3478_v38  ;;  %v2201_v37 = vld [vmem:[%s5943_s12 + $0x30] sm:$0xff]  ;;  %v2180_v38 = vld [vmem:[%s5942_s11 + $0x28] sm:$0xff] }
 0x317   :  { %1955 = vmatprep.subr.mxu1 %v3505_v20  ;;  %1826 = vmatpush1.msra.mxu0 %v3477_v63  ;;  %v2200_v20 = vld [vmem:[%s5943_s12 + $0x28] sm:$0xff]  ;;  %v2179_v63 = vld [vmem:[%s5942_s11 + $0x20] sm:$0xff] }
 0x318   :  { %1956 = vmatpush1.msra.mxu1 %v3504_v1  ;;  %1827 = vmatprep.subr.mxu0 %v3476_v50  ;;  %v2199_v1 = vld [vmem:[%s5943_s12 + $0x20] sm:$0xff]  ;;  %v2178_v50 = vld [vmem:[%s5942_s11 + $0x18] sm:$0xff] }
 0x319   :  { %1957 = vmatprep.subr.mxu1 %v3503_v21  ;;  %1828 = vmatpush1.msra.mxu0 %v3475_v22  ;;  %v2198_v21 = vld [vmem:[%s5943_s12 + $0x18] sm:$0xff]  ;;  %v2177_v22 = vld [vmem:[%s5942_s11 + $0x10] sm:$0xff] }
 0x31a   :  { %1958 = vmatpush1.msra.mxu1 %v3502_v24  ;;  %1829 = vmatprep.subr.mxu0 %v3474_v43  ;;  %v2197_v24 = vld [vmem:[%s5943_s12 + $0x10] sm:$0xff]  ;;  %v2176_v43 = vld [vmem:[%s5942_s11 + $0x8] sm:$0xff] }
 0x31b   :  { %1959 = vmatprep.subr.mxu1 %v3501_v39  ;;  %1830 = vmatpush1.msra.mxu0 %v3473_v40  ;;  %v2196_v39 = vld [vmem:[%s5943_s12 + $0x8] sm:$0xff]  ;;  %v2175_v40 = vld [vmem:[%s5942_s11] sm:$0xff] }
 0x31c   :  { %1863 = vmatprep.mubr.f32.mxu0 %v5977_v61  ;;  %1960 = vmatpush1.msra.mxu1 %v3500_v2  ;;  %v2195_v2 = vld [vmem:[%s5943_s12] sm:$0xff] }
 0x31d   :  { %1993 = vmatprep.mubr.f32.mxu1 %v5977_v61  ;;  %3497 = vmatmul.mubr.msk.f32.vlgmr.msra.gmra.mxu0 %vm1504_vm4, %v1758_v49  ;;  %v2214_v49 = vld [vmem:[%s5943_s12 + $0x98] sm:$0xff] }
 0x31e   :  { %3524 = vmatmul.mubr.msk.f32.vlgmr.msra.gmra.mxu1 %vm1504_vm4, %v1888_v51  ;;  %3549 = vmatprep.subr.msk.mxu0 %vm1314_vm3, %v3548_v23  ;;  %v2194_v23 = vld [vmem:[%s5942_s11 + $0x98] sm:$0xff]  ;;  %v2193_v51 = vld [vmem:[%s5942_s11 + $0x90] sm:$0xff] }
 0x31f   :  { %1869 = vmatprep.mubr.f32.mxu0 %v5977_v61  ;;  %3550 = vmatpush1.msk.msra.mxu0 %vm1314_vm3, %v3547_v52  ;;  %v2213_v52 = vld [vmem:[%s5943_s12 + $0x90] sm:$0xff] }
 0x320   :  { %1999 = vmatprep.mubr.f32.mxu1 %v5977_v61  ;;  %2071 = vmatprep.subr.mxu0 %v3546_v41  ;;  %v2192_v41 = vld [vmem:[%s5942_s11 + $0x88] sm:$0xff] }
 0x321   :  { %2225 = vmatprep.subr.mxu1 %v5977_v61  ;;  %2072 = vmatpush1.msra.mxu0 %v3545_v42  ;;  %v2212_v42 = vld [vmem:[%s5943_s12 + $0x88] sm:$0xff] }
 0x322   :  { %3525 = vmatmul.mubr.msk.f32.gmra.mxu1 %vm1504_vm4, %v1889_v53  ;;  %3498 = vmatmul.mubr.msk.f32.gmra.mxu0 %vm1504_vm4, %v1759_v14  ;;  %v2211_v53 = vld [vmem:[%s5943_s12 + $0x80] sm:$0xff] }
 0x323   :  { %2073 = vmatprep.subr.mxu0 %v3544_v6  ;;  %1875 = vmatprep.mubr.f32.mxu0 %v5977_v61  ;;  %v2191_v6 = vld [vmem:[%s5942_s11 + $0x80] sm:$0xff]  ;;  %s4003_s11 = smov [#allocation4]  }
 0x324   :  { %2074 = vmatpush1.msra.mxu0 %v3543_v55  ;;  %2005 = vmatprep.mubr.f32.mxu1 %v5977_v61 }
 0x325   :  { %2075 = vmatprep.subr.mxu0 %v3542_v25  ;;  %2226 = vmatpush1.msra.mxu1 %v2190_v59 }
 0x326   :  { %2076 = vmatpush1.msra.mxu0 %v3541_v26  ;;  %3526 = vmatmul.mubr.msk.f32.gmra.mxu1 %vm1504_vm4, %v1890_v3 }
 0x327   :  { %3499 = vmatmul.mubr.msk.f32.gmra.mxu0 %vm1504_vm4, %v1760_v27  ;;  %2077 = vmatprep.subr.mxu0 %v3540_v54 }
 0x328   :  { %2078 = vmatpush1.msra.mxu0 %v3539_v15  ;;  %2123 = vmatprep.mubr.f32.mxu0 %v5977_v61 }
 0x329   :  { %2079 = vmatprep.subr.mxu0 %v3538_v28  ;;  %2227 = vmatprep.subr.mxu1 %v5977_v61 }
 0x32a   :  { %2080 = vmatpush1.msra.mxu0 %v3537_v56  ;;  %2228 = vmatpush1.msra.mxu1 %v2189_v33  ;;  %v1510_v33 = vld [vmem:[%s5939_s8] sm:$0x3] }
 0x32b   :  { %2081 = vmatprep.subr.mxu0 %v3536_v9  ;;  %2229 = vmatprep.subr.mxu1 %v5977_v61 }
 0x32c   :  { %2082 = vmatpush1.msra.mxu0 %v3535_v29  ;;  %2230 = vmatpush1.msra.mxu1 %v2188_v44 }
 0x32d   :  { %2083 = vmatprep.subr.mxu0 %v3534_v30  ;;  %2231 = vmatprep.subr.mxu1 %v5977_v61 }
 0x32e   :  { %2084 = vmatpush1.msra.mxu0 %v3533_v57  ;;  %2232 = vmatpush1.msra.mxu1 %v2187_v46 }
 0x32f   :  { %2085 = vmatprep.subr.mxu0 %v3532_v58  ;;  %2233 = vmatprep.subr.mxu1 %v5977_v61 }
 0x330   :  { %2086 = vmatpush1.msra.mxu0 %v3531_v60  ;;  %2234 = vmatpush1.msra.mxu1 %v2186_v4 }
 0x331   :  { %2087 = vmatprep.subr.mxu0 %v3530_v10  ;;  %2235 = vmatprep.subr.mxu1 %v5977_v61 }
 0x332   :  { %2088 = vmatpush1.msra.mxu0 %v3529_v11  ;;  %2236 = vmatpush1.msra.mxu1 %v2185_v19 }
 0x333   :  { %2089 = vmatprep.subr.mxu0 %v3528_v13  ;;  %2237 = vmatprep.subr.mxu1 %v5977_v61 }
 0x334   :  { %2090 = vmatpush1.msra.mxu0 %v3527_v16  ;;  %2238 = vmatpush1.msra.mxu1 %v2184_v48 }
 0x335   :  { %3551 = vmatmul.mubr.msk.f32.vlgmr.msra.gmra.mxu0 %vm1504_vm4, %v2018_v31  ;;  %2305 = vmatprep.subr.mxu0 %v5977_v61 }
 0x336   :  { %2129 = vmatprep.mubr.f32.mxu0 %v5977_v61  ;;  %2306 = vmatpush1.msra.mxu0 %v2210_v0 }
 0x337   :  { %2307 = vmatprep.subr.mxu0 %v5977_v61  ;;  %2239 = vmatprep.subr.mxu1 %v5977_v61 }
 0x338   :  { %2308 = vmatpush1.msra.mxu0 %v2209_v34  ;;  %2240 = vmatpush1.msra.mxu1 %v2183_v36 }
 0x339   :  { %3552 = vmatmul.mubr.msk.f32.gmra.mxu0 %vm1504_vm4, %v2019_v32  ;;  %2309 = vmatprep.subr.mxu0 %v5977_v61 }
 0x33a   :  { %2135 = vmatprep.mubr.f32.mxu0 %v5977_v61  ;;  %2310 = vmatpush1.msra.mxu0 %v2208_v17 }
 0x33b   :  { %2311 = vmatprep.subr.mxu0 %v5977_v61  ;;  %2241 = vmatprep.subr.mxu1 %v5977_v61 }
 0x33c   :  { %2312 = vmatpush1.msra.mxu0 %v2207_v5  ;;  %2242 = vmatpush1.msra.mxu1 %v2182_v45 }
 0x33d   :  { %3553 = vmatmul.mubr.msk.f32.gmra.mxu0 %vm1504_vm4, %v2020_v18  ;;  %2313 = vmatprep.subr.mxu0 %v5977_v61 }
 0x33e   :  { %2314 = vmatpush1.msra.mxu0 %v2206_v7  ;;  %2243 = vmatprep.subr.mxu1 %v5977_v61  ;;  %v5980_v7 = vld [vmem:[#allocation9_spill] sm:$0xff] }
 0x33f   :  { %2315 = vmatprep.subr.mxu0 %v5977_v61  ;;  %2244 = vmatpush1.msra.mxu1 %v2181_v12  ;;  %v5981_v19 = vsub.s32 0, %v5980_v7  ;;  %v5982_v48 = vsub.s32 1, %v5980_v7  ;;  %v3571_v7 = vld [vmem:[%s5944_s13 + $0x88] sm:$0xff] }
 0x340   :  { %2316 = vmatpush1.msra.mxu0 %v2205_v47  ;;  %2245 = vmatprep.subr.mxu1 %v5977_v61 }
 0x341   :  { %2317 = vmatprep.subr.mxu0 %v5977_v61  ;;  %2246 = vmatpush1.msra.mxu1 %v2180_v38  ;;  %v2152_v47 = vrot.slane %v1510_v33, %v5981_v19  ;;  %v2566_v19 = vld [vmem:[%s5944_s13 + $0x38] sm:$0xff] }
 0x342   :  { %2318 = vmatpush1.msra.mxu0 %v2204_v35  ;;  %2247 = vmatprep.subr.mxu1 %v5977_v61  ;;  %v2156_v35 = vrot.slane %v1510_v33, %v5982_v48  ;;  %v2565_v48 = vld [vmem:[%s5944_s13 + $0x30] sm:$0xff] }
 0x343   :  { %2319 = vmatprep.subr.mxu0 %v5977_v61  ;;  %2248 = vmatpush1.msra.mxu1 %v2179_v63 }
 0x344   :  { %2320 = vmatpush1.msra.mxu0 %v2203_v8  ;;  %2249 = vmatprep.subr.mxu1 %v5977_v61 }
 0x345   :  { %2321 = vmatprep.subr.mxu0 %v5977_v61  ;;  %2250 = vmatpush1.msra.mxu1 %v2178_v50 }
 0x346   :  { %2322 = vmatpush1.msra.mxu0 %v2202_v62  ;;  %2251 = vmatprep.subr.mxu1 %v5977_v61 }
 0x347   :  { %2323 = vmatprep.subr.mxu0 %v5977_v61  ;;  %2252 = vmatpush1.msra.mxu1 %v2177_v22 }
 0x348   :  { %2324 = vmatpush1.msra.mxu0 %v2201_v37  ;;  %2253 = vmatprep.subr.mxu1 %v5977_v61 }
 0x349   :  { %2325 = vmatprep.subr.mxu0 %v5977_v61  ;;  %2254 = vmatpush1.msra.mxu1 %v2176_v43 }
 0x34a   :  { %2326 = vmatpush1.msra.mxu0 %v2200_v20  ;;  %2255 = vmatprep.subr.mxu1 %v5977_v61 }
 0x34b   :  { %2327 = vmatprep.subr.mxu0 %v5977_v61  ;;  %2256 = vmatpush1.msra.mxu1 %v2175_v40 }
 0x34c   :  { %2328 = vmatpush1.msra.mxu0 %v2199_v1  ;;  %2281 = vmatprep.subr.mxu1 %v5977_v61 }
 0x34d   :  { %2329 = vmatprep.subr.mxu0 %v5977_v61  ;;  %2282 = vmatpush2.msra.mxu1 %v2194_v23 }
 0x34e   :  { %2330 = vmatpush1.msra.mxu0 %v2198_v21  ;;  %2283 = vmatprep.subr.mxu1 %v5977_v61 }
 0x34f   :  { %2331 = vmatprep.subr.mxu0 %v5977_v61  ;;  %2284 = vmatpush2.msra.mxu1 %v2193_v51 }
 0x350   :  { %2332 = vmatpush1.msra.mxu0 %v2197_v24  ;;  %2285 = vmatprep.subr.mxu1 %v5977_v61 }
 0x351   :  { %2333 = vmatprep.subr.mxu0 %v5977_v61  ;;  %2286 = vmatpush2.msra.mxu1 %v2192_v41 }
 0x352   :  { %2334 = vmatpush1.msra.mxu0 %v2196_v39  ;;  %2287 = vmatprep.subr.mxu1 %v5977_v61 }
 0x353   :  { %2335 = vmatprep.subr.mxu0 %v5977_v61  ;;  %2288 = vmatpush2.msra.mxu1 %v2191_v6 }
 0x354   :  { %2336 = vmatpush1.msra.mxu0 %v2195_v2 }
 0x355   :  { %2361 = vmatprep.subr.mxu0 %v5977_v61 }
 0x356   :  { %2362 = vmatpush2.msra.mxu0 %v2214_v49 }
 0x357   :  { %2363 = vmatprep.subr.mxu0 %v5977_v61 }
 0x358   :  { %2364 = vmatpush2.msra.mxu0 %v2213_v52 }
 0x359   :  { %2365 = vmatprep.subr.mxu0 %v5977_v61 }
 0x35a   :  { %2366 = vmatpush2.msra.mxu0 %v2212_v42 }
 0x35b   :  { %2367 = vmatprep.subr.mxu0 %v5977_v61 }
 0x35c   :  { %2368 = vmatpush2.msra.mxu0 %v2211_v53 }
 0x35d   :  { %3798 = vmatprep.subr.mxu0 %v5977_v61 }
 0x3c2   :  { %v1643_v55 = vpop.f32.mrf.mxu0 }
 0x3c3   :  { %v1741_v26 = vpop.f32.mrf.mxu1 }
 0x3c4   :  { %v1645_v14 = vpop.f32.mrf.mxu0  ;;  %v1742_v13 = vadd.f32 %v1741_v26, %v1643_v55 }
 0x3c5   :  { %v1743_v3 = vpop.f32.mrf.mxu1 }
 0x3c6   :  { %v1744_v31 = vadd.f32 %v1743_v3, %v1645_v14 }
 0x3c8   :  { %v1649_v25 = vpop.f32.mrf.mxu0 }
 0x3c9   :  { %v1747_v27 = vpop.f32.mrf.mxu1 }
 0x3ca   :  { %v1651_v54 = vpop.f32.mrf.mxu0  ;;  %v1748_v59 = vadd.f32 %v1747_v27, %v1649_v25 }
 0x3cb   :  { %v1749_v56 = vpop.f32.mrf.mxu1 }
 0x3cc   :  { %v1750_v44 = vadd.f32 %v1749_v56, %v1651_v54  ;;  %v2171_v56 = vld [vmem:[%s5940_s9] sm:$0xff] }
 0x3ce   :  { %v1655_v15 = vpop.f32.mrf.mxu0 }
 0x3cf   :  { %v1753_v29 = vpop.f32.mrf.mxu1 }
 0x3d0   :  { %v1657_v28 = vpop.f32.mrf.mxu0  ;;  %v1754_v36 = vadd.f32 %v1753_v29, %v1655_v15  ;;  %v3572_v29 = vld [vmem:[%s5944_s13 + $0x90] sm:$0xff] }
 0x3d1   :  { %v1755_v57 = vpop.f32.mrf.mxu1 }
 0x3d2   :  { %v1756_v37 = vadd.f32 %v1755_v57, %v1657_v28 }
 0x3dd   :  { %v1865_v9 = vpop.f32.mrf.mxu0 }
 0x3de   :  { %v1995_v60 = vpop.f32.mrf.mxu1  ;;  %v1882_v32 = vadd.f32 %v1865_v9, %v1742_v13  ;;  %v3573_v9 = vld [vmem:[%s5944_s13 + $0x98] sm:$0xff] }
 0x3df   :  { %v1867_v30 = vpop.f32.mrf.mxu0 }
 0x3e0   :  { %v1997_v11 = vpop.f32.mrf.mxu1  ;;  %v1883_v0 = vadd.f32 %v1867_v30, %v1744_v31  ;;  %v2012_v17 = vadd.f32 %v1995_v60, %v1882_v32 }
 0x3e2   :  { %v1871_v58 = vpop.f32.mrf.mxu0  ;;  %v2001_v18 = vpop.f32.mrf.mxu1  ;;  %v2013_v8 = vadd.f32 %v1997_v11, %v1883_v0 }
 0x3e3   :  { %v1884_v46 = vadd.f32 %v1871_v58, %v1748_v59 }
 0x3e4   :  { %v1873_v10 = vpop.f32.mrf.mxu0  ;;  %v2003_v5 = vpop.f32.mrf.mxu1 }
 0x3e5   :  { %v1885_v45 = vadd.f32 %v1873_v10, %v1750_v44  ;;  %v2014_v38 = vadd.f32 %v2001_v18, %v1884_v46  ;;  %v2172_v44 = vld [vmem:[%s5940_s9 + $0x8] sm:$0x3] }
 0x3e6   :  { %v2007_v1 = vpop.f32.mrf.mxu1  ;;  %v2174_v46 = vld [vmem:[%s5941_s10 + $0x8] sm:$0x3] }
 0x3e7   :  { %v1877_v16 = vpop.f32.mrf.mxu0  ;;  %v2015_v22 = vadd.f32 %v2003_v5, %v1885_v45  ;;  %v2568_v5 = vld [vmem:[%s5944_s13 + $0x48] sm:$0xff]  ;;  %v2563_v45 = vld [vmem:[%s5944_s13 + $0x20] sm:$0xff] }
 0x3e8   :  { %v1886_v20 = vadd.f32 %v1877_v16, %v1754_v36  ;;  %v2009_v51 = vpop.f32.mrf.mxu1  ;;  %v2564_v36 = vld [vmem:[%s5944_s13 + $0x28] sm:$0xff] }
 0x3e9   :  { %v1879_v34 = vpop.f32.mrf.mxu0 }
 0x3ea   :  { %v1887_v24 = vadd.f32 %v1879_v34, %v1756_v37  ;;  %v2016_v2 = vadd.f32 %v2007_v1, %v1886_v20  ;;  %v3566_v37 = vld [vmem:[%s5944_s13 + $0x60] sm:$0xff]  ;;  %v3565_v20 = vld [vmem:[%s5944_s13 + $0x58] sm:$0xff]  ;;  %v3564_v1 = vld [vmem:[%s5944_s13 + $0x50] sm:$0xff] }
 0x3ec   :  { %v2017_v6 = vadd.f32 %v2009_v51, %v1887_v24 }
 0x3f5   :  { %v2125_v4 = vpop.f32.mrf.mxu0 }
 0x3f6   :  { %v2142_v62 = vadd.f32 %v2125_v4, %v2012_v17  ;;  %v2173_v17 = vld [vmem:[%s5941_s10] sm:$0xff] }
 0x3f7   :  { %v2127_v12 = vpop.f32.mrf.mxu0  ;;  %v2567_v4 = vld [vmem:[%s5944_s13 + $0x40] sm:$0xff] }
 0x3f8   :  { %v2143_v63 = vadd.f32 %v2127_v12, %v2013_v8  ;;  %v2159_v50 = vadd.f32 %v2152_v47, %v2142_v62  ;;  %v3568_v8 = vld [vmem:[%s5944_s13 + $0x70] sm:$0xff]  ;;  %v3567_v62 = vld [vmem:[%s5944_s13 + $0x68] sm:$0xff]  ;;  %v2562_v12 = vld [vmem:[%s5944_s13 + $0x18] sm:$0xff] }
 0x3f9   :  { %v2131_v21 = vpop.f32.mrf.mxu0 }
 0x3fa   :  { %v2160_v43 = vadd.f32 %v2156_v35, %v2143_v63  ;;  %v2144_v39 = vadd.f32 %v2131_v21, %v2014_v38  ;;  %v2165_v52 = vmax.f32 %v2159_v50, 0.0  ;;  %v2561_v38 = vld [vmem:[%s5944_s13 + $0x10] sm:$0xff]  ;;  %v2560_v63 = vld [vmem:[%s5944_s13 + $0x8] sm:$0xff]  ;;  %v2559_v50 = vld [vmem:[%s5944_s13] sm:$0xff] }
 0x3fb   :  { %v2133_v40 = vpop.f32.mrf.mxu0 }
 0x3fc   :  { %v2166_v23 = vmax.f32 %v2160_v43, 0.0  ;;  %v2145_v49 = vadd.f32 %v2133_v40, %v2015_v22  ;;  %v2161_v41 = vadd.f32 %v2152_v47, %v2144_v39 }
 0x3fd   :  { %v2137_v42 = vpop.f32.mrf.mxu0 }
 0x3fe   :  { %v2162_v53 = vadd.f32 %v2156_v35, %v2145_v49  ;;  %v2146_v55 = vadd.f32 %v2137_v42, %v2016_v2  ;;  %3554 = vmatprep.mubr.msk.f32.mxu1 %vm2215_vm6, %v2166_v23  ;;  %3557 = vmatprep.mubr.msk.f32.mxu0 %vm2215_vm6, %v2166_v23  ;;  %v2167_v54 = vmax.f32 %v2161_v41, 0.0  ;;  %v3585_v2 = vld [vmem:[%s5944_s13 + $0xe8] sm:$0xff]  ;;  %v3596_v23 = vld [vmem:[%s5944_s13 + $0x138] sm:$0xff]  ;;  %v3595_v41 = vld [vmem:[%s5944_s13 + $0x130] sm:$0xff] }
 0x3ff   :  { %v2139_v14 = vpop.f32.mrf.mxu0  ;;  %2290 = vmatmul.mubr.f32.vlgmr.msra.gmra.mxu1 %v2165_v52  ;;  %2370 = vmatmul.mubr.f32.vlgmr.msra.gmra.mxu0 %v2165_v52  ;;  %v3584_v52 = vld [vmem:[%s5944_s13 + $0xe0] sm:$0xff]  ;;  %v3583_v42 = vld [vmem:[%s5944_s13 + $0xd8] sm:$0xff] }
 0x400   :  { %v2168_v25 = vmax.f32 %v2162_v53, 0.0  ;;  %v2147_v26 = vadd.f32 %v2139_v14, %v2017_v6  ;;  %v2163_v3 = vadd.f32 %v2152_v47, %v2146_v55  ;;  %3799 = vmatpush3.msra.mxu0 %v3573_v9  ;;  %v3570_v47 = vld [vmem:[%s5944_s13 + $0x80] sm:$0xff]  ;;  %v3594_v6 = vld [vmem:[%s5944_s13 + $0x128] sm:$0xff]  ;;  %v3582_v53 = vld [vmem:[%s5944_s13 + $0xd0] sm:$0xff] }
 0x401   :  { %3800 = vmatprep.subr.mxu0 %v5977_v61  ;;  %v3593_v55 = vld [vmem:[%s5944_s13 + $0x120] sm:$0xff]  ;;  %v3581_v14 = vld [vmem:[%s5944_s13 + $0xc8] sm:$0xff]  ;;  %v3588_v9 = vld [vmem:[%s5944_s13 + $0xf8] sm:$0xff] }
 0x402   :  { %v2164_v15 = vadd.f32 %v2156_v35, %v2147_v26  ;;  %3555 = vmatprep.mubr.msk.f32.mxu1 %vm2215_vm6, %v2168_v25  ;;  %3558 = vmatprep.mubr.msk.f32.mxu0 %vm2215_vm6, %v2168_v25  ;;  %v2169_v28 = vmax.f32 %v2163_v3, 0.0  ;;  %v3569_v35 = vld [vmem:[%s5944_s13 + $0x78] sm:$0xff]  ;;  %v3580_v26 = vld [vmem:[%s5944_s13 + $0xc0] sm:$0xff] }
 0x403   :  { %2295 = vmatmul.mubr.f32.gmra.mxu1 %v2167_v54  ;;  %2375 = vmatmul.mubr.f32.gmra.mxu0 %v2167_v54  ;;  %v3592_v25 = vld [vmem:[%s5944_s13 + $0x118] sm:$0xff]  ;;  %v3591_v54 = vld [vmem:[%s5944_s13 + $0x110] sm:$0xff] }
 0x404   :  { %v2170_v27 = vmax.f32 %v2164_v15, 0.0  ;;  %3801 = vmatpush3.msra.mxu0 %v3572_v29  ;;  %v3579_v3 = vld [vmem:[%s5944_s13 + $0xb8] sm:$0xff]  ;;  %v3590_v15 = vld [vmem:[%s5944_s13 + $0x108] sm:$0xff]  ;;  %v3576_v29 = vld [vmem:[%s5944_s13 + $0xa0] sm:$0xff] }
 0x405   :  { %3802 = vmatprep.subr.mxu0 %v5977_v61 }
 0x406   :  { %3556 = vmatprep.mubr.msk.f32.mxu1 %vm2215_vm6, %v2170_v27  ;;  %3559 = vmatprep.mubr.msk.f32.mxu0 %vm2215_vm6, %v2170_v27  ;;  %v3578_v27 = vld [vmem:[%s5944_s13 + $0xb0] sm:$0xff] }
 0x407   :  { %2300 = vmatmul.mubr.f32.gmra.mxu1 %v2169_v28  ;;  %2380 = vmatmul.mubr.f32.gmra.mxu0 %v2169_v28  ;;  %v3589_v28 = vld [vmem:[%s5944_s13 + $0x100] sm:$0xff] }
 0x408   :  { %3786 = vmatprep.mubr.msk.f32.mxu1 %vm2388_vm7, %v2171_v56  ;;  %3803 = vmatpush3.msra.mxu0 %v3571_v7  ;;  %v3577_v56 = vld [vmem:[%s5944_s13 + $0xa8] sm:$0xff] }
 0x409   :  { %3804 = vmatprep.subr.mxu0 %v5977_v61  ;;  %3818 = vmatprep.mubr.msk.f32.mxu0 %vm4002_vm8, %v5977_v61 }
 0x40a   :  { %3805 = vmatpush3.msra.mxu0 %v3570_v47 }
 0x40b   :  { %3806 = vmatprep.subr.mxu0 %v5977_v61 }
 0x40c   :  { %3807 = vmatpush3.msra.mxu0 %v3569_v35 }
 0x40d   :  { %3808 = vmatprep.subr.mxu0 %v5977_v61 }
 0x40e   :  { %3809 = vmatpush3.msra.mxu0 %v3568_v8 }
 0x40f   :  { %3810 = vmatprep.subr.mxu0 %v5977_v61 }
 0x410   :  { %3811 = vmatpush3.msra.mxu0 %v3567_v62 }
 0x411   :  { %3812 = vmatprep.subr.mxu0 %v5977_v61 }
 0x412   :  { %3813 = vmatpush3.msra.mxu0 %v3566_v37 }
 0x413   :  { %3814 = vmatprep.subr.mxu0 %v5977_v61 }
 0x414   :  { %3815 = vmatpush3.msra.mxu0 %v3565_v20  ;;  %v3086_v20 = vld [vmem:[%s5946_s15 + $0x70] sm:$0xff] }
 0x415   :  { %3816 = vmatprep.subr.mxu0 %v5977_v61 }
 0x416   :  { %3817 = vmatpush3.msra.mxu0 %v3564_v1  ;;  %v3084_v1 = vld [vmem:[%s5946_s15 + $0x60] sm:$0xff] }
 0x417   :  { %3844 = vmatprep.subr.mxu0 %v5977_v61 }
 0x4bf   :  { %v2291_v30 = vpop.f32.mrf.mxu1  ;;  %v2371_v57 = vpop.f32.mrf.mxu0 }
 0x4c0   :  { %v2385_v34 = vmax.f32 %v2291_v30, %v2371_v57  ;;  %v3587_v30 = vld [vmem:[%s5944_s13 + $0xf0] sm:$0xff] }
 0x4c1   :  { %v2293_v58 = vpop.f32.mrf.mxu1  ;;  %v2373_v60 = vpop.f32.mrf.mxu0 }
 0x4c2   :  { %v3607_v60 = vld [vmem:[%s5944_s13 + $0x188] sm:$0xff] }
 0x4c3   :  { %v2296_v10 = vpop.f32.mrf.mxu1  ;;  %v2376_v11 = vpop.f32.mrf.mxu0 }
 0x4c4   :  { %v2386_v33 = vmax.f32 %v2296_v10, %v2376_v11  ;;  %v3606_v10 = vld [vmem:[%s5944_s13 + $0x180] sm:$0xff]  ;;  %v3605_v11 = vld [vmem:[%s5944_s13 + $0x178] sm:$0xff] }
 0x4c5   :  { %v2298_v13 = vpop.f32.mrf.mxu1  ;;  %v2378_v16 = vpop.f32.mrf.mxu0 }
 0x4c6   :  { %v3604_v13 = vld [vmem:[%s5944_s13 + $0x170] sm:$0xff]  ;;  %v3603_v16 = vld [vmem:[%s5944_s13 + $0x168] sm:$0xff] }
 0x4c7   :  { %v2301_v31 = vpop.f32.mrf.mxu1  ;;  %v2381_v32 = vpop.f32.mrf.mxu0 }
 0x4c8   :  { %v2387_v18 = vmax.f32 %v2301_v31, %v2381_v32  ;;  %v3602_v31 = vld [vmem:[%s5944_s13 + $0x160] sm:$0xff]  ;;  %v3601_v32 = vld [vmem:[%s5944_s13 + $0x158] sm:$0xff] }
 0x4c9   :  { %v2303_v59 = vpop.f32.mrf.mxu1  ;;  %v2383_v0 = vpop.f32.mrf.mxu0 }
 0x4ca   :  { %3780 = vmatprep.subr.mxu1 %v2387_v18  ;;  %v3599_v59 = vld [vmem:[%s5944_s13 + $0x148] sm:$0xff]  ;;  %v3598_v0 = vld [vmem:[%s5944_s13 + $0x140] sm:$0xff] }
 0x4cb   :  { %3781 = vmatpush3.msra.mxu1 %v2387_v18 }
 0x4cc   :  { %3782 = vmatprep.subr.mxu1 %v2386_v33 }
 0x4cd   :  { %3783 = vmatpush3.msra.mxu1 %v2386_v33 }
 0x4ce   :  { %3784 = vmatprep.subr.mxu1 %v2385_v34 }
 0x4cf   :  { %3785 = vmatpush3.msra.mxu1 %v2385_v34 }
 0x4d0   :  { %3789 = vmatprep.subr.mxu1 %v2387_v18  ;;  %3787 = vmatmul.mubr.msk.f32.vlgmr.msra.gmra.mxu1 %vm2388_vm7, %v2172_v44 }
 0x4d1   :  { %3790 = vmatpush3.msra.mxu1 %v2387_v18  ;;  %3795 = vmatprep.mubr.msk.f32.mxu1 %vm2388_vm7, %v2173_v17  ;;  %v3600_v18 = vld [vmem:[%s5944_s13 + $0x150] sm:$0xff] }
 0x4d2   :  { %3791 = vmatprep.subr.mxu1 %v2386_v33 }
 0x4d3   :  { %3792 = vmatpush3.msra.mxu1 %v2386_v33 }
 0x4d4   :  { %3793 = vmatprep.subr.mxu1 %v2385_v34 }
 0x4d5   :  { %3794 = vmatpush3.msra.mxu1 %v2385_v34 }
 0x4d6   :  { %3796 = vmatmul.mubr.msk.f32.vlgmr.msra.gmra.mxu1 %vm2388_vm7, %v2174_v46  ;;  %3821 = vmatprep.subr.mxu1 %v5977_v61 }
 0x4d7   :  { %3822 = vmatpush3.msra.mxu1 %v2568_v5  ;;  %3841 = vmatprep.mubr.msk.f32.mxu1 %vm4002_vm8, %v5977_v61 }
 0x4d8   :  { %3823 = vmatprep.subr.mxu1 %v5977_v61 }
 0x4d9   :  { %3824 = vmatpush3.msra.mxu1 %v2567_v4 }
 0x4da   :  { %3825 = vmatprep.subr.mxu1 %v5977_v61 }
 0x4db   :  { %3826 = vmatpush3.msra.mxu1 %v2566_v19 }
 0x4dc   :  { %3827 = vmatprep.subr.mxu1 %v5977_v61 }
 0x4dd   :  { %3828 = vmatpush3.msra.mxu1 %v2565_v48 }
 0x4de   :  { %3829 = vmatprep.subr.mxu1 %v5977_v61 }
 0x4df   :  { %3830 = vmatpush3.msra.mxu1 %v2564_v36  ;;  %v3609_v36 = vld [vmem:[%s5945_s14] ss:$0 sm:$0xff] }
 0x4e0   :  { %3831 = vmatprep.subr.mxu1 %v5977_v61 }
 0x4e1   :  { %3832 = vmatpush3.msra.mxu1 %v2563_v45 }
 0x4e2   :  { %3833 = vmatprep.subr.mxu1 %v5977_v61 }
 0x4e3   :  { %3834 = vmatpush3.msra.mxu1 %v2562_v12 }
 0x4e4   :  { %3835 = vmatprep.subr.mxu1 %v5977_v61 }
 0x4e5   :  { %3836 = vmatpush3.msra.mxu1 %v2561_v38  ;;  %v2993_v38 = vld [vmem:[%s5950_s19] sm:$0x3]  ;;  %s3271_s19 = sshll.u32 %s4003_s11, 4  ;;  %s3272_s19 = int_to_ptr.vmem [resolvable:$true] %s3271_s19 }
 0x4e6   :  { %3837 = vmatprep.subr.mxu1 %v5977_v61  ;;  %p3984_p1 = scmp.lt.s32.totalorder %s3272_s19, %s3272_s19 }
 0x4e7   :  { %3838 = vmatpush3.msra.mxu1 %v2560_v63  ;;  %v3085_v63 = vld [vmem:[%s5946_s15 + $0x68] sm:$0xff] }
 0x4e8   :  { %3839 = vmatprep.subr.mxu1 %v5977_v61 }
 0x4e9   :  { %3840 = vmatpush3.msra.mxu1 %v2559_v50  ;;  %v3083_v50 = vld [vmem:[%s5946_s15 + $0x58] sm:$0xff] }
 0x4ea   :  { %3867 = vmatprep.subr.mxu1 %v5977_v61 }
 0x590   :  { %v3788_v21 = vpop.f32.mrf.mxu1 }
 0x592   :  { %v2461_v22 = vpop.f32.mrf.mxu1 }
 0x596   :  { %v3797_v24 = vpop.f32.mrf.mxu1 }
 0x597   :  { %v2552_v43 = vmax.f32 %v3788_v21, %v3797_v24  ;;  %v3082_v21 = vld [vmem:[%s5946_s15 + $0x50] sm:$0xff]  ;;  %v3080_v24 = vld [vmem:[%s5946_s15 + $0x40] sm:$0xff] }
 0x598   :  { %v2542_v39 = vpop.f32.mrf.mxu1 }
 0x599   :  { %2556 = vst.msk [vmem:[#allocation3 + $0x8] sm:$0x3] %vm2555_vm9, %v2552_v43  ;;  %v2551_v40 = vmax.f32 %v2461_v22, %v2542_v39  ;;  %v3081_v22 = vld [vmem:[%s5946_s15 + $0x48] sm:$0xff]  ;;  %v3079_v43 = vld [vmem:[%s5946_s15 + $0x38] sm:$0xff]  ;;  %v3078_v39 = vld [vmem:[%s5946_s15 + $0x30] sm:$0xff] }
 0x59b   :  { %2554 = vst.msk [vmem:[#allocation3] sm:$0xff] %vm2553_vm10, %v2551_v40  ;;  %v3077_v40 = vld [vmem:[%s5946_s15 + $0x28] sm:$0xff] }
 0x5a2   :  { %v2569_v49 = vld [vmem:[#allocation3 + $0x1] sm:$0x3f] }
 0x5a3   :  { %v2558_v51 = vld [vmem:[#allocation3] sm:$0x3f]  ;;  %3819 = vmatmul.mubr.msk.f32.vlgmr.msra.gmra.mxu0 %vm2553_vm10, %v2569_v49  ;;  %v3074_v49 = vld [vmem:[%s5946_s15 + $0x10] sm:$0xff] }
 0x5a4   :  { %3842 = vmatmul.mubr.msk.f32.vlgmr.msra.gmra.mxu1 %vm2553_vm10, %v2558_v51  ;;  %3845 = vmatpush3.msra.mxu0 %v3585_v2  ;;  %v2727_v57 = vld [vmem:[#allocation3 + $0x2] sm:$0x3f]  ;;  %v3073_v51 = vld [vmem:[%s5946_s15 + $0x8] sm:$0xff] }
 0x5a5   :  { %3868 = vmatpush3.msra.mxu1 %v3596_v23  ;;  %3846 = vmatprep.subr.mxu0 %v5977_v61  ;;  %v2813_v58 = vld [vmem:[#allocation3 + $0x3] sm:$0x3f]  ;;  %v3075_v23 = vld [vmem:[%s5946_s15 + $0x18] sm:$0xff] }
 0x5a6   :  { %3869 = vmatprep.subr.mxu1 %v5977_v61  ;;  %3847 = vmatpush3.msra.mxu0 %v3584_v52  ;;  %v2899_v33 = vld [vmem:[#allocation3 + $0x4] sm:$0x3f] }
 0x5a7   :  { %3870 = vmatpush3.msra.mxu1 %v3595_v41  ;;  %3848 = vmatprep.subr.mxu0 %v5977_v61  ;;  %v3076_v2 = vld [vmem:[%s5946_s15 + $0x20] sm:$0xff]  ;;  %v3179_v41 = vld [vmem:[%s5948_s17 + $0x50] sm:$0xf] }
 0x5a8   :  { %3871 = vmatprep.subr.mxu1 %v5977_v61  ;;  %3849 = vmatpush3.msra.mxu0 %v3583_v42  ;;  %v3072_v52 = vld [vmem:[%s5946_s15] sm:$0xff]  ;;  %v3178_v42 = vld [vmem:[%s5948_s17 + $0x48] sm:$0xff] }
 0x5a9   :  { %3872 = vmatpush3.msra.mxu1 %v3594_v6  ;;  %3850 = vmatprep.subr.mxu0 %v5977_v61  ;;  %v3177_v6 = vld [vmem:[%s5948_s17 + $0x40] sm:$0xff] }
 0x5aa   :  { %3873 = vmatprep.subr.mxu1 %v5977_v61  ;;  %3851 = vmatpush3.msra.mxu0 %v3582_v53  ;;  %v3176_v53 = vld [vmem:[%s5948_s17 + $0x38] sm:$0xff] }
 0x5ab   :  { %3874 = vmatpush3.msra.mxu1 %v3593_v55  ;;  %3852 = vmatprep.subr.mxu0 %v5977_v61  ;;  %v3175_v55 = vld [vmem:[%s5948_s17 + $0x30] sm:$0xff] }
 0x5ac   :  { %3875 = vmatprep.subr.mxu1 %v5977_v61  ;;  %3853 = vmatpush3.msra.mxu0 %v3581_v14  ;;  %v3174_v14 = vld [vmem:[%s5948_s17 + $0x28] sm:$0xff] }
 0x5ad   :  { %3876 = vmatpush3.msra.mxu1 %v3592_v25  ;;  %3854 = vmatprep.subr.mxu0 %v5977_v61  ;;  %v3173_v25 = vld [vmem:[%s5948_s17 + $0x20] sm:$0xff] }
 0x5ae   :  { %3877 = vmatprep.subr.mxu1 %v5977_v61  ;;  %3855 = vmatpush3.msra.mxu0 %v3580_v26  ;;  %v3172_v26 = vld [vmem:[%s5948_s17 + $0x18] sm:$0xff] }
 0x5af   :  { %3878 = vmatpush3.msra.mxu1 %v3591_v54  ;;  %3856 = vmatprep.subr.mxu0 %v5977_v61 }
 0x5b0   :  { %3879 = vmatprep.subr.mxu1 %v5977_v61  ;;  %3857 = vmatpush3.msra.mxu0 %v3579_v3 }
 0x5b1   :  { %3880 = vmatpush3.msra.mxu1 %v3590_v15  ;;  %3858 = vmatprep.subr.mxu0 %v5977_v61  ;;  %v3171_v15 = vld [vmem:[%s5948_s17 + $0x10] sm:$0xff] }
 0x5b2   :  { %3881 = vmatprep.subr.mxu1 %v5977_v61  ;;  %3859 = vmatpush3.msra.mxu0 %v3578_v27  ;;  %v3170_v27 = vld [vmem:[%s5948_s17 + $0x8] sm:$0xff] }
 0x5b3   :  { %3882 = vmatpush3.msra.mxu1 %v3589_v28  ;;  %3860 = vmatprep.subr.mxu0 %v5977_v61  ;;  %v3169_v28 = vld [vmem:[%s5948_s17] sm:$0xff]  ;;  %s3979_s17 = scalar_lea.vmem %s3272_s19, 32 }
 0x5b4   :  { %3883 = vmatprep.subr.mxu1 %v5977_v61  ;;  %3861 = vmatpush3.msra.mxu0 %v3577_v56  ;;  %v3612_v56 = vld [vmem:[%s5947_s16] ss:$0 sm:$0xff]  ;;  %p3980_p0 = scmp.ne.s32.totalorder %s3272_s19, %s3979_s17  ;;  %p3985_p2 = scmp.lt.s32.totalorder %s3979_s17, %s3979_s17 }
 0x5b5   :  { %3884 = vmatpush3.msra.mxu1 %v3588_v9  ;;  %3862 = vmatprep.subr.mxu0 %v5977_v61 }
 0x5b6   :  { %3885 = vmatprep.subr.mxu1 %v5977_v61  ;;  %3863 = vmatpush3.msra.mxu0 %v3576_v29  ;;  %p3986_p3 = por %p3985_p2, %p3984_p1 }
 0x5b7   :  { %3864 = vmatprep.mubr.msk.f32.mxu0 %vm4002_vm8, %v5977_v61  ;;  %3886 = vmatpush3.msra.mxu1 %v3587_v30 }
 0x5b8   :  { %3887 = vmatprep.mubr.msk.f32.mxu1 %vm4002_vm8, %v5977_v61  ;;  %3865 = vmatmul.mubr.msk.f32.vlgmr.msra.gmra.mxu0 %vm2553_vm10, %v2727_v57  ;;  %p3987_p4 = pnand %p3986_p3, %p3980_p0 }
 0x5b9   :  { %3888 = vmatmul.mubr.msk.f32.vlgmr.msra.gmra.mxu1 %vm2553_vm10, %v2813_v58  ;;  %3890 = vmatprep.subr.mxu0 %v5977_v61  ;;  %v3614_v58 = vld [vmem:[%s5949_s18] ss:$0 sm:$0xff] }
 0x5ba   :  { %3910 = vmatprep.mubr.msk.f32.mxu0 %vm4002_vm8, %v5977_v61  ;;  %3891 = vmatpush3.msra.mxu0 %v3607_v60 }
 0x5bb   :  { %3913 = vmatprep.subr.mxu1 %v5977_v61  ;;  %3892 = vmatprep.subr.mxu0 %v5977_v61 }
 0x5bc   :  { %3915 = vmatprep.mubr.msk.f32.mxu1 %vm4002_vm8, %v5977_v61  ;;  %3893 = vmatpush3.msra.mxu0 %v3606_v10 }
 0x5bd   :  { %3894 = vmatprep.subr.mxu0 %v5977_v61 }
 0x5be   :  { %3895 = vmatpush3.msra.mxu0 %v3605_v11 }
 0x5bf   :  { %3896 = vmatprep.subr.mxu0 %v5977_v61 }
 0x5c0   :  { %3897 = vmatpush3.msra.mxu0 %v3604_v13 }
 0x5c1   :  { %3898 = vmatprep.subr.mxu0 %v5977_v61 }
 0x5c2   :  { %3899 = vmatpush3.msra.mxu0 %v3603_v16 }
 0x5c3   :  { %3900 = vmatprep.subr.mxu0 %v5977_v61 }
 0x5c4   :  { %3901 = vmatpush3.msra.mxu0 %v3602_v31 }
 0x5c5   :  { %3902 = vmatprep.subr.mxu0 %v5977_v61 }
 0x5c6   :  { %3903 = vmatpush3.msra.mxu0 %v3601_v32 }
 0x5c7   :  { %3904 = vmatprep.subr.mxu0 %v5977_v61 }
 0x5c8   :  { %3905 = vmatpush3.msra.mxu0 %v3600_v18 }
 0x5c9   :  { %3906 = vmatprep.subr.mxu0 %v5977_v61 }
 0x5ca   :  { %3907 = vmatpush3.msra.mxu0 %v3599_v59 }
 0x5cb   :  { %3908 = vmatprep.subr.mxu0 %v5977_v61 }
 0x5cc   :  { %3909 = vmatpush3.msra.mxu0 %v3598_v0 }
 0x5cd   :  { %3911 = vmatmul.mubr.msk.f32.vlgmr.msra.gmra.mxu0 %vm2553_vm10, %v2899_v33  ;;  %3951 = vmatprep.subr.mxu0 %v5977_v61 }
 0x5ce   :  { %3973 = vmatprep.mubr.msk.f32.mxu0 %vm4002_vm8, %v5977_v61  ;;  %3952 = vmatpush3.msk.msra.mxu0 %vm1314_vm3, %v3179_v41 }
 0x5cf   :  { %3953 = vmatprep.subr.mxu0 %v5977_v61 }
 0x5d0   :  { %3954 = vmatpush3.msra.mxu0 %v3178_v42 }
 0x5d1   :  { %3955 = vmatprep.subr.mxu0 %v5977_v61 }
 0x5d2   :  { %3956 = vmatpush3.msra.mxu0 %v3177_v6 }
 0x5d3   :  { %3957 = vmatprep.subr.mxu0 %v5977_v61 }
 0x5d4   :  { %3958 = vmatpush3.msra.mxu0 %v3176_v53 }
 0x5d5   :  { %3959 = vmatprep.subr.mxu0 %v5977_v61 }
 0x5d6   :  { %3960 = vmatpush3.msra.mxu0 %v3175_v55 }
 0x5d7   :  { %3961 = vmatprep.subr.mxu0 %v5977_v61 }
 0x5d8   :  { %3962 = vmatpush3.msra.mxu0 %v3174_v14 }
 0x5d9   :  { %3963 = vmatprep.subr.mxu0 %v5977_v61 }
 0x5da   :  { %3964 = vmatpush3.msra.mxu0 %v3173_v25 }
 0x5db   :  { %3965 = vmatprep.subr.mxu0 %v5977_v61 }
 0x5dc   :  { %3966 = vmatpush3.msra.mxu0 %v3172_v26 }
 0x5dd   :  { %3967 = vmatprep.subr.mxu0 %v5977_v61 }
 0x5de   :  { %3968 = vmatpush3.msra.mxu0 %v3171_v15 }
 0x5df   :  { %3969 = vmatprep.subr.mxu0 %v5977_v61 }
 0x5e0   :  { %3970 = vmatpush3.msra.mxu0 %v3170_v27 }
 0x5e1   :  { %3971 = vmatprep.subr.mxu0 %v5977_v61 }
 0x5e2   :  { %3972 = vmatpush3.msra.mxu0 %v3169_v28 }
 0x663   :  { %v2650_v34 = vpop.f32.mrf.mxu0 }
 0x664   :  { %v2723_v44 = vpop.f32.mrf.mxu1 }
 0x665   :  { %v3820_v17 = vpop.f32.mrf.mxu0  ;;  %v2724_v47 = vadd.f32 %v2723_v44, %v2650_v34 }
 0x666   :  { %v3843_v46 = vpop.f32.mrf.mxu1 }
 0x678   :  { %v2808_v5 = vpop.f32.mrf.mxu0 }
 0x679   :  { %v2894_v4 = vpop.f32.mrf.mxu1  ;;  %v2812_v48 = vadd.f32 %v2808_v5, %v2724_v47 }
 0x67a   :  { %v3866_v7 = vpop.f32.mrf.mxu0 }
 0x67b   :  { %v3889_v19 = vpop.f32.mrf.mxu1  ;;  %v2898_v35 = vadd.f32 %v2894_v4, %v2812_v48 }
 0x68d   :  { %v2980_v8 = vpop.f32.mrf.mxu0 }
 0x68e   :  { %v2984_v45 = vadd.f32 %v2980_v8, %v2898_v35 }
 0x68f   :  { %v3912_v62 = vpop.f32.mrf.mxu0 }
 0x690   :  { %v2991_v12 = vadd.f32 %v3609_v36, %v2984_v45 }
 0x692   :  { %v2992_v37 = vmax.f32 %v2991_v12, 0.0 }
 0x694   :  { %3914 = vmatpush3.msk.msra.mxu1 %vm2998_vm11, %v2992_v37 }
 0x695   :  { %3916 = vmatmul.mubr.msk.f32.vlgmr.msra.gmra.mxu1 %vm2994_vm12, %v2993_v38  ;;  %3918 = vmatprep.subr.mxu1 %v5977_v61 }
 0x696   :  { %3919 = vmatpush3.msra.mxu1 %v3086_v20  ;;  %3948 = vmatprep.mubr.msk.f32.mxu1 %vm4002_vm8, %v5977_v61 }
 0x697   :  { %3920 = vmatprep.subr.mxu1 %v5977_v61 }
 0x698   :  { %3921 = vmatpush3.msra.mxu1 %v3085_v63 }
 0x699   :  { %3922 = vmatprep.subr.mxu1 %v5977_v61 }
 0x69a   :  { %3923 = vmatpush3.msra.mxu1 %v3084_v1 }
 0x69b   :  { %3924 = vmatprep.subr.mxu1 %v5977_v61 }
 0x69c   :  { %3925 = vmatpush3.msra.mxu1 %v3083_v50 }
 0x69d   :  { %3926 = vmatprep.subr.mxu1 %v5977_v61 }
 0x69e   :  { %3927 = vmatpush3.msra.mxu1 %v3082_v21 }
 0x69f   :  { %3928 = vmatprep.subr.mxu1 %v5977_v61 }
 0x6a0   :  { %3929 = vmatpush3.msra.mxu1 %v3081_v22 }
 0x6a1   :  { %3930 = vmatprep.subr.mxu1 %v5977_v61 }
 0x6a2   :  { %3931 = vmatpush3.msra.mxu1 %v3080_v24 }
 0x6a3   :  { %3932 = vmatprep.subr.mxu1 %v5977_v61 }
 0x6a4   :  { %3933 = vmatpush3.msra.mxu1 %v3079_v43 }
 0x6a5   :  { %3934 = vmatprep.subr.mxu1 %v5977_v61 }
 0x6a6   :  { %3935 = vmatpush3.msra.mxu1 %v3078_v39 }
 0x6a7   :  { %3936 = vmatprep.subr.mxu1 %v5977_v61 }
 0x6a8   :  { %3937 = vmatpush3.msra.mxu1 %v3077_v40 }
 0x6a9   :  { %3938 = vmatprep.subr.mxu1 %v5977_v61 }
 0x6aa   :  { %3939 = vmatpush3.msra.mxu1 %v3076_v2 }
 0x6ab   :  { %3940 = vmatprep.subr.mxu1 %v5977_v61 }
 0x6ac   :  { %3941 = vmatpush3.msra.mxu1 %v3075_v23 }
 0x6ad   :  { %3942 = vmatprep.subr.mxu1 %v5977_v61 }
 0x6ae   :  { %3943 = vmatpush3.msra.mxu1 %v3074_v49 }
 0x6af   :  { %3944 = vmatprep.subr.mxu1 %v5977_v61 }
 0x6b0   :  { %3945 = vmatpush3.msra.mxu1 %v3073_v51 }
 0x6b1   :  { %3946 = vmatprep.subr.mxu1 %v5977_v61 }
 0x6b2   :  { %3947 = vmatpush3.msra.mxu1 %v3072_v52 }
 0x755   :  { %v3068_v54 = vpop.f32.mrf.mxu1 }
 0x756   :  { %3949 = vmatmul.mubr.msk.f32.vlgmr.msra.gmra.mxu1 %vm3094_vm13, %v3068_v54 }
 0x757   :  { %v3917_v3 = vpop.f32.mrf.mxu1 }
 0x816   :  { %v3164_v9 = vpop.f32.mrf.mxu1 }
 0x817   :  { %v3165_v29 = vadd.f32 %v3612_v56, %v3164_v9 }
 0x818   :  { %v3950_v30 = vpop.f32.mrf.mxu1 }
 0x819   :  { %v3168_v57 = vmax.f32 %v3165_v29, 0.0 }
 0x81b   :  { %3974 = vmatmul.mubr.msk.f32.vlgmr.msra.gmra.mxu0 %vm1504_vm4, %v3168_v57 }
 0x8db   :  { %v3259_v61 = vpop.f32.mrf.mxu0 }
 0x8dc   :  { %v3260_v60 = vadd.f32 %v3614_v58, %v3259_v61 }
 0x8dd   :  { %v3975_v10 = vpop.f32.mrf.mxu0 }
 0x8de   :  { %3264 = vst.msk [vmem:[#allocation4] sm:$0x3] %vm3263_vm14, %v3260_v60 }
 0x8df   :  { %3990 = shalt.err (!%p3987_p4)
}
 0x8e0   :  { %3274 = dma.vmem_to_hbm [thread:$0]  %s3272_s19, 32, %s5951_s20, [#allocation5]  }
 0x8e1   :  { %3999 = dma.done.wait [#allocation5], 32  }
 0x8e2   :  { %4000 = vsyncadd [#allocation5], 4294967264 }
 0x8e3   :  { %3278 = vsyncpa [#allocation5], 1 }

</bundles_post_ra>
